<compile_context>
chip_gen: v7x
topology: tpu7x:2x2x1
jax: 0.10.0
libtpu: 0.0.40
codegen_flags: <defaults>
</compile_context>

<pallas_src>
import functools

import jax
import jax.numpy as jnp
from jax.experimental import pallas as pl
from jax.experimental.pallas import tpu as pltpu

# Set to jnp.bfloat16 on v6e/v7x for 2x MXU throughput and half the HBM/VMEM
# bytes (accumulation stays f32 via preferred_element_type, epilogue stays f32
# which is also what v5e needs).  Kept at f32 here to match PyTorch numerics.
COMPUTE_DTYPE = jnp.float32


def _round8(n):
    return ((n + 7) // 8) * 8


# ---------------------------------------------------------------------------
# In-kernel helpers (traced inside the Pallas kernels)
# ---------------------------------------------------------------------------
def _im2col(h, k):
    """h: (C, L) -> (k*C, L) with row t*C + c, col l == h[c, l + t - (k-1)//2]
    (zero outside [0, L)).  Built from lane rotations + iota masks — matches
    PyTorch Conv1d(padding=k//2) for odd kernel lengths (torch_ecg default)."""
    c, l = h.shape
    pad_l = (k - 1) // 2
    col = jax.lax.broadcasted_iota(jnp.int32, (c, l), 1)
    taps = []
    for t in range(k):
        shift = pad_l - t  # static python int
        rolled = h if shift % l == 0 else pltpu.roll(h, shift % l, 1)
        mask = (col >= shift) & (col < l + shift)
        taps.append(jnp.where(mask, rolled, jnp.zeros_like(rolled)))
    return jnp.concatenate(taps, axis=0)


def _conv_step(h, w, s, b, k, relu):
    """conv1d('same') as ONE im2col MXU matmul + folded conv-bias/BN affine."""
    y = jnp.dot(w, _im2col(h.astype(w.dtype), k),
                preferred_element_type=jnp.float32)
    y = y * s + b
    return jnp.maximum(y, 0.0) if relu else y


# ---------------------------------------------------------------------------
# Pallas kernels (one per UNet block)
# ---------------------------------------------------------------------------
def _block_kernel(*refs, pool_scale, ks, relus):
    """Fused [optional MaxPool1d(pool_scale)] + Conv_Bn_Activation chain.
    One grid step = one batch element; intermediates never touch HBM."""
    x_ref, o_ref = refs[0], refs[-1]
    idx = 1
    h = x_ref[0]                                            # (Cin_pad, L)
    if pool_scale > 1:
        # MaxPool1d(kernel=stride=pool_scale) via column-select 0/1 matmuls:
        # keeps L on the lane axis, avoids lane-strided gathers.
        sel_ref = refs[idx]
        idx += 1
        p = jnp.dot(h, sel_ref[0], preferred_element_type=jnp.float32)
        for i in range(1, pool_scale):
            p = jnp.maximum(
                p, jnp.dot(h, sel_ref[i], preferred_element_type=jnp.float32))
        h = p
    for ci, (k, relu) in enumerate(zip(ks, relus)):
        w = refs[idx + 3 * ci][...]
        s = refs[idx + 3 * ci + 1][...]
        b = refs[idx + 3 * ci + 2][...]
        h = _conv_step(h, w, s, b, k, relu)
    o_ref[0] = h.astype(o_ref.dtype)


def _up_block_kernel(skip_ref, up_ref, e_ref, wsk_ref, wup_ref, s0_ref, b0_ref,
                     *rest, k0, ks, relus):
    """Fused UpDoubleConv: nearest-upsample + F.pad (0/1 expansion matmul),
    skip 'concat' as two weight slabs feeding one accumulator, then the conv
    chain.  The last up block also carries the model's out_conv in ks/relus."""
    o_ref = rest[-1]
    # nn.Upsample(nearest) + F.pad expressed as up_in @ E  (E is 0/1, (L_up, L)).
    up_full = jnp.dot(up_ref[0], e_ref[...], preferred_element_type=jnp.float32)
    # First conv of the DoubleConv: torch.cat([skip, up], dim=1) never exists.
    h = jnp.dot(wsk_ref[...], _im2col(skip_ref[0], k0),
                preferred_element_type=jnp.float32)
    h += jnp.dot(wup_ref[...], _im2col(up_full.astype(wup_ref.dtype), k0),
                 preferred_element_type=jnp.float32)
    h = jnp.maximum(h * s0_ref[...] + b0_ref[...], 0.0)
    for ci, (k, relu) in enumerate(zip(ks, relus)):
        w = rest[3 * ci][...]
        s = rest[3 * ci + 1][...]
        b = rest[3 * ci + 2][...]
        h = _conv_step(h, w, s, b, k, relu)
    o_ref[0] = h.astype(o_ref.dtype)


# ---------------------------------------------------------------------------
# Wrappers
# ---------------------------------------------------------------------------
def _pool_select_matrix(l_in, scale):
    """(scale, L_in, L_out) 0/1 matrices: x @ S[i] selects columns j*scale+i."""
    l_out = l_in // scale
    l_idx = jnp.arange(l_in)[:, None]
    j_idx = jnp.arange(l_out)[None, :]
    return jnp.stack(
        [(l_idx == j_idx * scale + i).astype(jnp.float32) for i in range(scale)], 0)


def _nearest_expand_matrix(l_up, scale, l_out):
    """(L_up, L_out) 0/1 matrix realizing nn.Upsample(nearest, scale) followed
    by F.pad(diff//2, diff - diff//2), as up_in @ E."""
    diff = l_out - l_up * scale
    pad_left = diff // 2
    l_idx = jnp.arange(l_out)
    src = (l_idx - pad_left) // scale
    valid = (l_idx >= pad_left) & (l_idx < pad_left + l_up * scale)
    e = (src[None, :] == jnp.arange(l_up)[:, None]) & valid[None, :]
    return e.astype(jnp.float32)


def _weight_specs(p_list):
    ops, specs = [], []
    for p in p_list:
        ops += [p["w"].astype(COMPUTE_DTYPE), p["s"], p["b"]]
        specs += [pl.BlockSpec(p["w"].shape, lambda i: (0, 0)),
                  pl.BlockSpec(p["s"].shape, lambda i: (0, 0)),
                  pl.BlockSpec(p["b"].shape, lambda i: (0, 0))]
    return ops, specs


def fused_conv_block(x, convs, *, pool_scale=1):
    """[optional MaxPool1d] + DoubleConv as one pallas_call.
    x: (B, Cin_pad, L) -> (B, Cout_pad, L // pool_scale)."""
    b, c_in, l = x.shape
    l_out = l // pool_scale
    c_out = convs[-1]["w"].shape[0]
    ks = tuple(p["k"] for p in convs)
    relus = tuple(p["relu"] for p in convs)

    operands = [x.astype(COMPUTE_DTYPE)]
    in_specs = [pl.BlockSpec((1, c_in, l), lambda i: (i, 0, 0))]
    if pool_scale > 1:
        sel = _pool_select_matrix(l, pool_scale).astype(COMPUTE_DTYPE)
        operands.append(sel)
        in_specs.append(pl.BlockSpec(sel.shape, lambda i: (0, 0, 0)))
    w_ops, w_specs = _weight_specs(convs)
    operands += w_ops
    in_specs += w_specs

    # TODO(synk): for realistic ECG seq_len add an L-tile grid axis with halos.
    return pl.pallas_call(
        functools.partial(_block_kernel, pool_scale=pool_scale, ks=ks, relus=relus),
        out_shape=jax.ShapeDtypeStruct((b, c_out, l_out), jnp.float32),
        grid=(b,),
        in_specs=in_specs,
        out_specs=pl.BlockSpec((1, c_out, l_out), lambda i: (i, 0, 0)),
        compiler_params=pltpu.CompilerParams(dimension_semantics=("parallel",)),
    )(*operands)


def fused_up_block(skip, up_in, first, rest, up_scale):
    """UpDoubleConv (+ fused out_conv on the last block) as one pallas_call.
    skip: (B, Cs_pad, L); up_in: (B, Cu_pad, L_up) -> (B, Cout_pad, L)."""
    b, cs, l = skip.shape
    _, cu, l_up = up_in.shape
    e = _nearest_expand_matrix(l_up, up_scale, l).astype(COMPUTE_DTYPE)
    c_out = rest[-1]["w"].shape[0]
    ks = tuple(p["k"] for p in rest)
    relus = tuple(p["relu"] for p in rest)

    operands = [skip.astype(COMPUTE_DTYPE), up_in.astype(COMPUTE_DTYPE), e,
                first["w_skip"].astype(COMPUTE_DTYPE),
                first["w_up"].astype(COMPUTE_DTYPE), first["s"], first["b"]]
    in_specs = [pl.BlockSpec((1, cs, l), lambda i: (i, 0, 0)),
                pl.BlockSpec((1, cu, l_up), lambda i: (i, 0, 0)),
                pl.BlockSpec(e.shape, lambda i: (0, 0)),
                pl.BlockSpec(first["w_skip"].shape, lambda i: (0, 0)),
                pl.BlockSpec(first["w_up"].shape, lambda i: (0, 0)),
                pl.BlockSpec(first["s"].shape, lambda i: (0, 0)),
                pl.BlockSpec(first["b"].shape, lambda i: (0, 0))]
    w_ops, w_specs = _weight_specs(rest)
    operands += w_ops
    in_specs += w_specs

    return pl.pallas_call(
        functools.partial(_up_block_kernel, k0=first["k"], ks=ks, relus=relus),
        out_shape=jax.ShapeDtypeStruct((b, c_out, l), jnp.float32),
        grid=(b,),
        in_specs=in_specs,
        out_specs=pl.BlockSpec((1, c_out, l), lambda i: (i, 0, 0)),
        compiler_params=pltpu.CompilerParams(dimension_semantics=("parallel",)),
    )(*operands)


# ---------------------------------------------------------------------------
# Model forward
# ---------------------------------------------------------------------------
def ecg_unet_forward(x_ncl, params, cfg):
    """x_ncl: (batch, n_leads, seq_len) -> (batch, seq_len, n_classes).
    The PyTorch NCL input layout is already channels-on-sublanes /
    length-on-lanes, so no entry transpose is needed."""
    x = x_ncl.astype(jnp.float32)
    c_in_pad = _round8(cfg["n_leads"])
    if c_in_pad != x.shape[1]:
        x = jnp.pad(x, ((0, 0), (0, c_in_pad - x.shape[1]), (0, 0)))

    n = cfg["down_up_block_num"]
    to_concat = [fused_conv_block(x, params["init"])]
    for idx in range(n):
        to_concat.append(
            fused_conv_block(to_concat[-1], params[f"down_{idx}"],
                             pool_scale=cfg["down_scales"][idx]))

    up_input = to_concat[-1]
    skips = to_concat[-2::-1]
    for idx in range(n):
        first, rest = params[f"up_{idx}"]
        up_input = fused_up_block(skips[idx], up_input, first, rest,
                                  cfg["up_scales"][idx])

    # Last up block already carries the fused out_conv (lane-dense (C, L)
    # store); strip zero channel padding and apply torch's permute(0, 2, 1).
    out = up_input[:, : cfg["n_classes"], :]
    return jnp.transpose(out, (0, 2, 1))


# ---------------------------------------------------------------------------
# Deterministic parameter construction
# ---------------------------------------------------------------------------
def _flatten_padded(w_part):
    """(Cout, Cin, k) torch layout -> (round8(Cout), k*round8(Cin)), column
    order t-major / channel-minor to match _im2col, zero padded."""
    c_out, c_in, k = w_part.shape
    co_p, ci_p = _round8(c_out), _round8(c_in)
    w_p = jnp.zeros((co_p, ci_p, k), jnp.float32).at[:c_out, :c_in, :].set(w_part)
    return jnp.transpose(w_p, (0, 2, 1)).reshape(co_p, k * ci_p)


def _pad_vec(v, c_out):
    return jnp.zeros((_round8(c_out), 1), jnp.float32).at[:c_out, 0].set(v)


def _rand_conv(key, c_in, c_out, k, *, bn=True):
    kw, kb, kg, kbt = jax.random.split(key, 4)
    w = jax.random.normal(kw, (c_out, c_in, k), jnp.float32) * (2.0 / (c_in * k)) ** 0.5
    conv_b = 0.01 * jax.random.normal(kb, (c_out,), jnp.float32)
    if bn:  # inference-mode BN folded into per-channel (scale, bias)
        gamma = 1.0 + 0.05 * jax.random.normal(kg, (c_out,), jnp.float32)
        beta = 0.05 * jax.random.normal(kbt, (c_out,), jnp.float32)
        rmean = jnp.zeros((c_out,), jnp.float32)
        rvar = jnp.ones((c_out,), jnp.float32)
        bn_scale = gamma * jax.lax.rsqrt(rvar + 1e-5)
        scale = bn_scale
        bias = conv_b * bn_scale + (beta - rmean * bn_scale)
    else:
        scale = jnp.ones((c_out,), jnp.float32)
        bias = conv_b
    return w, scale, bias


def _make_conv(key, c_in, c_out, k, *, bn=True, relu=True):
    w, scale, bias = _rand_conv(key, c_in, c_out, k, bn=bn)
    return dict(w=_flatten_padded(w), s=_pad_vec(scale, c_out),
                b=_pad_vec(bias, c_out), k=k, relu=relu,
                w_raw=w, s_raw=scale, b_raw=bias)


def _make_up_first_conv(key, c_skip, c_up, c_out, k):
    w, scale, bias = _rand_conv(key, c_skip + c_up, c_out, k, bn=True)
    return dict(w_skip=_flatten_padded(w[:, :c_skip, :]),
                w_up=_flatten_padded(w[:, c_skip:, :]),
                s=_pad_vec(scale, c_out), b=_pad_vec(bias, c_out), k=k,
                w_raw=w, s_raw=scale, b_raw=bias)


def build_params(key, cfg):
    params = {}
    keys = iter(jax.random.split(key, 64))
    n = cfg["down_up_block_num"]
    c0 = cfg["init_num_filters"]

    params["init"] = [
        _make_conv(next(keys), cfg["n_leads"], c0, cfg["init_filter_length"]),
        _make_conv(next(keys), c0, c0, cfg["init_filter_length"]),
    ]

    in_ch = c0
    for idx in range(n):
        out_ch = cfg["down_num_filters"][idx]
        k = cfg["down_filter_lengths"][idx]
        params[f"down_{idx}"] = [
            _make_conv(next(keys), in_ch, out_ch, k),
            _make_conv(next(keys), out_ch, out_ch, k),
        ]
        in_ch = out_ch

    skip_chs = [c0] + list(cfg["down_num_filters"])  # channels of to_concat[i]
    for idx in range(n):
        out_ch = cfg["up_num_filters"][idx]
        k = cfg["up_conv_filter_lengths"][idx]
        c_up = in_ch
        c_skip = skip_chs[n - 1 - idx]  # == in_ch // 2 for the vanilla config
        first = _make_up_first_conv(next(keys), c_skip, c_up, out_ch, k)
        rest = [_make_conv(next(keys), out_ch, out_ch, k)]
        if idx == n - 1:  # fuse the model's out_conv (no norm, no activation)
            rest.append(_make_conv(next(keys), out_ch, cfg["n_classes"],
                                   cfg["out_filter_length"], bn=False, relu=False))
        params[f"up_{idx}"] = (first, rest)
        in_ch = out_ch
    return params


# ---------------------------------------------------------------------------
# Pure-JAX reference (validation only)
# ---------------------------------------------------------------------------
def _ref_conv(x, w, scale, bias, relu):
    k = w.shape[-1]
    pad = (k - 1) // 2
    y = jax.lax.conv_general_dilated(
        x, w, window_strides=(1,), padding=[(pad, k - 1 - pad)],
        dimension_numbers=("NCH", "OIH", "NCH"),
        precision=jax.lax.Precision.HIGHEST)
    y = y * scale[None, :, None] + bias[None, :, None]
    return jnp.maximum(y, 0.0) if relu else y


def ecg_unet_reference(x, params, cfg):
    n = cfg["down_up_block_num"]

    def chain(h, convs):
        for p in convs:
            h = _ref_conv(h, p["w_raw"], p["s_raw"], p["b_raw"], p["relu"])
        return h

    to_concat = [chain(x, params["init"])]
    for idx in range(n):
        s = cfg["down_scales"][idx]
        h = to_concat[-1]
        lo = h.shape[-1] // s
        h = h[..., : lo * s].reshape(h.shape[0], h.shape[1], lo, s).max(-1)
        to_concat.append(chain(h, params[f"down_{idx}"]))

    up_input = to_concat[-1]
    skips = to_concat[-2::-1]
    for idx in range(n):
        first, rest = params[f"up_{idx}"]
        up = jnp.repeat(up_input, cfg["up_scales"][idx], axis=-1)
        skip = skips[idx]
        diff = skip.shape[-1] - up.shape[-1]
        up = jnp.pad(up, ((0, 0), (0, 0), (diff // 2, diff - diff // 2)))
        h = jnp.concatenate([skip, up], axis=1)
        h = _ref_conv(h, first["w_raw"], first["s_raw"], first["b_raw"], True)
        up_input = chain(h, rest)
    return jnp.transpose(up_input, (0, 2, 1))


# ---------------------------------------------------------------------------
if __name__ == "__main__":
    cfg = dict(
        n_leads=4,
        n_classes=3,
        seq_len=64,
        init_num_filters=8,
        init_filter_length=9,
        down_up_block_num=2,
        down_scales=[2, 2],
        down_num_filters=[16, 32],
        down_filter_lengths=[9, 9],
        up_scales=[2, 2],
        up_num_filters=[16, 8],
        up_conv_filter_lengths=[9, 9],
        out_filter_length=9,
    )

    key = jax.random.PRNGKey(0)
    kx, kp = jax.random.split(key)
    # PyTorch input layout: (batch_size, n_leads, seq_len)
    x = jax.random.normal(kx, (2, cfg["n_leads"], cfg["seq_len"]), jnp.float32)
    params = build_params(kp, cfg)

    fwd = jax.jit(lambda sig: ecg_unet_forward(sig, params, cfg))
    out = jax.block_until_ready(fwd(x))

    assert out.shape == (2, cfg["seq_len"], cfg["n_classes"]), out.shape
    assert out.dtype == jnp.float32

    ref = ecg_unet_reference(x, params, cfg)
    assert jnp.allclose(out, ref, rtol=2e-2, atol=2e-2), \
        float(jnp.max(jnp.abs(out - ref)))

    print("KERNEL_OK")
</pallas_src>

<mosaic_0001>
module attributes {stable_mosaic.version = 11 : i64} {
  func.func @_block_kernel(%arg0: i32, %arg1: memref<1x8x64xf32, #tpu.memory_space<vmem>>, %arg2: memref<2x64x32xf32, #tpu.memory_space<vmem>>, %arg3: memref<16x72xf32, #tpu.memory_space<vmem>>, %arg4: memref<16x1xf32, #tpu.memory_space<vmem>>, %arg5: memref<16x1xf32, #tpu.memory_space<vmem>>, %arg6: memref<16x144xf32, #tpu.memory_space<vmem>>, %arg7: memref<16x1xf32, #tpu.memory_space<vmem>>, %arg8: memref<16x1xf32, #tpu.memory_space<vmem>>, %arg9: memref<1x16x32xf32, #tpu.memory_space<vmem>>) attributes {dimension_semantics = [#tpu.dimension_semantics<parallel>], iteration_bounds = array<i64: 2>, scalar_prefetch = 0 : i64, scratch_operands = 0 : i64, tpu.core_type = #tpu.core_type<tc>, window_params = [{transform_indices = @transform_0, window_bounds = array<i64: 1, 8, 64>}, {pipeline_mode = #tpu.pipeline_mode<synchronous>, transform_indices = @transform_1, window_bounds = array<i64: 2, 64, 32>}, {pipeline_mode = #tpu.pipeline_mode<synchronous>, transform_indices = @transform_2, window_bounds = array<i64: 16, 72>}, {pipeline_mode = #tpu.pipeline_mode<synchronous>, transform_indices = @transform_3, window_bounds = array<i64: 16, 1>}, {pipeline_mode = #tpu.pipeline_mode<synchronous>, transform_indices = @transform_4, window_bounds = array<i64: 16, 1>}, {pipeline_mode = #tpu.pipeline_mode<synchronous>, transform_indices = @transform_5, window_bounds = array<i64: 16, 144>}, {pipeline_mode = #tpu.pipeline_mode<synchronous>, transform_indices = @transform_6, window_bounds = array<i64: 16, 1>}, {pipeline_mode = #tpu.pipeline_mode<synchronous>, transform_indices = @transform_7, window_bounds = array<i64: 16, 1>}, {transform_indices = @transform_8, window_bounds = array<i64: 1, 16, 32>}]} {
    %c0 = arith.constant 0 : index
    %c0_0 = arith.constant 0 : index
    %c0_1 = arith.constant 0 : index
    %0 = vector.load %arg1[%c0, %c0_0, %c0_1] : memref<1x8x64xf32, #tpu.memory_space<vmem>>, vector<1x8x64xf32>
    %1 = vector.shape_cast %0 : vector<1x8x64xf32> to vector<8x64xf32>
    %c0_2 = arith.constant 0 : index
    %c0_3 = arith.constant 0 : index
    %c0_4 = arith.constant 0 : index
    %2 = vector.load %arg2[%c0_2, %c0_3, %c0_4] : memref<2x64x32xf32, #tpu.memory_space<vmem>>, vector<1x64x32xf32>
    %3 = vector.shape_cast %2 : vector<1x64x32xf32> to vector<64x32xf32>
    %cst = arith.constant dense<0.000000e+00> : vector<8x32xf32>
    %4 = tpu.matmul %1, %3, %cst {dimension_numbers = #tpu.dot_dimension_numbers<[1], [0], [0], [1], [0, 0, 1, 1], [], []>} : vector<8x64xf32>, vector<64x32xf32>, vector<8x32xf32> -> vector<8x32xf32>
    %c1 = arith.constant 1 : index
    %c0_5 = arith.constant 0 : index
    %c0_6 = arith.constant 0 : index
    %5 = vector.load %arg2[%c1, %c0_5, %c0_6] : memref<2x64x32xf32, #tpu.memory_space<vmem>>, vector<1x64x32xf32>
    %6 = vector.shape_cast %5 : vector<1x64x32xf32> to vector<64x32xf32>
    %cst_7 = arith.constant dense<0.000000e+00> : vector<8x32xf32>
    %7 = tpu.matmul %1, %6, %cst_7 {dimension_numbers = #tpu.dot_dimension_numbers<[1], [0], [0], [1], [0, 0, 1, 1], [], []>} : vector<8x64xf32>, vector<64x32xf32>, vector<8x32xf32> -> vector<8x32xf32>
    %8 = arith.maximumf %4, %7 : vector<8x32xf32>
    %c0_8 = arith.constant 0 : index
    %c0_9 = arith.constant 0 : index
    %9 = vector.load %arg3[%c0_8, %c0_9] : memref<16x72xf32, #tpu.memory_space<vmem>>, vector<16x72xf32>
    %c0_10 = arith.constant 0 : index
    %c0_11 = arith.constant 0 : index
    %10 = vector.load %arg4[%c0_10, %c0_11] : memref<16x1xf32, #tpu.memory_space<vmem>>, vector<16x1xf32>
    %c0_12 = arith.constant 0 : index
    %c0_13 = arith.constant 0 : index
    %11 = vector.load %arg5[%c0_12, %c0_13] : memref<16x1xf32, #tpu.memory_space<vmem>>, vector<16x1xf32>
    %12 = tpu.iota {dimensions = array<i32: 1>} : vector<8x32xi32>
    %c4_i32 = arith.constant 4 : i32
    %13 = tpu.dynamic_rotate %8 by %c4_i32 dim 1 : vector<8x32xf32>, i32 -> vector<8x32xf32>
    %c4_i32_14 = arith.constant 4 : i32
    %14 = vector.broadcast %c4_i32_14 : i32 to vector<8x32xi32>
    %15 = arith.cmpi sge, %12, %14 : vector<8x32xi32>
    %c36_i32 = arith.constant 36 : i32
    %16 = vector.broadcast %c36_i32 : i32 to vector<8x32xi32>
    %17 = arith.cmpi slt, %12, %16 : vector<8x32xi32>
    %18 = arith.andi %15, %17 : vector<8x32xi1>
    %cst_15 = arith.constant 0.000000e+00 : f32
    %19 = vector.broadcast %cst_15 : f32 to vector<8x32xf32>
    %20 = arith.select %18, %13, %19 : vector<8x32xi1>, vector<8x32xf32>
    %c3_i32 = arith.constant 3 : i32
    %21 = tpu.dynamic_rotate %8 by %c3_i32 dim 1 : vector<8x32xf32>, i32 -> vector<8x32xf32>
    %c3_i32_16 = arith.constant 3 : i32
    %22 = vector.broadcast %c3_i32_16 : i32 to vector<8x32xi32>
    %23 = arith.cmpi sge, %12, %22 : vector<8x32xi32>
    %c35_i32 = arith.constant 35 : i32
    %24 = vector.broadcast %c35_i32 : i32 to vector<8x32xi32>
    %25 = arith.cmpi slt, %12, %24 : vector<8x32xi32>
    %26 = arith.andi %23, %25 : vector<8x32xi1>
    %cst_17 = arith.constant 0.000000e+00 : f32
    %27 = vector.broadcast %cst_17 : f32 to vector<8x32xf32>
    %28 = arith.select %26, %21, %27 : vector<8x32xi1>, vector<8x32xf32>
    %c2_i32 = arith.constant 2 : i32
    %29 = tpu.dynamic_rotate %8 by %c2_i32 dim 1 : vector<8x32xf32>, i32 -> vector<8x32xf32>
    %c2_i32_18 = arith.constant 2 : i32
    %30 = vector.broadcast %c2_i32_18 : i32 to vector<8x32xi32>
    %31 = arith.cmpi sge, %12, %30 : vector<8x32xi32>
    %c34_i32 = arith.constant 34 : i32
    %32 = vector.broadcast %c34_i32 : i32 to vector<8x32xi32>
    %33 = arith.cmpi slt, %12, %32 : vector<8x32xi32>
    %34 = arith.andi %31, %33 : vector<8x32xi1>
    %cst_19 = arith.constant 0.000000e+00 : f32
    %35 = vector.broadcast %cst_19 : f32 to vector<8x32xf32>
    %36 = arith.select %34, %29, %35 : vector<8x32xi1>, vector<8x32xf32>
    %c1_i32 = arith.constant 1 : i32
    %37 = tpu.dynamic_rotate %8 by %c1_i32 dim 1 : vector<8x32xf32>, i32 -> vector<8x32xf32>
    %c1_i32_20 = arith.constant 1 : i32
    %38 = vector.broadcast %c1_i32_20 : i32 to vector<8x32xi32>
    %39 = arith.cmpi sge, %12, %38 : vector<8x32xi32>
    %c33_i32 = arith.constant 33 : i32
    %40 = vector.broadcast %c33_i32 : i32 to vector<8x32xi32>
    %41 = arith.cmpi slt, %12, %40 : vector<8x32xi32>
    %42 = arith.andi %39, %41 : vector<8x32xi1>
    %cst_21 = arith.constant 0.000000e+00 : f32
    %43 = vector.broadcast %cst_21 : f32 to vector<8x32xf32>
    %44 = arith.select %42, %37, %43 : vector<8x32xi1>, vector<8x32xf32>
    %c0_i32 = arith.constant 0 : i32
    %45 = vector.broadcast %c0_i32 : i32 to vector<8x32xi32>
    %46 = arith.cmpi sge, %12, %45 : vector<8x32xi32>
    %c32_i32 = arith.constant 32 : i32
    %47 = vector.broadcast %c32_i32 : i32 to vector<8x32xi32>
    %48 = arith.cmpi slt, %12, %47 : vector<8x32xi32>
    %49 = arith.andi %46, %48 : vector<8x32xi1>
    %cst_22 = arith.constant 0.000000e+00 : f32
    %50 = vector.broadcast %cst_22 : f32 to vector<8x32xf32>
    %51 = arith.select %49, %8, %50 : vector<8x32xi1>, vector<8x32xf32>
    %c31_i32 = arith.constant 31 : i32
    %52 = tpu.dynamic_rotate %8 by %c31_i32 dim 1 : vector<8x32xf32>, i32 -> vector<8x32xf32>
    %c-1_i32 = arith.constant -1 : i32
    %53 = vector.broadcast %c-1_i32 : i32 to vector<8x32xi32>
    %54 = arith.cmpi sge, %12, %53 : vector<8x32xi32>
    %c31_i32_23 = arith.constant 31 : i32
    %55 = vector.broadcast %c31_i32_23 : i32 to vector<8x32xi32>
    %56 = arith.cmpi slt, %12, %55 : vector<8x32xi32>
    %57 = arith.andi %54, %56 : vector<8x32xi1>
    %cst_24 = arith.constant 0.000000e+00 : f32
    %58 = vector.broadcast %cst_24 : f32 to vector<8x32xf32>
    %59 = arith.select %57, %52, %58 : vector<8x32xi1>, vector<8x32xf32>
    %c30_i32 = arith.constant 30 : i32
    %60 = tpu.dynamic_rotate %8 by %c30_i32 dim 1 : vector<8x32xf32>, i32 -> vector<8x32xf32>
    %c-2_i32 = arith.constant -2 : i32
    %61 = vector.broadcast %c-2_i32 : i32 to vector<8x32xi32>
    %62 = arith.cmpi sge, %12, %61 : vector<8x32xi32>
    %c30_i32_25 = arith.constant 30 : i32
    %63 = vector.broadcast %c30_i32_25 : i32 to vector<8x32xi32>
    %64 = arith.cmpi slt, %12, %63 : vector<8x32xi32>
    %65 = arith.andi %62, %64 : vector<8x32xi1>
    %cst_26 = arith.constant 0.000000e+00 : f32
    %66 = vector.broadcast %cst_26 : f32 to vector<8x32xf32>
    %67 = arith.select %65, %60, %66 : vector<8x32xi1>, vector<8x32xf32>
    %c29_i32 = arith.constant 29 : i32
    %68 = tpu.dynamic_rotate %8 by %c29_i32 dim 1 : vector<8x32xf32>, i32 -> vector<8x32xf32>
    %c-3_i32 = arith.constant -3 : i32
    %69 = vector.broadcast %c-3_i32 : i32 to vector<8x32xi32>
    %70 = arith.cmpi sge, %12, %69 : vector<8x32xi32>
    %c29_i32_27 = arith.constant 29 : i32
    %71 = vector.broadcast %c29_i32_27 : i32 to vector<8x32xi32>
    %72 = arith.cmpi slt, %12, %71 : vector<8x32xi32>
    %73 = arith.andi %70, %72 : vector<8x32xi1>
    %cst_28 = arith.constant 0.000000e+00 : f32
    %74 = vector.broadcast %cst_28 : f32 to vector<8x32xf32>
    %75 = arith.select %73, %68, %74 : vector<8x32xi1>, vector<8x32xf32>
    %c28_i32 = arith.constant 28 : i32
    %76 = tpu.dynamic_rotate %8 by %c28_i32 dim 1 : vector<8x32xf32>, i32 -> vector<8x32xf32>
    %c-4_i32 = arith.constant -4 : i32
    %77 = vector.broadcast %c-4_i32 : i32 to vector<8x32xi32>
    %78 = arith.cmpi sge, %12, %77 : vector<8x32xi32>
    %c28_i32_29 = arith.constant 28 : i32
    %79 = vector.broadcast %c28_i32_29 : i32 to vector<8x32xi32>
    %80 = arith.cmpi slt, %12, %79 : vector<8x32xi32>
    %81 = arith.andi %78, %80 : vector<8x32xi1>
    %cst_30 = arith.constant 0.000000e+00 : f32
    %82 = vector.broadcast %cst_30 : f32 to vector<8x32xf32>
    %83 = arith.select %81, %76, %82 : vector<8x32xi1>, vector<8x32xf32>
    %84 = tpu.concatenate %20, %28, %36, %44, %51, %59, %67, %75, %83 in 0 : vector<8x32xf32>, vector<8x32xf32>, vector<8x32xf32>, vector<8x32xf32>, vector<8x32xf32>, vector<8x32xf32>, vector<8x32xf32>, vector<8x32xf32>, vector<8x32xf32> -> vector<72x32xf32>
    %cst_31 = arith.constant dense<0.000000e+00> : vector<16x32xf32>
    %85 = tpu.matmul %9, %84, %cst_31 {dimension_numbers = #tpu.dot_dimension_numbers<[1], [0], [0], [1], [0, 0, 1, 1], [], []>} : vector<16x72xf32>, vector<72x32xf32>, vector<16x32xf32> -> vector<16x32xf32>
    %86 = vector.broadcast %10 : vector<16x1xf32> to vector<16x32xf32>
    %87 = arith.mulf %85, %86 : vector<16x32xf32>
    %88 = vector.broadcast %11 : vector<16x1xf32> to vector<16x32xf32>
    %89 = arith.addf %87, %88 : vector<16x32xf32>
    %cst_32 = arith.constant 0.000000e+00 : f32
    %90 = vector.broadcast %cst_32 : f32 to vector<16x32xf32>
    %91 = arith.maximumf %89, %90 : vector<16x32xf32>
    %c0_33 = arith.constant 0 : index
    %c0_34 = arith.constant 0 : index
    %92 = vector.load %arg6[%c0_33, %c0_34] : memref<16x144xf32, #tpu.memory_space<vmem>>, vector<16x144xf32>
    %c0_35 = arith.constant 0 : index
    %c0_36 = arith.constant 0 : index
    %93 = vector.load %arg7[%c0_35, %c0_36] : memref<16x1xf32, #tpu.memory_space<vmem>>, vector<16x1xf32>
    %c0_37 = arith.constant 0 : index
    %c0_38 = arith.constant 0 : index
    %94 = vector.load %arg8[%c0_37, %c0_38] : memref<16x1xf32, #tpu.memory_space<vmem>>, vector<16x1xf32>
    %95 = tpu.iota {dimensions = array<i32: 1>} : vector<16x32xi32>
    %c4_i32_39 = arith.constant 4 : i32
    %96 = tpu.dynamic_rotate %91 by %c4_i32_39 dim 1 : vector<16x32xf32>, i32 -> vector<16x32xf32>
    %c4_i32_40 = arith.constant 4 : i32
    %97 = vector.broadcast %c4_i32_40 : i32 to vector<16x32xi32>
    %98 = arith.cmpi sge, %95, %97 : vector<16x32xi32>
    %c36_i32_41 = arith.constant 36 : i32
    %99 = vector.broadcast %c36_i32_41 : i32 to vector<16x32xi32>
    %100 = arith.cmpi slt, %95, %99 : vector<16x32xi32>
    %101 = arith.andi %98, %100 : vector<16x32xi1>
    %cst_42 = arith.constant 0.000000e+00 : f32
    %102 = vector.broadcast %cst_42 : f32 to vector<16x32xf32>
    %103 = arith.select %101, %96, %102 : vector<16x32xi1>, vector<16x32xf32>
    %c3_i32_43 = arith.constant 3 : i32
    %104 = tpu.dynamic_rotate %91 by %c3_i32_43 dim 1 : vector<16x32xf32>, i32 -> vector<16x32xf32>
    %c3_i32_44 = arith.constant 3 : i32
    %105 = vector.broadcast %c3_i32_44 : i32 to vector<16x32xi32>
    %106 = arith.cmpi sge, %95, %105 : vector<16x32xi32>
    %c35_i32_45 = arith.constant 35 : i32
    %107 = vector.broadcast %c35_i32_45 : i32 to vector<16x32xi32>
    %108 = arith.cmpi slt, %95, %107 : vector<16x32xi32>
    %109 = arith.andi %106, %108 : vector<16x32xi1>
    %cst_46 = arith.constant 0.000000e+00 : f32
    %110 = vector.broadcast %cst_46 : f32 to vector<16x32xf32>
    %111 = arith.select %109, %104, %110 : vector<16x32xi1>, vector<16x32xf32>
    %c2_i32_47 = arith.constant 2 : i32
    %112 = tpu.dynamic_rotate %91 by %c2_i32_47 dim 1 : vector<16x32xf32>, i32 -> vector<16x32xf32>
    %c2_i32_48 = arith.constant 2 : i32
    %113 = vector.broadcast %c2_i32_48 : i32 to vector<16x32xi32>
    %114 = arith.cmpi sge, %95, %113 : vector<16x32xi32>
    %c34_i32_49 = arith.constant 34 : i32
    %115 = vector.broadcast %c34_i32_49 : i32 to vector<16x32xi32>
    %116 = arith.cmpi slt, %95, %115 : vector<16x32xi32>
    %117 = arith.andi %114, %116 : vector<16x32xi1>
    %cst_50 = arith.constant 0.000000e+00 : f32
    %118 = vector.broadcast %cst_50 : f32 to vector<16x32xf32>
    %119 = arith.select %117, %112, %118 : vector<16x32xi1>, vector<16x32xf32>
    %c1_i32_51 = arith.constant 1 : i32
    %120 = tpu.dynamic_rotate %91 by %c1_i32_51 dim 1 : vector<16x32xf32>, i32 -> vector<16x32xf32>
    %c1_i32_52 = arith.constant 1 : i32
    %121 = vector.broadcast %c1_i32_52 : i32 to vector<16x32xi32>
    %122 = arith.cmpi sge, %95, %121 : vector<16x32xi32>
    %c33_i32_53 = arith.constant 33 : i32
    %123 = vector.broadcast %c33_i32_53 : i32 to vector<16x32xi32>
    %124 = arith.cmpi slt, %95, %123 : vector<16x32xi32>
    %125 = arith.andi %122, %124 : vector<16x32xi1>
    %cst_54 = arith.constant 0.000000e+00 : f32
    %126 = vector.broadcast %cst_54 : f32 to vector<16x32xf32>
    %127 = arith.select %125, %120, %126 : vector<16x32xi1>, vector<16x32xf32>
    %c0_i32_55 = arith.constant 0 : i32
    %128 = vector.broadcast %c0_i32_55 : i32 to vector<16x32xi32>
    %129 = arith.cmpi sge, %95, %128 : vector<16x32xi32>
    %c32_i32_56 = arith.constant 32 : i32
    %130 = vector.broadcast %c32_i32_56 : i32 to vector<16x32xi32>
    %131 = arith.cmpi slt, %95, %130 : vector<16x32xi32>
    %132 = arith.andi %129, %131 : vector<16x32xi1>
    %cst_57 = arith.constant 0.000000e+00 : f32
    %133 = vector.broadcast %cst_57 : f32 to vector<16x32xf32>
    %134 = arith.select %132, %91, %133 : vector<16x32xi1>, vector<16x32xf32>
    %c31_i32_58 = arith.constant 31 : i32
    %135 = tpu.dynamic_rotate %91 by %c31_i32_58 dim 1 : vector<16x32xf32>, i32 -> vector<16x32xf32>
    %c-1_i32_59 = arith.constant -1 : i32
    %136 = vector.broadcast %c-1_i32_59 : i32 to vector<16x32xi32>
    %137 = arith.cmpi sge, %95, %136 : vector<16x32xi32>
    %c31_i32_60 = arith.constant 31 : i32
    %138 = vector.broadcast %c31_i32_60 : i32 to vector<16x32xi32>
    %139 = arith.cmpi slt, %95, %138 : vector<16x32xi32>
    %140 = arith.andi %137, %139 : vector<16x32xi1>
    %cst_61 = arith.constant 0.000000e+00 : f32
    %141 = vector.broadcast %cst_61 : f32 to vector<16x32xf32>
    %142 = arith.select %140, %135, %141 : vector<16x32xi1>, vector<16x32xf32>
    %c30_i32_62 = arith.constant 30 : i32
    %143 = tpu.dynamic_rotate %91 by %c30_i32_62 dim 1 : vector<16x32xf32>, i32 -> vector<16x32xf32>
    %c-2_i32_63 = arith.constant -2 : i32
    %144 = vector.broadcast %c-2_i32_63 : i32 to vector<16x32xi32>
    %145 = arith.cmpi sge, %95, %144 : vector<16x32xi32>
    %c30_i32_64 = arith.constant 30 : i32
    %146 = vector.broadcast %c30_i32_64 : i32 to vector<16x32xi32>
    %147 = arith.cmpi slt, %95, %146 : vector<16x32xi32>
    %148 = arith.andi %145, %147 : vector<16x32xi1>
    %cst_65 = arith.constant 0.000000e+00 : f32
    %149 = vector.broadcast %cst_65 : f32 to vector<16x32xf32>
    %150 = arith.select %148, %143, %149 : vector<16x32xi1>, vector<16x32xf32>
    %c29_i32_66 = arith.constant 29 : i32
    %151 = tpu.dynamic_rotate %91 by %c29_i32_66 dim 1 : vector<16x32xf32>, i32 -> vector<16x32xf32>
    %c-3_i32_67 = arith.constant -3 : i32
    %152 = vector.broadcast %c-3_i32_67 : i32 to vector<16x32xi32>
    %153 = arith.cmpi sge, %95, %152 : vector<16x32xi32>
    %c29_i32_68 = arith.constant 29 : i32
    %154 = vector.broadcast %c29_i32_68 : i32 to vector<16x32xi32>
    %155 = arith.cmpi slt, %95, %154 : vector<16x32xi32>
    %156 = arith.andi %153, %155 : vector<16x32xi1>
    %cst_69 = arith.constant 0.000000e+00 : f32
    %157 = vector.broadcast %cst_69 : f32 to vector<16x32xf32>
    %158 = arith.select %156, %151, %157 : vector<16x32xi1>, vector<16x32xf32>
    %c28_i32_70 = arith.constant 28 : i32
    %159 = tpu.dynamic_rotate %91 by %c28_i32_70 dim 1 : vector<16x32xf32>, i32 -> vector<16x32xf32>
    %c-4_i32_71 = arith.constant -4 : i32
    %160 = vector.broadcast %c-4_i32_71 : i32 to vector<16x32xi32>
    %161 = arith.cmpi sge, %95, %160 : vector<16x32xi32>
    %c28_i32_72 = arith.constant 28 : i32
    %162 = vector.broadcast %c28_i32_72 : i32 to vector<16x32xi32>
    %163 = arith.cmpi slt, %95, %162 : vector<16x32xi32>
    %164 = arith.andi %161, %163 : vector<16x32xi1>
    %cst_73 = arith.constant 0.000000e+00 : f32
    %165 = vector.broadcast %cst_73 : f32 to vector<16x32xf32>
    %166 = arith.select %164, %159, %165 : vector<16x32xi1>, vector<16x32xf32>
    %167 = tpu.concatenate %103, %111, %119, %127, %134, %142, %150, %158, %166 in 0 : vector<16x32xf32>, vector<16x32xf32>, vector<16x32xf32>, vector<16x32xf32>, vector<16x32xf32>, vector<16x32xf32>, vector<16x32xf32>, vector<16x32xf32>, vector<16x32xf32> -> vector<144x32xf32>
    %cst_74 = arith.constant dense<0.000000e+00> : vector<16x32xf32>
    %168 = tpu.matmul %92, %167, %cst_74 {dimension_numbers = #tpu.dot_dimension_numbers<[1], [0], [0], [1], [0, 0, 1, 1], [], []>} : vector<16x144xf32>, vector<144x32xf32>, vector<16x32xf32> -> vector<16x32xf32>
    %169 = vector.broadcast %93 : vector<16x1xf32> to vector<16x32xf32>
    %170 = arith.mulf %168, %169 : vector<16x32xf32>
    %171 = vector.broadcast %94 : vector<16x1xf32> to vector<16x32xf32>
    %172 = arith.addf %170, %171 : vector<16x32xf32>
    %cst_75 = arith.constant 0.000000e+00 : f32
    %173 = vector.broadcast %cst_75 : f32 to vector<16x32xf32>
    %174 = arith.maximumf %172, %173 : vector<16x32xf32>
    %c0_76 = arith.constant 0 : index
    %c0_77 = arith.constant 0 : index
    %c0_78 = arith.constant 0 : index
    %175 = vector.load %arg9[%c0_76, %c0_77, %c0_78] : memref<1x16x32xf32, #tpu.memory_space<vmem>>, vector<1x16x32xf32>
    %176 = vector.shape_cast %175 : vector<1x16x32xf32> to vector<16x32xf32>
    %177 = vector.shape_cast %174 : vector<16x32xf32> to vector<1x16x32xf32>
    tpu.vector_store %arg9[%c0_76, %c0_77, %c0_78], %177 {strides = array<i32>} : memref<1x16x32xf32, #tpu.memory_space<vmem>>, vector<1x16x32xf32>,
    return
  }
  func.func @transform_0(%arg0: i32) -> (i32, i32, i32) {
    %c0_i32 = arith.constant 0 : i32
    %c0_i32_0 = arith.constant 0 : i32
    %c0_i32_1 = arith.constant 0 : i32
    return %arg0, %c0_i32, %c0_i32_0 : i32, i32, i32
  }
  func.func @transform_1(%arg0: i32) -> (i32, i32, i32) {
    %c0_i32 = arith.constant 0 : i32
    %c0_i32_0 = arith.constant 0 : i32
    %c0_i32_1 = arith.constant 0 : i32
    %c0_i32_2 = arith.constant 0 : i32
    return %c0_i32, %c0_i32_0, %c0_i32_1 : i32, i32, i32
  }
  func.func @transform_2(%arg0: i32) -> (i32, i32) {
    %c0_i32 = arith.constant 0 : i32
    %c0_i32_0 = arith.constant 0 : i32
    %c0_i32_1 = arith.constant 0 : i32
    return %c0_i32, %c0_i32_0 : i32, i32
  }
  func.func @transform_3(%arg0: i32) -> (i32, i32) {
    %c0_i32 = arith.constant 0 : i32
    %c0_i32_0 = arith.constant 0 : i32
    %c0_i32_1 = arith.constant 0 : i32
    return %c0_i32, %c0_i32_0 : i32, i32
  }
  func.func @transform_4(%arg0: i32) -> (i32, i32) {
    %c0_i32 = arith.constant 0 : i32
    %c0_i32_0 = arith.constant 0 : i32
    %c0_i32_1 = arith.constant 0 : i32
    return %c0_i32, %c0_i32_0 : i32, i32
  }
  func.func @transform_5(%arg0: i32) -> (i32, i32) {
    %c0_i32 = arith.constant 0 : i32
    %c0_i32_0 = arith.constant 0 : i32
    %c0_i32_1 = arith.constant 0 : i32
    return %c0_i32, %c0_i32_0 : i32, i32
  }
  func.func @transform_6(%arg0: i32) -> (i32, i32) {
    %c0_i32 = arith.constant 0 : i32
    %c0_i32_0 = arith.constant 0 : i32
    %c0_i32_1 = arith.constant 0 : i32
    return %c0_i32, %c0_i32_0 : i32, i32
  }
  func.func @transform_7(%arg0: i32) -> (i32, i32) {
    %c0_i32 = arith.constant 0 : i32
    %c0_i32_0 = arith.constant 0 : i32
    %c0_i32_1 = arith.constant 0 : i32
    return %c0_i32, %c0_i32_0 : i32, i32
  }
  func.func @transform_8(%arg0: i32) -> (i32, i32, i32) {
    %c0_i32 = arith.constant 0 : i32
    %c0_i32_0 = arith.constant 0 : i32
    %c0_i32_1 = arith.constant 0 : i32
    return %arg0, %c0_i32, %c0_i32_0 : i32, i32, i32
  }
}

module attributes {stable_mosaic.version = 11 : i64} {
  func.func @_block_kernel(%arg0: i32, %arg1: memref<1x8x64xf32, #tpu.memory_space<vmem>>, %arg2: memref<8x72xf32, #tpu.memory_space<vmem>>, %arg3: memref<8x1xf32, #tpu.memory_space<vmem>>, %arg4: memref<8x1xf32, #tpu.memory_space<vmem>>, %arg5: memref<8x72xf32, #tpu.memory_space<vmem>>, %arg6: memref<8x1xf32, #tpu.memory_space<vmem>>, %arg7: memref<8x1xf32, #tpu.memory_space<vmem>>, %arg8: memref<1x8x64xf32, #tpu.memory_space<vmem>>) attributes {dimension_semantics = [#tpu.dimension_semantics<parallel>], iteration_bounds = array<i64: 2>, scalar_prefetch = 0 : i64, scratch_operands = 0 : i64, tpu.core_type = #tpu.core_type<tc>, window_params = [{transform_indices = @transform_0, window_bounds = array<i64: 1, 8, 64>}, {pipeline_mode = #tpu.pipeline_mode<synchronous>, transform_indices = @transform_1, window_bounds = array<i64: 8, 72>}, {pipeline_mode = #tpu.pipeline_mode<synchronous>, transform_indices = @transform_2, window_bounds = array<i64: 8, 1>}, {pipeline_mode = #tpu.pipeline_mode<synchronous>, transform_indices = @transform_3, window_bounds = array<i64: 8, 1>}, {pipeline_mode = #tpu.pipeline_mode<synchronous>, transform_indices = @transform_4, window_bounds = array<i64: 8, 72>}, {pipeline_mode = #tpu.pipeline_mode<synchronous>, transform_indices = @transform_5, window_bounds = array<i64: 8, 1>}, {pipeline_mode = #tpu.pipeline_mode<synchronous>, transform_indices = @transform_6, window_bounds = array<i64: 8, 1>}, {transform_indices = @transform_7, window_bounds = array<i64: 1, 8, 64>}]} {
    %c0 = arith.constant 0 : index
    %c0_0 = arith.constant 0 : index
    %c0_1 = arith.constant 0 : index
    %0 = vector.load %arg1[%c0, %c0_0, %c0_1] : memref<1x8x64xf32, #tpu.memory_space<vmem>>, vector<1x8x64xf32>
    %1 = vector.shape_cast %0 : vector<1x8x64xf32> to vector<8x64xf32>
    %c0_2 = arith.constant 0 : index
    %c0_3 = arith.constant 0 : index
    %2 = vector.load %arg2[%c0_2, %c0_3] : memref<8x72xf32, #tpu.memory_space<vmem>>, vector<8x72xf32>
    %c0_4 = arith.constant 0 : index
    %c0_5 = arith.constant 0 : index
    %3 = vector.load %arg3[%c0_4, %c0_5] : memref<8x1xf32, #tpu.memory_space<vmem>>, vector<8x1xf32>
    %c0_6 = arith.constant 0 : index
    %c0_7 = arith.constant 0 : index
    %4 = vector.load %arg4[%c0_6, %c0_7] : memref<8x1xf32, #tpu.memory_space<vmem>>, vector<8x1xf32>
    %5 = tpu.iota {dimensions = array<i32: 1>} : vector<8x64xi32>
    %c4_i32 = arith.constant 4 : i32
    %6 = tpu.dynamic_rotate %1 by %c4_i32 dim 1 : vector<8x64xf32>, i32 -> vector<8x64xf32>
    %c4_i32_8 = arith.constant 4 : i32
    %7 = vector.broadcast %c4_i32_8 : i32 to vector<8x64xi32>
    %8 = arith.cmpi sge, %5, %7 : vector<8x64xi32>
    %c68_i32 = arith.constant 68 : i32
    %9 = vector.broadcast %c68_i32 : i32 to vector<8x64xi32>
    %10 = arith.cmpi slt, %5, %9 : vector<8x64xi32>
    %11 = arith.andi %8, %10 : vector<8x64xi1>
    %cst = arith.constant 0.000000e+00 : f32
    %12 = vector.broadcast %cst : f32 to vector<8x64xf32>
    %13 = arith.select %11, %6, %12 : vector<8x64xi1>, vector<8x64xf32>
    %c3_i32 = arith.constant 3 : i32
    %14 = tpu.dynamic_rotate %1 by %c3_i32 dim 1 : vector<8x64xf32>, i32 -> vector<8x64xf32>
    %c3_i32_9 = arith.constant 3 : i32
    %15 = vector.broadcast %c3_i32_9 : i32 to vector<8x64xi32>
    %16 = arith.cmpi sge, %5, %15 : vector<8x64xi32>
    %c67_i32 = arith.constant 67 : i32
    %17 = vector.broadcast %c67_i32 : i32 to vector<8x64xi32>
    %18 = arith.cmpi slt, %5, %17 : vector<8x64xi32>
    %19 = arith.andi %16, %18 : vector<8x64xi1>
    %cst_10 = arith.constant 0.000000e+00 : f32
    %20 = vector.broadcast %cst_10 : f32 to vector<8x64xf32>
    %21 = arith.select %19, %14, %20 : vector<8x64xi1>, vector<8x64xf32>
    %c2_i32 = arith.constant 2 : i32
    %22 = tpu.dynamic_rotate %1 by %c2_i32 dim 1 : vector<8x64xf32>, i32 -> vector<8x64xf32>
    %c2_i32_11 = arith.constant 2 : i32
    %23 = vector.broadcast %c2_i32_11 : i32 to vector<8x64xi32>
    %24 = arith.cmpi sge, %5, %23 : vector<8x64xi32>
    %c66_i32 = arith.constant 66 : i32
    %25 = vector.broadcast %c66_i32 : i32 to vector<8x64xi32>
    %26 = arith.cmpi slt, %5, %25 : vector<8x64xi32>
    %27 = arith.andi %24, %26 : vector<8x64xi1>
    %cst_12 = arith.constant 0.000000e+00 : f32
    %28 = vector.broadcast %cst_12 : f32 to vector<8x64xf32>
    %29 = arith.select %27, %22, %28 : vector<8x64xi1>, vector<8x64xf32>
    %c1_i32 = arith.constant 1 : i32
    %30 = tpu.dynamic_rotate %1 by %c1_i32 dim 1 : vector<8x64xf32>, i32 -> vector<8x64xf32>
    %c1_i32_13 = arith.constant 1 : i32
    %31 = vector.broadcast %c1_i32_13 : i32 to vector<8x64xi32>
    %32 = arith.cmpi sge, %5, %31 : vector<8x64xi32>
    %c65_i32 = arith.constant 65 : i32
    %33 = vector.broadcast %c65_i32 : i32 to vector<8x64xi32>
    %34 = arith.cmpi slt, %5, %33 : vector<8x64xi32>
    %35 = arith.andi %32, %34 : vector<8x64xi1>
    %cst_14 = arith.constant 0.000000e+00 : f32
    %36 = vector.broadcast %cst_14 : f32 to vector<8x64xf32>
    %37 = arith.select %35, %30, %36 : vector<8x64xi1>, vector<8x64xf32>
    %c0_i32 = arith.constant 0 : i32
    %38 = vector.broadcast %c0_i32 : i32 to vector<8x64xi32>
    %39 = arith.cmpi sge, %5, %38 : vector<8x64xi32>
    %c64_i32 = arith.constant 64 : i32
    %40 = vector.broadcast %c64_i32 : i32 to vector<8x64xi32>
    %41 = arith.cmpi slt, %5, %40 : vector<8x64xi32>
    %42 = arith.andi %39, %41 : vector<8x64xi1>
    %cst_15 = arith.constant 0.000000e+00 : f32
    %43 = vector.broadcast %cst_15 : f32 to vector<8x64xf32>
    %44 = arith.select %42, %1, %43 : vector<8x64xi1>, vector<8x64xf32>
    %c63_i32 = arith.constant 63 : i32
    %45 = tpu.dynamic_rotate %1 by %c63_i32 dim 1 : vector<8x64xf32>, i32 -> vector<8x64xf32>
    %c-1_i32 = arith.constant -1 : i32
    %46 = vector.broadcast %c-1_i32 : i32 to vector<8x64xi32>
    %47 = arith.cmpi sge, %5, %46 : vector<8x64xi32>
    %c63_i32_16 = arith.constant 63 : i32
    %48 = vector.broadcast %c63_i32_16 : i32 to vector<8x64xi32>
    %49 = arith.cmpi slt, %5, %48 : vector<8x64xi32>
    %50 = arith.andi %47, %49 : vector<8x64xi1>
    %cst_17 = arith.constant 0.000000e+00 : f32
    %51 = vector.broadcast %cst_17 : f32 to vector<8x64xf32>
    %52 = arith.select %50, %45, %51 : vector<8x64xi1>, vector<8x64xf32>
    %c62_i32 = arith.constant 62 : i32
    %53 = tpu.dynamic_rotate %1 by %c62_i32 dim 1 : vector<8x64xf32>, i32 -> vector<8x64xf32>
    %c-2_i32 = arith.constant -2 : i32
    %54 = vector.broadcast %c-2_i32 : i32 to vector<8x64xi32>
    %55 = arith.cmpi sge, %5, %54 : vector<8x64xi32>
    %c62_i32_18 = arith.constant 62 : i32
    %56 = vector.broadcast %c62_i32_18 : i32 to vector<8x64xi32>
    %57 = arith.cmpi slt, %5, %56 : vector<8x64xi32>
    %58 = arith.andi %55, %57 : vector<8x64xi1>
    %cst_19 = arith.constant 0.000000e+00 : f32
    %59 = vector.broadcast %cst_19 : f32 to vector<8x64xf32>
    %60 = arith.select %58, %53, %59 : vector<8x64xi1>, vector<8x64xf32>
    %c61_i32 = arith.constant 61 : i32
    %61 = tpu.dynamic_rotate %1 by %c61_i32 dim 1 : vector<8x64xf32>, i32 -> vector<8x64xf32>
    %c-3_i32 = arith.constant -3 : i32
    %62 = vector.broadcast %c-3_i32 : i32 to vector<8x64xi32>
    %63 = arith.cmpi sge, %5, %62 : vector<8x64xi32>
    %c61_i32_20 = arith.constant 61 : i32
    %64 = vector.broadcast %c61_i32_20 : i32 to vector<8x64xi32>
    %65 = arith.cmpi slt, %5, %64 : vector<8x64xi32>
    %66 = arith.andi %63, %65 : vector<8x64xi1>
    %cst_21 = arith.constant 0.000000e+00 : f32
    %67 = vector.broadcast %cst_21 : f32 to vector<8x64xf32>
    %68 = arith.select %66, %61, %67 : vector<8x64xi1>, vector<8x64xf32>
    %c60_i32 = arith.constant 60 : i32
    %69 = tpu.dynamic_rotate %1 by %c60_i32 dim 1 : vector<8x64xf32>, i32 -> vector<8x64xf32>
    %c-4_i32 = arith.constant -4 : i32
    %70 = vector.broadcast %c-4_i32 : i32 to vector<8x64xi32>
    %71 = arith.cmpi sge, %5, %70 : vector<8x64xi32>
    %c60_i32_22 = arith.constant 60 : i32
    %72 = vector.broadcast %c60_i32_22 : i32 to vector<8x64xi32>
    %73 = arith.cmpi slt, %5, %72 : vector<8x64xi32>
    %74 = arith.andi %71, %73 : vector<8x64xi1>
    %cst_23 = arith.constant 0.000000e+00 : f32
    %75 = vector.broadcast %cst_23 : f32 to vector<8x64xf32>
    %76 = arith.select %74, %69, %75 : vector<8x64xi1>, vector<8x64xf32>
    %77 = tpu.concatenate %13, %21, %29, %37, %44, %52, %60, %68, %76 in 0 : vector<8x64xf32>, vector<8x64xf32>, vector<8x64xf32>, vector<8x64xf32>, vector<8x64xf32>, vector<8x64xf32>, vector<8x64xf32>, vector<8x64xf32>, vector<8x64xf32> -> vector<72x64xf32>
    %cst_24 = arith.constant dense<0.000000e+00> : vector<8x64xf32>
    %78 = tpu.matmul %2, %77, %cst_24 {dimension_numbers = #tpu.dot_dimension_numbers<[1], [0], [0], [1], [0, 0, 1, 1], [], []>} : vector<8x72xf32>, vector<72x64xf32>, vector<8x64xf32> -> vector<8x64xf32>
    %79 = vector.broadcast %3 : vector<8x1xf32> to vector<8x64xf32>
    %80 = arith.mulf %78, %79 : vector<8x64xf32>
    %81 = vector.broadcast %4 : vector<8x1xf32> to vector<8x64xf32>
    %82 = arith.addf %80, %81 : vector<8x64xf32>
    %cst_25 = arith.constant 0.000000e+00 : f32
    %83 = vector.broadcast %cst_25 : f32 to vector<8x64xf32>
    %84 = arith.maximumf %82, %83 : vector<8x64xf32>
    %c0_26 = arith.constant 0 : index
    %c0_27 = arith.constant 0 : index
    %85 = vector.load %arg5[%c0_26, %c0_27] : memref<8x72xf32, #tpu.memory_space<vmem>>, vector<8x72xf32>
    %c0_28 = arith.constant 0 : index
    %c0_29 = arith.constant 0 : index
    %86 = vector.load %arg6[%c0_28, %c0_29] : memref<8x1xf32, #tpu.memory_space<vmem>>, vector<8x1xf32>
    %c0_30 = arith.constant 0 : index
    %c0_31 = arith.constant 0 : index
    %87 = vector.load %arg7[%c0_30, %c0_31] : memref<8x1xf32, #tpu.memory_space<vmem>>, vector<8x1xf32>
    %88 = tpu.iota {dimensions = array<i32: 1>} : vector<8x64xi32>
    %c4_i32_32 = arith.constant 4 : i32
    %89 = tpu.dynamic_rotate %84 by %c4_i32_32 dim 1 : vector<8x64xf32>, i32 -> vector<8x64xf32>
    %c4_i32_33 = arith.constant 4 : i32
    %90 = vector.broadcast %c4_i32_33 : i32 to vector<8x64xi32>
    %91 = arith.cmpi sge, %88, %90 : vector<8x64xi32>
    %c68_i32_34 = arith.constant 68 : i32
    %92 = vector.broadcast %c68_i32_34 : i32 to vector<8x64xi32>
    %93 = arith.cmpi slt, %88, %92 : vector<8x64xi32>
    %94 = arith.andi %91, %93 : vector<8x64xi1>
    %cst_35 = arith.constant 0.000000e+00 : f32
    %95 = vector.broadcast %cst_35 : f32 to vector<8x64xf32>
    %96 = arith.select %94, %89, %95 : vector<8x64xi1>, vector<8x64xf32>
    %c3_i32_36 = arith.constant 3 : i32
    %97 = tpu.dynamic_rotate %84 by %c3_i32_36 dim 1 : vector<8x64xf32>, i32 -> vector<8x64xf32>
    %c3_i32_37 = arith.constant 3 : i32
    %98 = vector.broadcast %c3_i32_37 : i32 to vector<8x64xi32>
    %99 = arith.cmpi sge, %88, %98 : vector<8x64xi32>
    %c67_i32_38 = arith.constant 67 : i32
    %100 = vector.broadcast %c67_i32_38 : i32 to vector<8x64xi32>
    %101 = arith.cmpi slt, %88, %100 : vector<8x64xi32>
    %102 = arith.andi %99, %101 : vector<8x64xi1>
    %cst_39 = arith.constant 0.000000e+00 : f32
    %103 = vector.broadcast %cst_39 : f32 to vector<8x64xf32>
    %104 = arith.select %102, %97, %103 : vector<8x64xi1>, vector<8x64xf32>
    %c2_i32_40 = arith.constant 2 : i32
    %105 = tpu.dynamic_rotate %84 by %c2_i32_40 dim 1 : vector<8x64xf32>, i32 -> vector<8x64xf32>
    %c2_i32_41 = arith.constant 2 : i32
    %106 = vector.broadcast %c2_i32_41 : i32 to vector<8x64xi32>
    %107 = arith.cmpi sge, %88, %106 : vector<8x64xi32>
    %c66_i32_42 = arith.constant 66 : i32
    %108 = vector.broadcast %c66_i32_42 : i32 to vector<8x64xi32>
    %109 = arith.cmpi slt, %88, %108 : vector<8x64xi32>
    %110 = arith.andi %107, %109 : vector<8x64xi1>
    %cst_43 = arith.constant 0.000000e+00 : f32
    %111 = vector.broadcast %cst_43 : f32 to vector<8x64xf32>
    %112 = arith.select %110, %105, %111 : vector<8x64xi1>, vector<8x64xf32>
    %c1_i32_44 = arith.constant 1 : i32
    %113 = tpu.dynamic_rotate %84 by %c1_i32_44 dim 1 : vector<8x64xf32>, i32 -> vector<8x64xf32>
    %c1_i32_45 = arith.constant 1 : i32
    %114 = vector.broadcast %c1_i32_45 : i32 to vector<8x64xi32>
    %115 = arith.cmpi sge, %88, %114 : vector<8x64xi32>
    %c65_i32_46 = arith.constant 65 : i32
    %116 = vector.broadcast %c65_i32_46 : i32 to vector<8x64xi32>
    %117 = arith.cmpi slt, %88, %116 : vector<8x64xi32>
    %118 = arith.andi %115, %117 : vector<8x64xi1>
    %cst_47 = arith.constant 0.000000e+00 : f32
    %119 = vector.broadcast %cst_47 : f32 to vector<8x64xf32>
    %120 = arith.select %118, %113, %119 : vector<8x64xi1>, vector<8x64xf32>
    %c0_i32_48 = arith.constant 0 : i32
    %121 = vector.broadcast %c0_i32_48 : i32 to vector<8x64xi32>
    %122 = arith.cmpi sge, %88, %121 : vector<8x64xi32>
    %c64_i32_49 = arith.constant 64 : i32
    %123 = vector.broadcast %c64_i32_49 : i32 to vector<8x64xi32>
    %124 = arith.cmpi slt, %88, %123 : vector<8x64xi32>
    %125 = arith.andi %122, %124 : vector<8x64xi1>
    %cst_50 = arith.constant 0.000000e+00 : f32
    %126 = vector.broadcast %cst_50 : f32 to vector<8x64xf32>
    %127 = arith.select %125, %84, %126 : vector<8x64xi1>, vector<8x64xf32>
    %c63_i32_51 = arith.constant 63 : i32
    %128 = tpu.dynamic_rotate %84 by %c63_i32_51 dim 1 : vector<8x64xf32>, i32 -> vector<8x64xf32>
    %c-1_i32_52 = arith.constant -1 : i32
    %129 = vector.broadcast %c-1_i32_52 : i32 to vector<8x64xi32>
    %130 = arith.cmpi sge, %88, %129 : vector<8x64xi32>
    %c63_i32_53 = arith.constant 63 : i32
    %131 = vector.broadcast %c63_i32_53 : i32 to vector<8x64xi32>
    %132 = arith.cmpi slt, %88, %131 : vector<8x64xi32>
    %133 = arith.andi %130, %132 : vector<8x64xi1>
    %cst_54 = arith.constant 0.000000e+00 : f32
    %134 = vector.broadcast %cst_54 : f32 to vector<8x64xf32>
    %135 = arith.select %133, %128, %134 : vector<8x64xi1>, vector<8x64xf32>
    %c62_i32_55 = arith.constant 62 : i32
    %136 = tpu.dynamic_rotate %84 by %c62_i32_55 dim 1 : vector<8x64xf32>, i32 -> vector<8x64xf32>
    %c-2_i32_56 = arith.constant -2 : i32
    %137 = vector.broadcast %c-2_i32_56 : i32 to vector<8x64xi32>
    %138 = arith.cmpi sge, %88, %137 : vector<8x64xi32>
    %c62_i32_57 = arith.constant 62 : i32
    %139 = vector.broadcast %c62_i32_57 : i32 to vector<8x64xi32>
    %140 = arith.cmpi slt, %88, %139 : vector<8x64xi32>
    %141 = arith.andi %138, %140 : vector<8x64xi1>
    %cst_58 = arith.constant 0.000000e+00 : f32
    %142 = vector.broadcast %cst_58 : f32 to vector<8x64xf32>
    %143 = arith.select %141, %136, %142 : vector<8x64xi1>, vector<8x64xf32>
    %c61_i32_59 = arith.constant 61 : i32
    %144 = tpu.dynamic_rotate %84 by %c61_i32_59 dim 1 : vector<8x64xf32>, i32 -> vector<8x64xf32>
    %c-3_i32_60 = arith.constant -3 : i32
    %145 = vector.broadcast %c-3_i32_60 : i32 to vector<8x64xi32>
    %146 = arith.cmpi sge, %88, %145 : vector<8x64xi32>
    %c61_i32_61 = arith.constant 61 : i32
    %147 = vector.broadcast %c61_i32_61 : i32 to vector<8x64xi32>
    %148 = arith.cmpi slt, %88, %147 : vector<8x64xi32>
    %149 = arith.andi %146, %148 : vector<8x64xi1>
    %cst_62 = arith.constant 0.000000e+00 : f32
    %150 = vector.broadcast %cst_62 : f32 to vector<8x64xf32>
    %151 = arith.select %149, %144, %150 : vector<8x64xi1>, vector<8x64xf32>
    %c60_i32_63 = arith.constant 60 : i32
    %152 = tpu.dynamic_rotate %84 by %c60_i32_63 dim 1 : vector<8x64xf32>, i32 -> vector<8x64xf32>
    %c-4_i32_64 = arith.constant -4 : i32
    %153 = vector.broadcast %c-4_i32_64 : i32 to vector<8x64xi32>
    %154 = arith.cmpi sge, %88, %153 : vector<8x64xi32>
    %c60_i32_65 = arith.constant 60 : i32
    %155 = vector.broadcast %c60_i32_65 : i32 to vector<8x64xi32>
    %156 = arith.cmpi slt, %88, %155 : vector<8x64xi32>
    %157 = arith.andi %154, %156 : vector<8x64xi1>
    %cst_66 = arith.constant 0.000000e+00 : f32
    %158 = vector.broadcast %cst_66 : f32 to vector<8x64xf32>
    %159 = arith.select %157, %152, %158 : vector<8x64xi1>, vector<8x64xf32>
    %160 = tpu.concatenate %96, %104, %112, %120, %127, %135, %143, %151, %159 in 0 : vector<8x64xf32>, vector<8x64xf32>, vector<8x64xf32>, vector<8x64xf32>, vector<8x64xf32>, vector<8x64xf32>, vector<8x64xf32>, vector<8x64xf32>, vector<8x64xf32> -> vector<72x64xf32>
    %cst_67 = arith.constant dense<0.000000e+00> : vector<8x64xf32>
    %161 = tpu.matmul %85, %160, %cst_67 {dimension_numbers = #tpu.dot_dimension_numbers<[1], [0], [0], [1], [0, 0, 1, 1], [], []>} : vector<8x72xf32>, vector<72x64xf32>, vector<8x64xf32> -> vector<8x64xf32>
    %162 = vector.broadcast %86 : vector<8x1xf32> to vector<8x64xf32>
    %163 = arith.mulf %161, %162 : vector<8x64xf32>
    %164 = vector.broadcast %87 : vector<8x1xf32> to vector<8x64xf32>
    %165 = arith.addf %163, %164 : vector<8x64xf32>
    %cst_68 = arith.constant 0.000000e+00 : f32
    %166 = vector.broadcast %cst_68 : f32 to vector<8x64xf32>
    %167 = arith.maximumf %165, %166 : vector<8x64xf32>
    %c0_69 = arith.constant 0 : index
    %c0_70 = arith.constant 0 : index
    %c0_71 = arith.constant 0 : index
    %168 = vector.load %arg8[%c0_69, %c0_70, %c0_71] : memref<1x8x64xf32, #tpu.memory_space<vmem>>, vector<1x8x64xf32>
    %169 = vector.shape_cast %168 : vector<1x8x64xf32> to vector<8x64xf32>
    %170 = vector.shape_cast %167 : vector<8x64xf32> to vector<1x8x64xf32>
    tpu.vector_store %arg8[%c0_69, %c0_70, %c0_71], %170 {strides = array<i32>} : memref<1x8x64xf32, #tpu.memory_space<vmem>>, vector<1x8x64xf32>,
    return
  }
  func.func @transform_0(%arg0: i32) -> (i32, i32, i32) {
    %c0_i32 = arith.constant 0 : i32
    %c0_i32_0 = arith.constant 0 : i32
    %c0_i32_1 = arith.constant 0 : i32
    return %arg0, %c0_i32, %c0_i32_0 : i32, i32, i32
  }
  func.func @transform_1(%arg0: i32) -> (i32, i32) {
    %c0_i32 = arith.constant 0 : i32
    %c0_i32_0 = arith.constant 0 : i32
    %c0_i32_1 = arith.constant 0 : i32
    return %c0_i32, %c0_i32_0 : i32, i32
  }
  func.func @transform_2(%arg0: i32) -> (i32, i32) {
    %c0_i32 = arith.constant 0 : i32
    %c0_i32_0 = arith.constant 0 : i32
    %c0_i32_1 = arith.constant 0 : i32
    return %c0_i32, %c0_i32_0 : i32, i32
  }
  func.func @transform_3(%arg0: i32) -> (i32, i32) {
    %c0_i32 = arith.constant 0 : i32
    %c0_i32_0 = arith.constant 0 : i32
    %c0_i32_1 = arith.constant 0 : i32
    return %c0_i32, %c0_i32_0 : i32, i32
  }
  func.func @transform_4(%arg0: i32) -> (i32, i32) {
    %c0_i32 = arith.constant 0 : i32
    %c0_i32_0 = arith.constant 0 : i32
    %c0_i32_1 = arith.constant 0 : i32
    return %c0_i32, %c0_i32_0 : i32, i32
  }
  func.func @transform_5(%arg0: i32) -> (i32, i32) {
    %c0_i32 = arith.constant 0 : i32
    %c0_i32_0 = arith.constant 0 : i32
    %c0_i32_1 = arith.constant 0 : i32
    return %c0_i32, %c0_i32_0 : i32, i32
  }
  func.func @transform_6(%arg0: i32) -> (i32, i32) {
    %c0_i32 = arith.constant 0 : i32
    %c0_i32_0 = arith.constant 0 : i32
    %c0_i32_1 = arith.constant 0 : i32
    return %c0_i32, %c0_i32_0 : i32, i32
  }
  func.func @transform_7(%arg0: i32) -> (i32, i32, i32) {
    %c0_i32 = arith.constant 0 : i32
    %c0_i32_0 = arith.constant 0 : i32
    %c0_i32_1 = arith.constant 0 : i32
    return %arg0, %c0_i32, %c0_i32_0 : i32, i32, i32
  }
}

module attributes {stable_mosaic.version = 11 : i64} {
  func.func @_block_kernel(%arg0: i32, %arg1: memref<1x16x32xf32, #tpu.memory_space<vmem>>, %arg2: memref<2x32x16xf32, #tpu.memory_space<vmem>>, %arg3: memref<32x144xf32, #tpu.memory_space<vmem>>, %arg4: memref<32x1xf32, #tpu.memory_space<vmem>>, %arg5: memref<32x1xf32, #tpu.memory_space<vmem>>, %arg6: memref<32x288xf32, #tpu.memory_space<vmem>>, %arg7: memref<32x1xf32, #tpu.memory_space<vmem>>, %arg8: memref<32x1xf32, #tpu.memory_space<vmem>>, %arg9: memref<1x32x16xf32, #tpu.memory_space<vmem>>) attributes {dimension_semantics = [#tpu.dimension_semantics<parallel>], iteration_bounds = array<i64: 2>, scalar_prefetch = 0 : i64, scratch_operands = 0 : i64, tpu.core_type = #tpu.core_type<tc>, window_params = [{transform_indices = @transform_0, window_bounds = array<i64: 1, 16, 32>}, {pipeline_mode = #tpu.pipeline_mode<synchronous>, transform_indices = @transform_1, window_bounds = array<i64: 2, 32, 16>}, {pipeline_mode = #tpu.pipeline_mode<synchronous>, transform_indices = @transform_2, window_bounds = array<i64: 32, 144>}, {pipeline_mode = #tpu.pipeline_mode<synchronous>, transform_indices = @transform_3, window_bounds = array<i64: 32, 1>}, {pipeline_mode = #tpu.pipeline_mode<synchronous>, transform_indices = @transform_4, window_bounds = array<i64: 32, 1>}, {pipeline_mode = #tpu.pipeline_mode<synchronous>, transform_indices = @transform_5, window_bounds = array<i64: 32, 288>}, {pipeline_mode = #tpu.pipeline_mode<synchronous>, transform_indices = @transform_6, window_bounds = array<i64: 32, 1>}, {pipeline_mode = #tpu.pipeline_mode<synchronous>, transform_indices = @transform_7, window_bounds = array<i64: 32, 1>}, {transform_indices = @transform_8, window_bounds = array<i64: 1, 32, 16>}]} {
    %c0 = arith.constant 0 : index
    %c0_0 = arith.constant 0 : index
    %c0_1 = arith.constant 0 : index
    %0 = vector.load %arg1[%c0, %c0_0, %c0_1] : memref<1x16x32xf32, #tpu.memory_space<vmem>>, vector<1x16x32xf32>
    %1 = vector.shape_cast %0 : vector<1x16x32xf32> to vector<16x32xf32>
    %c0_2 = arith.constant 0 : index
    %c0_3 = arith.constant 0 : index
    %c0_4 = arith.constant 0 : index
    %2 = vector.load %arg2[%c0_2, %c0_3, %c0_4] : memref<2x32x16xf32, #tpu.memory_space<vmem>>, vector<1x32x16xf32>
    %3 = vector.shape_cast %2 : vector<1x32x16xf32> to vector<32x16xf32>
    %cst = arith.constant dense<0.000000e+00> : vector<16x16xf32>
    %4 = tpu.matmul %1, %3, %cst {dimension_numbers = #tpu.dot_dimension_numbers<[1], [0], [0], [1], [0, 0, 1, 1], [], []>} : vector<16x32xf32>, vector<32x16xf32>, vector<16x16xf32> -> vector<16x16xf32>
    %c1 = arith.constant 1 : index
    %c0_5 = arith.constant 0 : index
    %c0_6 = arith.constant 0 : index
    %5 = vector.load %arg2[%c1, %c0_5, %c0_6] : memref<2x32x16xf32, #tpu.memory_space<vmem>>, vector<1x32x16xf32>
    %6 = vector.shape_cast %5 : vector<1x32x16xf32> to vector<32x16xf32>
    %cst_7 = arith.constant dense<0.000000e+00> : vector<16x16xf32>
    %7 = tpu.matmul %1, %6, %cst_7 {dimension_numbers = #tpu.dot_dimension_numbers<[1], [0], [0], [1], [0, 0, 1, 1], [], []>} : vector<16x32xf32>, vector<32x16xf32>, vector<16x16xf32> -> vector<16x16xf32>
    %8 = arith.maximumf %4, %7 : vector<16x16xf32>
    %c0_8 = arith.constant 0 : index
    %c0_9 = arith.constant 0 : index
    %9 = vector.load %arg3[%c0_8, %c0_9] : memref<32x144xf32, #tpu.memory_space<vmem>>, vector<32x144xf32>
    %c0_10 = arith.constant 0 : index
    %c0_11 = arith.constant 0 : index
    %10 = vector.load %arg4[%c0_10, %c0_11] : memref<32x1xf32, #tpu.memory_space<vmem>>, vector<32x1xf32>
    %c0_12 = arith.constant 0 : index
    %c0_13 = arith.constant 0 : index
    %11 = vector.load %arg5[%c0_12, %c0_13] : memref<32x1xf32, #tpu.memory_space<vmem>>, vector<32x1xf32>
    %12 = tpu.iota {dimensions = array<i32: 1>} : vector<16x16xi32>
    %c4_i32 = arith.constant 4 : i32
    %13 = tpu.dynamic_rotate %8 by %c4_i32 dim 1 : vector<16x16xf32>, i32 -> vector<16x16xf32>
    %c4_i32_14 = arith.constant 4 : i32
    %14 = vector.broadcast %c4_i32_14 : i32 to vector<16x16xi32>
    %15 = arith.cmpi sge, %12, %14 : vector<16x16xi32>
    %c20_i32 = arith.constant 20 : i32
    %16 = vector.broadcast %c20_i32 : i32 to vector<16x16xi32>
    %17 = arith.cmpi slt, %12, %16 : vector<16x16xi32>
    %18 = arith.andi %15, %17 : vector<16x16xi1>
    %cst_15 = arith.constant 0.000000e+00 : f32
    %19 = vector.broadcast %cst_15 : f32 to vector<16x16xf32>
    %20 = arith.select %18, %13, %19 : vector<16x16xi1>, vector<16x16xf32>
    %c3_i32 = arith.constant 3 : i32
    %21 = tpu.dynamic_rotate %8 by %c3_i32 dim 1 : vector<16x16xf32>, i32 -> vector<16x16xf32>
    %c3_i32_16 = arith.constant 3 : i32
    %22 = vector.broadcast %c3_i32_16 : i32 to vector<16x16xi32>
    %23 = arith.cmpi sge, %12, %22 : vector<16x16xi32>
    %c19_i32 = arith.constant 19 : i32
    %24 = vector.broadcast %c19_i32 : i32 to vector<16x16xi32>
    %25 = arith.cmpi slt, %12, %24 : vector<16x16xi32>
    %26 = arith.andi %23, %25 : vector<16x16xi1>
    %cst_17 = arith.constant 0.000000e+00 : f32
    %27 = vector.broadcast %cst_17 : f32 to vector<16x16xf32>
    %28 = arith.select %26, %21, %27 : vector<16x16xi1>, vector<16x16xf32>
    %c2_i32 = arith.constant 2 : i32
    %29 = tpu.dynamic_rotate %8 by %c2_i32 dim 1 : vector<16x16xf32>, i32 -> vector<16x16xf32>
    %c2_i32_18 = arith.constant 2 : i32
    %30 = vector.broadcast %c2_i32_18 : i32 to vector<16x16xi32>
    %31 = arith.cmpi sge, %12, %30 : vector<16x16xi32>
    %c18_i32 = arith.constant 18 : i32
    %32 = vector.broadcast %c18_i32 : i32 to vector<16x16xi32>
    %33 = arith.cmpi slt, %12, %32 : vector<16x16xi32>
    %34 = arith.andi %31, %33 : vector<16x16xi1>
    %cst_19 = arith.constant 0.000000e+00 : f32
    %35 = vector.broadcast %cst_19 : f32 to vector<16x16xf32>
    %36 = arith.select %34, %29, %35 : vector<16x16xi1>, vector<16x16xf32>
    %c1_i32 = arith.constant 1 : i32
    %37 = tpu.dynamic_rotate %8 by %c1_i32 dim 1 : vector<16x16xf32>, i32 -> vector<16x16xf32>
    %c1_i32_20 = arith.constant 1 : i32
    %38 = vector.broadcast %c1_i32_20 : i32 to vector<16x16xi32>
    %39 = arith.cmpi sge, %12, %38 : vector<16x16xi32>
    %c17_i32 = arith.constant 17 : i32
    %40 = vector.broadcast %c17_i32 : i32 to vector<16x16xi32>
    %41 = arith.cmpi slt, %12, %40 : vector<16x16xi32>
    %42 = arith.andi %39, %41 : vector<16x16xi1>
    %cst_21 = arith.constant 0.000000e+00 : f32
    %43 = vector.broadcast %cst_21 : f32 to vector<16x16xf32>
    %44 = arith.select %42, %37, %43 : vector<16x16xi1>, vector<16x16xf32>
    %c0_i32 = arith.constant 0 : i32
    %45 = vector.broadcast %c0_i32 : i32 to vector<16x16xi32>
    %46 = arith.cmpi sge, %12, %45 : vector<16x16xi32>
    %c16_i32 = arith.constant 16 : i32
    %47 = vector.broadcast %c16_i32 : i32 to vector<16x16xi32>
    %48 = arith.cmpi slt, %12, %47 : vector<16x16xi32>
    %49 = arith.andi %46, %48 : vector<16x16xi1>
    %cst_22 = arith.constant 0.000000e+00 : f32
    %50 = vector.broadcast %cst_22 : f32 to vector<16x16xf32>
    %51 = arith.select %49, %8, %50 : vector<16x16xi1>, vector<16x16xf32>
    %c15_i32 = arith.constant 15 : i32
    %52 = tpu.dynamic_rotate %8 by %c15_i32 dim 1 : vector<16x16xf32>, i32 -> vector<16x16xf32>
    %c-1_i32 = arith.constant -1 : i32
    %53 = vector.broadcast %c-1_i32 : i32 to vector<16x16xi32>
    %54 = arith.cmpi sge, %12, %53 : vector<16x16xi32>
    %c15_i32_23 = arith.constant 15 : i32
    %55 = vector.broadcast %c15_i32_23 : i32 to vector<16x16xi32>
    %56 = arith.cmpi slt, %12, %55 : vector<16x16xi32>
    %57 = arith.andi %54, %56 : vector<16x16xi1>
    %cst_24 = arith.constant 0.000000e+00 : f32
    %58 = vector.broadcast %cst_24 : f32 to vector<16x16xf32>
    %59 = arith.select %57, %52, %58 : vector<16x16xi1>, vector<16x16xf32>
    %c14_i32 = arith.constant 14 : i32
    %60 = tpu.dynamic_rotate %8 by %c14_i32 dim 1 : vector<16x16xf32>, i32 -> vector<16x16xf32>
    %c-2_i32 = arith.constant -2 : i32
    %61 = vector.broadcast %c-2_i32 : i32 to vector<16x16xi32>
    %62 = arith.cmpi sge, %12, %61 : vector<16x16xi32>
    %c14_i32_25 = arith.constant 14 : i32
    %63 = vector.broadcast %c14_i32_25 : i32 to vector<16x16xi32>
    %64 = arith.cmpi slt, %12, %63 : vector<16x16xi32>
    %65 = arith.andi %62, %64 : vector<16x16xi1>
    %cst_26 = arith.constant 0.000000e+00 : f32
    %66 = vector.broadcast %cst_26 : f32 to vector<16x16xf32>
    %67 = arith.select %65, %60, %66 : vector<16x16xi1>, vector<16x16xf32>
    %c13_i32 = arith.constant 13 : i32
    %68 = tpu.dynamic_rotate %8 by %c13_i32 dim 1 : vector<16x16xf32>, i32 -> vector<16x16xf32>
    %c-3_i32 = arith.constant -3 : i32
    %69 = vector.broadcast %c-3_i32 : i32 to vector<16x16xi32>
    %70 = arith.cmpi sge, %12, %69 : vector<16x16xi32>
    %c13_i32_27 = arith.constant 13 : i32
    %71 = vector.broadcast %c13_i32_27 : i32 to vector<16x16xi32>
    %72 = arith.cmpi slt, %12, %71 : vector<16x16xi32>
    %73 = arith.andi %70, %72 : vector<16x16xi1>
    %cst_28 = arith.constant 0.000000e+00 : f32
    %74 = vector.broadcast %cst_28 : f32 to vector<16x16xf32>
    %75 = arith.select %73, %68, %74 : vector<16x16xi1>, vector<16x16xf32>
    %c12_i32 = arith.constant 12 : i32
    %76 = tpu.dynamic_rotate %8 by %c12_i32 dim 1 : vector<16x16xf32>, i32 -> vector<16x16xf32>
    %c-4_i32 = arith.constant -4 : i32
    %77 = vector.broadcast %c-4_i32 : i32 to vector<16x16xi32>
    %78 = arith.cmpi sge, %12, %77 : vector<16x16xi32>
    %c12_i32_29 = arith.constant 12 : i32
    %79 = vector.broadcast %c12_i32_29 : i32 to vector<16x16xi32>
    %80 = arith.cmpi slt, %12, %79 : vector<16x16xi32>
    %81 = arith.andi %78, %80 : vector<16x16xi1>
    %cst_30 = arith.constant 0.000000e+00 : f32
    %82 = vector.broadcast %cst_30 : f32 to vector<16x16xf32>
    %83 = arith.select %81, %76, %82 : vector<16x16xi1>, vector<16x16xf32>
    %84 = tpu.concatenate %20, %28, %36, %44, %51, %59, %67, %75, %83 in 0 : vector<16x16xf32>, vector<16x16xf32>, vector<16x16xf32>, vector<16x16xf32>, vector<16x16xf32>, vector<16x16xf32>, vector<16x16xf32>, vector<16x16xf32>, vector<16x16xf32> -> vector<144x16xf32>
    %cst_31 = arith.constant dense<0.000000e+00> : vector<32x16xf32>
    %85 = tpu.matmul %9, %84, %cst_31 {dimension_numbers = #tpu.dot_dimension_numbers<[1], [0], [0], [1], [0, 0, 1, 1], [], []>} : vector<32x144xf32>, vector<144x16xf32>, vector<32x16xf32> -> vector<32x16xf32>
    %86 = vector.broadcast %10 : vector<32x1xf32> to vector<32x16xf32>
    %87 = arith.mulf %85, %86 : vector<32x16xf32>
    %88 = vector.broadcast %11 : vector<32x1xf32> to vector<32x16xf32>
    %89 = arith.addf %87, %88 : vector<32x16xf32>
    %cst_32 = arith.constant 0.000000e+00 : f32
    %90 = vector.broadcast %cst_32 : f32 to vector<32x16xf32>
    %91 = arith.maximumf %89, %90 : vector<32x16xf32>
    %c0_33 = arith.constant 0 : index
    %c0_34 = arith.constant 0 : index
    %92 = vector.load %arg6[%c0_33, %c0_34] : memref<32x288xf32, #tpu.memory_space<vmem>>, vector<32x288xf32>
    %c0_35 = arith.constant 0 : index
    %c0_36 = arith.constant 0 : index
    %93 = vector.load %arg7[%c0_35, %c0_36] : memref<32x1xf32, #tpu.memory_space<vmem>>, vector<32x1xf32>
    %c0_37 = arith.constant 0 : index
    %c0_38 = arith.constant 0 : index
    %94 = vector.load %arg8[%c0_37, %c0_38] : memref<32x1xf32, #tpu.memory_space<vmem>>, vector<32x1xf32>
    %95 = tpu.iota {dimensions = array<i32: 1>} : vector<32x16xi32>
    %c4_i32_39 = arith.constant 4 : i32
    %96 = tpu.dynamic_rotate %91 by %c4_i32_39 dim 1 : vector<32x16xf32>, i32 -> vector<32x16xf32>
    %c4_i32_40 = arith.constant 4 : i32
    %97 = vector.broadcast %c4_i32_40 : i32 to vector<32x16xi32>
    %98 = arith.cmpi sge, %95, %97 : vector<32x16xi32>
    %c20_i32_41 = arith.constant 20 : i32
    %99 = vector.broadcast %c20_i32_41 : i32 to vector<32x16xi32>
    %100 = arith.cmpi slt, %95, %99 : vector<32x16xi32>
    %101 = arith.andi %98, %100 : vector<32x16xi1>
    %cst_42 = arith.constant 0.000000e+00 : f32
    %102 = vector.broadcast %cst_42 : f32 to vector<32x16xf32>
    %103 = arith.select %101, %96, %102 : vector<32x16xi1>, vector<32x16xf32>
    %c3_i32_43 = arith.constant 3 : i32
    %104 = tpu.dynamic_rotate %91 by %c3_i32_43 dim 1 : vector<32x16xf32>, i32 -> vector<32x16xf32>
    %c3_i32_44 = arith.constant 3 : i32
    %105 = vector.broadcast %c3_i32_44 : i32 to vector<32x16xi32>
    %106 = arith.cmpi sge, %95, %105 : vector<32x16xi32>
    %c19_i32_45 = arith.constant 19 : i32
    %107 = vector.broadcast %c19_i32_45 : i32 to vector<32x16xi32>
    %108 = arith.cmpi slt, %95, %107 : vector<32x16xi32>
    %109 = arith.andi %106, %108 : vector<32x16xi1>
    %cst_46 = arith.constant 0.000000e+00 : f32
    %110 = vector.broadcast %cst_46 : f32 to vector<32x16xf32>
    %111 = arith.select %109, %104, %110 : vector<32x16xi1>, vector<32x16xf32>
    %c2_i32_47 = arith.constant 2 : i32
    %112 = tpu.dynamic_rotate %91 by %c2_i32_47 dim 1 : vector<32x16xf32>, i32 -> vector<32x16xf32>
    %c2_i32_48 = arith.constant 2 : i32
    %113 = vector.broadcast %c2_i32_48 : i32 to vector<32x16xi32>
    %114 = arith.cmpi sge, %95, %113 : vector<32x16xi32>
    %c18_i32_49 = arith.constant 18 : i32
    %115 = vector.broadcast %c18_i32_49 : i32 to vector<32x16xi32>
    %116 = arith.cmpi slt, %95, %115 : vector<32x16xi32>
    %117 = arith.andi %114, %116 : vector<32x16xi1>
    %cst_50 = arith.constant 0.000000e+00 : f32
    %118 = vector.broadcast %cst_50 : f32 to vector<32x16xf32>
    %119 = arith.select %117, %112, %118 : vector<32x16xi1>, vector<32x16xf32>
    %c1_i32_51 = arith.constant 1 : i32
    %120 = tpu.dynamic_rotate %91 by %c1_i32_51 dim 1 : vector<32x16xf32>, i32 -> vector<32x16xf32>
    %c1_i32_52 = arith.constant 1 : i32
    %121 = vector.broadcast %c1_i32_52 : i32 to vector<32x16xi32>
    %122 = arith.cmpi sge, %95, %121 : vector<32x16xi32>
    %c17_i32_53 = arith.constant 17 : i32
    %123 = vector.broadcast %c17_i32_53 : i32 to vector<32x16xi32>
    %124 = arith.cmpi slt, %95, %123 : vector<32x16xi32>
    %125 = arith.andi %122, %124 : vector<32x16xi1>
    %cst_54 = arith.constant 0.000000e+00 : f32
    %126 = vector.broadcast %cst_54 : f32 to vector<32x16xf32>
    %127 = arith.select %125, %120, %126 : vector<32x16xi1>, vector<32x16xf32>
    %c0_i32_55 = arith.constant 0 : i32
    %128 = vector.broadcast %c0_i32_55 : i32 to vector<32x16xi32>
    %129 = arith.cmpi sge, %95, %128 : vector<32x16xi32>
    %c16_i32_56 = arith.constant 16 : i32
    %130 = vector.broadcast %c16_i32_56 : i32 to vector<32x16xi32>
    %131 = arith.cmpi slt, %95, %130 : vector<32x16xi32>
    %132 = arith.andi %129, %131 : vector<32x16xi1>
    %cst_57 = arith.constant 0.000000e+00 : f32
    %133 = vector.broadcast %cst_57 : f32 to vector<32x16xf32>
    %134 = arith.select %132, %91, %133 : vector<32x16xi1>, vector<32x16xf32>
    %c15_i32_58 = arith.constant 15 : i32
    %135 = tpu.dynamic_rotate %91 by %c15_i32_58 dim 1 : vector<32x16xf32>, i32 -> vector<32x16xf32>
    %c-1_i32_59 = arith.constant -1 : i32
    %136 = vector.broadcast %c-1_i32_59 : i32 to vector<32x16xi32>
    %137 = arith.cmpi sge, %95, %136 : vector<32x16xi32>
    %c15_i32_60 = arith.constant 15 : i32
    %138 = vector.broadcast %c15_i32_60 : i32 to vector<32x16xi32>
    %139 = arith.cmpi slt, %95, %138 : vector<32x16xi32>
    %140 = arith.andi %137, %139 : vector<32x16xi1>
    %cst_61 = arith.constant 0.000000e+00 : f32
    %141 = vector.broadcast %cst_61 : f32 to vector<32x16xf32>
    %142 = arith.select %140, %135, %141 : vector<32x16xi1>, vector<32x16xf32>
    %c14_i32_62 = arith.constant 14 : i32
    %143 = tpu.dynamic_rotate %91 by %c14_i32_62 dim 1 : vector<32x16xf32>, i32 -> vector<32x16xf32>
    %c-2_i32_63 = arith.constant -2 : i32
    %144 = vector.broadcast %c-2_i32_63 : i32 to vector<32x16xi32>
    %145 = arith.cmpi sge, %95, %144 : vector<32x16xi32>
    %c14_i32_64 = arith.constant 14 : i32
    %146 = vector.broadcast %c14_i32_64 : i32 to vector<32x16xi32>
    %147 = arith.cmpi slt, %95, %146 : vector<32x16xi32>
    %148 = arith.andi %145, %147 : vector<32x16xi1>
    %cst_65 = arith.constant 0.000000e+00 : f32
    %149 = vector.broadcast %cst_65 : f32 to vector<32x16xf32>
    %150 = arith.select %148, %143, %149 : vector<32x16xi1>, vector<32x16xf32>
    %c13_i32_66 = arith.constant 13 : i32
    %151 = tpu.dynamic_rotate %91 by %c13_i32_66 dim 1 : vector<32x16xf32>, i32 -> vector<32x16xf32>
    %c-3_i32_67 = arith.constant -3 : i32
    %152 = vector.broadcast %c-3_i32_67 : i32 to vector<32x16xi32>
    %153 = arith.cmpi sge, %95, %152 : vector<32x16xi32>
    %c13_i32_68 = arith.constant 13 : i32
    %154 = vector.broadcast %c13_i32_68 : i32 to vector<32x16xi32>
    %155 = arith.cmpi slt, %95, %154 : vector<32x16xi32>
    %156 = arith.andi %153, %155 : vector<32x16xi1>
    %cst_69 = arith.constant 0.000000e+00 : f32
    %157 = vector.broadcast %cst_69 : f32 to vector<32x16xf32>
    %158 = arith.select %156, %151, %157 : vector<32x16xi1>, vector<32x16xf32>
    %c12_i32_70 = arith.constant 12 : i32
    %159 = tpu.dynamic_rotate %91 by %c12_i32_70 dim 1 : vector<32x16xf32>, i32 -> vector<32x16xf32>
    %c-4_i32_71 = arith.constant -4 : i32
    %160 = vector.broadcast %c-4_i32_71 : i32 to vector<32x16xi32>
    %161 = arith.cmpi sge, %95, %160 : vector<32x16xi32>
    %c12_i32_72 = arith.constant 12 : i32
    %162 = vector.broadcast %c12_i32_72 : i32 to vector<32x16xi32>
    %163 = arith.cmpi slt, %95, %162 : vector<32x16xi32>
    %164 = arith.andi %161, %163 : vector<32x16xi1>
    %cst_73 = arith.constant 0.000000e+00 : f32
    %165 = vector.broadcast %cst_73 : f32 to vector<32x16xf32>
    %166 = arith.select %164, %159, %165 : vector<32x16xi1>, vector<32x16xf32>
    %167 = tpu.concatenate %103, %111, %119, %127, %134, %142, %150, %158, %166 in 0 : vector<32x16xf32>, vector<32x16xf32>, vector<32x16xf32>, vector<32x16xf32>, vector<32x16xf32>, vector<32x16xf32>, vector<32x16xf32>, vector<32x16xf32>, vector<32x16xf32> -> vector<288x16xf32>
    %cst_74 = arith.constant dense<0.000000e+00> : vector<32x16xf32>
    %168 = tpu.matmul %92, %167, %cst_74 {dimension_numbers = #tpu.dot_dimension_numbers<[1], [0], [0], [1], [0, 0, 1, 1], [], []>} : vector<32x288xf32>, vector<288x16xf32>, vector<32x16xf32> -> vector<32x16xf32>
    %169 = vector.broadcast %93 : vector<32x1xf32> to vector<32x16xf32>
    %170 = arith.mulf %168, %169 : vector<32x16xf32>
    %171 = vector.broadcast %94 : vector<32x1xf32> to vector<32x16xf32>
    %172 = arith.addf %170, %171 : vector<32x16xf32>
    %cst_75 = arith.constant 0.000000e+00 : f32
    %173 = vector.broadcast %cst_75 : f32 to vector<32x16xf32>
    %174 = arith.maximumf %172, %173 : vector<32x16xf32>
    %c0_76 = arith.constant 0 : index
    %c0_77 = arith.constant 0 : index
    %c0_78 = arith.constant 0 : index
    %175 = vector.load %arg9[%c0_76, %c0_77, %c0_78] : memref<1x32x16xf32, #tpu.memory_space<vmem>>, vector<1x32x16xf32>
    %176 = vector.shape_cast %175 : vector<1x32x16xf32> to vector<32x16xf32>
    %177 = vector.shape_cast %174 : vector<32x16xf32> to vector<1x32x16xf32>
    tpu.vector_store %arg9[%c0_76, %c0_77, %c0_78], %177 {strides = array<i32>} : memref<1x32x16xf32, #tpu.memory_space<vmem>>, vector<1x32x16xf32>,
    return
  }
  func.func @transform_0(%arg0: i32) -> (i32, i32, i32) {
    %c0_i32 = arith.constant 0 : i32
    %c0_i32_0 = arith.constant 0 : i32
    %c0_i32_1 = arith.constant 0 : i32
    return %arg0, %c0_i32, %c0_i32_0 : i32, i32, i32
  }
  func.func @transform_1(%arg0: i32) -> (i32, i32, i32) {
    %c0_i32 = arith.constant 0 : i32
    %c0_i32_0 = arith.constant 0 : i32
    %c0_i32_1 = arith.constant 0 : i32
    %c0_i32_2 = arith.constant 0 : i32
    return %c0_i32, %c0_i32_0, %c0_i32_1 : i32, i32, i32
  }
  func.func @transform_2(%arg0: i32) -> (i32, i32) {
    %c0_i32 = arith.constant 0 : i32
    %c0_i32_0 = arith.constant 0 : i32
    %c0_i32_1 = arith.constant 0 : i32
    return %c0_i32, %c0_i32_0 : i32, i32
  }
  func.func @transform_3(%arg0: i32) -> (i32, i32) {
    %c0_i32 = arith.constant 0 : i32
    %c0_i32_0 = arith.constant 0 : i32
    %c0_i32_1 = arith.constant 0 : i32
    return %c0_i32, %c0_i32_0 : i32, i32
  }
  func.func @transform_4(%arg0: i32) -> (i32, i32) {
    %c0_i32 = arith.constant 0 : i32
    %c0_i32_0 = arith.constant 0 : i32
    %c0_i32_1 = arith.constant 0 : i32
    return %c0_i32, %c0_i32_0 : i32, i32
  }
  func.func @transform_5(%arg0: i32) -> (i32, i32) {
    %c0_i32 = arith.constant 0 : i32
    %c0_i32_0 = arith.constant 0 : i32
    %c0_i32_1 = arith.constant 0 : i32
    return %c0_i32, %c0_i32_0 : i32, i32
  }
  func.func @transform_6(%arg0: i32) -> (i32, i32) {
    %c0_i32 = arith.constant 0 : i32
    %c0_i32_0 = arith.constant 0 : i32
    %c0_i32_1 = arith.constant 0 : i32
    return %c0_i32, %c0_i32_0 : i32, i32
  }
  func.func @transform_7(%arg0: i32) -> (i32, i32) {
    %c0_i32 = arith.constant 0 : i32
    %c0_i32_0 = arith.constant 0 : i32
    %c0_i32_1 = arith.constant 0 : i32
    return %c0_i32, %c0_i32_0 : i32, i32
  }
  func.func @transform_8(%arg0: i32) -> (i32, i32, i32) {
    %c0_i32 = arith.constant 0 : i32
    %c0_i32_0 = arith.constant 0 : i32
    %c0_i32_1 = arith.constant 0 : i32
    return %arg0, %c0_i32, %c0_i32_0 : i32, i32, i32
  }
}

module attributes {stable_mosaic.version = 11 : i64} {
  func.func @_up_block_kernel(%arg0: i32, %arg1: memref<1x16x32xf32, #tpu.memory_space<vmem>>, %arg2: memref<1x32x16xf32, #tpu.memory_space<vmem>>, %arg3: memref<16x32xf32, #tpu.memory_space<vmem>>, %arg4: memref<16x144xf32, #tpu.memory_space<vmem>>, %arg5: memref<16x288xf32, #tpu.memory_space<vmem>>, %arg6: memref<16x1xf32, #tpu.memory_space<vmem>>, %arg7: memref<16x1xf32, #tpu.memory_space<vmem>>, %arg8: memref<16x144xf32, #tpu.memory_space<vmem>>, %arg9: memref<16x1xf32, #tpu.memory_space<vmem>>, %arg10: memref<16x1xf32, #tpu.memory_space<vmem>>, %arg11: memref<1x16x32xf32, #tpu.memory_space<vmem>>) attributes {dimension_semantics = [#tpu.dimension_semantics<parallel>], iteration_bounds = array<i64: 2>, scalar_prefetch = 0 : i64, scratch_operands = 0 : i64, tpu.core_type = #tpu.core_type<tc>, window_params = [{transform_indices = @transform_0, window_bounds = array<i64: 1, 16, 32>}, {transform_indices = @transform_1, window_bounds = array<i64: 1, 32, 16>}, {pipeline_mode = #tpu.pipeline_mode<synchronous>, transform_indices = @transform_2, window_bounds = array<i64: 16, 32>}, {pipeline_mode = #tpu.pipeline_mode<synchronous>, transform_indices = @transform_3, window_bounds = array<i64: 16, 144>}, {pipeline_mode = #tpu.pipeline_mode<synchronous>, transform_indices = @transform_4, window_bounds = array<i64: 16, 288>}, {pipeline_mode = #tpu.pipeline_mode<synchronous>, transform_indices = @transform_5, window_bounds = array<i64: 16, 1>}, {pipeline_mode = #tpu.pipeline_mode<synchronous>, transform_indices = @transform_6, window_bounds = array<i64: 16, 1>}, {pipeline_mode = #tpu.pipeline_mode<synchronous>, transform_indices = @transform_7, window_bounds = array<i64: 16, 144>}, {pipeline_mode = #tpu.pipeline_mode<synchronous>, transform_indices = @transform_8, window_bounds = array<i64: 16, 1>}, {pipeline_mode = #tpu.pipeline_mode<synchronous>, transform_indices = @transform_9, window_bounds = array<i64: 16, 1>}, {transform_indices = @transform_10, window_bounds = array<i64: 1, 16, 32>}]} {
    %c0 = arith.constant 0 : index
    %c0_0 = arith.constant 0 : index
    %c0_1 = arith.constant 0 : index
    %0 = vector.load %arg2[%c0, %c0_0, %c0_1] : memref<1x32x16xf32, #tpu.memory_space<vmem>>, vector<1x32x16xf32>
    %1 = vector.shape_cast %0 : vector<1x32x16xf32> to vector<32x16xf32>
    %c0_2 = arith.constant 0 : index
    %c0_3 = arith.constant 0 : index
    %2 = vector.load %arg3[%c0_2, %c0_3] : memref<16x32xf32, #tpu.memory_space<vmem>>, vector<16x32xf32>
    %cst = arith.constant dense<0.000000e+00> : vector<32x32xf32>
    %3 = tpu.matmul %1, %2, %cst {dimension_numbers = #tpu.dot_dimension_numbers<[1], [0], [0], [1], [0, 0, 1, 1], [], []>} : vector<32x16xf32>, vector<16x32xf32>, vector<32x32xf32> -> vector<32x32xf32>
    %c0_4 = arith.constant 0 : index
    %c0_5 = arith.constant 0 : index
    %4 = vector.load %arg4[%c0_4, %c0_5] : memref<16x144xf32, #tpu.memory_space<vmem>>, vector<16x144xf32>
    %c0_6 = arith.constant 0 : index
    %c0_7 = arith.constant 0 : index
    %c0_8 = arith.constant 0 : index
    %5 = vector.load %arg1[%c0_6, %c0_7, %c0_8] : memref<1x16x32xf32, #tpu.memory_space<vmem>>, vector<1x16x32xf32>
    %6 = vector.shape_cast %5 : vector<1x16x32xf32> to vector<16x32xf32>
    %7 = tpu.iota {dimensions = array<i32: 1>} : vector<16x32xi32>
    %c4_i32 = arith.constant 4 : i32
    %8 = tpu.dynamic_rotate %6 by %c4_i32 dim 1 : vector<16x32xf32>, i32 -> vector<16x32xf32>
    %c4_i32_9 = arith.constant 4 : i32
    %9 = vector.broadcast %c4_i32_9 : i32 to vector<16x32xi32>
    %10 = arith.cmpi sge, %7, %9 : vector<16x32xi32>
    %c36_i32 = arith.constant 36 : i32
    %11 = vector.broadcast %c36_i32 : i32 to vector<16x32xi32>
    %12 = arith.cmpi slt, %7, %11 : vector<16x32xi32>
    %13 = arith.andi %10, %12 : vector<16x32xi1>
    %cst_10 = arith.constant 0.000000e+00 : f32
    %14 = vector.broadcast %cst_10 : f32 to vector<16x32xf32>
    %15 = arith.select %13, %8, %14 : vector<16x32xi1>, vector<16x32xf32>
    %c3_i32 = arith.constant 3 : i32
    %16 = tpu.dynamic_rotate %6 by %c3_i32 dim 1 : vector<16x32xf32>, i32 -> vector<16x32xf32>
    %c3_i32_11 = arith.constant 3 : i32
    %17 = vector.broadcast %c3_i32_11 : i32 to vector<16x32xi32>
    %18 = arith.cmpi sge, %7, %17 : vector<16x32xi32>
    %c35_i32 = arith.constant 35 : i32
    %19 = vector.broadcast %c35_i32 : i32 to vector<16x32xi32>
    %20 = arith.cmpi slt, %7, %19 : vector<16x32xi32>
    %21 = arith.andi %18, %20 : vector<16x32xi1>
    %cst_12 = arith.constant 0.000000e+00 : f32
    %22 = vector.broadcast %cst_12 : f32 to vector<16x32xf32>
    %23 = arith.select %21, %16, %22 : vector<16x32xi1>, vector<16x32xf32>
    %c2_i32 = arith.constant 2 : i32
    %24 = tpu.dynamic_rotate %6 by %c2_i32 dim 1 : vector<16x32xf32>, i32 -> vector<16x32xf32>
    %c2_i32_13 = arith.constant 2 : i32
    %25 = vector.broadcast %c2_i32_13 : i32 to vector<16x32xi32>
    %26 = arith.cmpi sge, %7, %25 : vector<16x32xi32>
    %c34_i32 = arith.constant 34 : i32
    %27 = vector.broadcast %c34_i32 : i32 to vector<16x32xi32>
    %28 = arith.cmpi slt, %7, %27 : vector<16x32xi32>
    %29 = arith.andi %26, %28 : vector<16x32xi1>
    %cst_14 = arith.constant 0.000000e+00 : f32
    %30 = vector.broadcast %cst_14 : f32 to vector<16x32xf32>
    %31 = arith.select %29, %24, %30 : vector<16x32xi1>, vector<16x32xf32>
    %c1_i32 = arith.constant 1 : i32
    %32 = tpu.dynamic_rotate %6 by %c1_i32 dim 1 : vector<16x32xf32>, i32 -> vector<16x32xf32>
    %c1_i32_15 = arith.constant 1 : i32
    %33 = vector.broadcast %c1_i32_15 : i32 to vector<16x32xi32>
    %34 = arith.cmpi sge, %7, %33 : vector<16x32xi32>
    %c33_i32 = arith.constant 33 : i32
    %35 = vector.broadcast %c33_i32 : i32 to vector<16x32xi32>
    %36 = arith.cmpi slt, %7, %35 : vector<16x32xi32>
    %37 = arith.andi %34, %36 : vector<16x32xi1>
    %cst_16 = arith.constant 0.000000e+00 : f32
    %38 = vector.broadcast %cst_16 : f32 to vector<16x32xf32>
    %39 = arith.select %37, %32, %38 : vector<16x32xi1>, vector<16x32xf32>
    %c0_i32 = arith.constant 0 : i32
    %40 = vector.broadcast %c0_i32 : i32 to vector<16x32xi32>
    %41 = arith.cmpi sge, %7, %40 : vector<16x32xi32>
    %c32_i32 = arith.constant 32 : i32
    %42 = vector.broadcast %c32_i32 : i32 to vector<16x32xi32>
    %43 = arith.cmpi slt, %7, %42 : vector<16x32xi32>
    %44 = arith.andi %41, %43 : vector<16x32xi1>
    %cst_17 = arith.constant 0.000000e+00 : f32
    %45 = vector.broadcast %cst_17 : f32 to vector<16x32xf32>
    %46 = arith.select %44, %6, %45 : vector<16x32xi1>, vector<16x32xf32>
    %c31_i32 = arith.constant 31 : i32
    %47 = tpu.dynamic_rotate %6 by %c31_i32 dim 1 : vector<16x32xf32>, i32 -> vector<16x32xf32>
    %c-1_i32 = arith.constant -1 : i32
    %48 = vector.broadcast %c-1_i32 : i32 to vector<16x32xi32>
    %49 = arith.cmpi sge, %7, %48 : vector<16x32xi32>
    %c31_i32_18 = arith.constant 31 : i32
    %50 = vector.broadcast %c31_i32_18 : i32 to vector<16x32xi32>
    %51 = arith.cmpi slt, %7, %50 : vector<16x32xi32>
    %52 = arith.andi %49, %51 : vector<16x32xi1>
    %cst_19 = arith.constant 0.000000e+00 : f32
    %53 = vector.broadcast %cst_19 : f32 to vector<16x32xf32>
    %54 = arith.select %52, %47, %53 : vector<16x32xi1>, vector<16x32xf32>
    %c30_i32 = arith.constant 30 : i32
    %55 = tpu.dynamic_rotate %6 by %c30_i32 dim 1 : vector<16x32xf32>, i32 -> vector<16x32xf32>
    %c-2_i32 = arith.constant -2 : i32
    %56 = vector.broadcast %c-2_i32 : i32 to vector<16x32xi32>
    %57 = arith.cmpi sge, %7, %56 : vector<16x32xi32>
    %c30_i32_20 = arith.constant 30 : i32
    %58 = vector.broadcast %c30_i32_20 : i32 to vector<16x32xi32>
    %59 = arith.cmpi slt, %7, %58 : vector<16x32xi32>
    %60 = arith.andi %57, %59 : vector<16x32xi1>
    %cst_21 = arith.constant 0.000000e+00 : f32
    %61 = vector.broadcast %cst_21 : f32 to vector<16x32xf32>
    %62 = arith.select %60, %55, %61 : vector<16x32xi1>, vector<16x32xf32>
    %c29_i32 = arith.constant 29 : i32
    %63 = tpu.dynamic_rotate %6 by %c29_i32 dim 1 : vector<16x32xf32>, i32 -> vector<16x32xf32>
    %c-3_i32 = arith.constant -3 : i32
    %64 = vector.broadcast %c-3_i32 : i32 to vector<16x32xi32>
    %65 = arith.cmpi sge, %7, %64 : vector<16x32xi32>
    %c29_i32_22 = arith.constant 29 : i32
    %66 = vector.broadcast %c29_i32_22 : i32 to vector<16x32xi32>
    %67 = arith.cmpi slt, %7, %66 : vector<16x32xi32>
    %68 = arith.andi %65, %67 : vector<16x32xi1>
    %cst_23 = arith.constant 0.000000e+00 : f32
    %69 = vector.broadcast %cst_23 : f32 to vector<16x32xf32>
    %70 = arith.select %68, %63, %69 : vector<16x32xi1>, vector<16x32xf32>
    %c28_i32 = arith.constant 28 : i32
    %71 = tpu.dynamic_rotate %6 by %c28_i32 dim 1 : vector<16x32xf32>, i32 -> vector<16x32xf32>
    %c-4_i32 = arith.constant -4 : i32
    %72 = vector.broadcast %c-4_i32 : i32 to vector<16x32xi32>
    %73 = arith.cmpi sge, %7, %72 : vector<16x32xi32>
    %c28_i32_24 = arith.constant 28 : i32
    %74 = vector.broadcast %c28_i32_24 : i32 to vector<16x32xi32>
    %75 = arith.cmpi slt, %7, %74 : vector<16x32xi32>
    %76 = arith.andi %73, %75 : vector<16x32xi1>
    %cst_25 = arith.constant 0.000000e+00 : f32
    %77 = vector.broadcast %cst_25 : f32 to vector<16x32xf32>
    %78 = arith.select %76, %71, %77 : vector<16x32xi1>, vector<16x32xf32>
    %79 = tpu.concatenate %15, %23, %31, %39, %46, %54, %62, %70, %78 in 0 : vector<16x32xf32>, vector<16x32xf32>, vector<16x32xf32>, vector<16x32xf32>, vector<16x32xf32>, vector<16x32xf32>, vector<16x32xf32>, vector<16x32xf32>, vector<16x32xf32> -> vector<144x32xf32>
    %cst_26 = arith.constant dense<0.000000e+00> : vector<16x32xf32>
    %80 = tpu.matmul %4, %79, %cst_26 {dimension_numbers = #tpu.dot_dimension_numbers<[1], [0], [0], [1], [0, 0, 1, 1], [], []>} : vector<16x144xf32>, vector<144x32xf32>, vector<16x32xf32> -> vector<16x32xf32>
    %c0_27 = arith.constant 0 : index
    %c0_28 = arith.constant 0 : index
    %81 = vector.load %arg5[%c0_27, %c0_28] : memref<16x288xf32, #tpu.memory_space<vmem>>, vector<16x288xf32>
    %82 = tpu.iota {dimensions = array<i32: 1>} : vector<32x32xi32>
    %c4_i32_29 = arith.constant 4 : i32
    %83 = tpu.dynamic_rotate %3 by %c4_i32_29 dim 1 : vector<32x32xf32>, i32 -> vector<32x32xf32>
    %c4_i32_30 = arith.constant 4 : i32
    %84 = vector.broadcast %c4_i32_30 : i32 to vector<32x32xi32>
    %85 = arith.cmpi sge, %82, %84 : vector<32x32xi32>
    %c36_i32_31 = arith.constant 36 : i32
    %86 = vector.broadcast %c36_i32_31 : i32 to vector<32x32xi32>
    %87 = arith.cmpi slt, %82, %86 : vector<32x32xi32>
    %88 = arith.andi %85, %87 : vector<32x32xi1>
    %cst_32 = arith.constant 0.000000e+00 : f32
    %89 = vector.broadcast %cst_32 : f32 to vector<32x32xf32>
    %90 = arith.select %88, %83, %89 : vector<32x32xi1>, vector<32x32xf32>
    %c3_i32_33 = arith.constant 3 : i32
    %91 = tpu.dynamic_rotate %3 by %c3_i32_33 dim 1 : vector<32x32xf32>, i32 -> vector<32x32xf32>
    %c3_i32_34 = arith.constant 3 : i32
    %92 = vector.broadcast %c3_i32_34 : i32 to vector<32x32xi32>
    %93 = arith.cmpi sge, %82, %92 : vector<32x32xi32>
    %c35_i32_35 = arith.constant 35 : i32
    %94 = vector.broadcast %c35_i32_35 : i32 to vector<32x32xi32>
    %95 = arith.cmpi slt, %82, %94 : vector<32x32xi32>
    %96 = arith.andi %93, %95 : vector<32x32xi1>
    %cst_36 = arith.constant 0.000000e+00 : f32
    %97 = vector.broadcast %cst_36 : f32 to vector<32x32xf32>
    %98 = arith.select %96, %91, %97 : vector<32x32xi1>, vector<32x32xf32>
    %c2_i32_37 = arith.constant 2 : i32
    %99 = tpu.dynamic_rotate %3 by %c2_i32_37 dim 1 : vector<32x32xf32>, i32 -> vector<32x32xf32>
    %c2_i32_38 = arith.constant 2 : i32
    %100 = vector.broadcast %c2_i32_38 : i32 to vector<32x32xi32>
    %101 = arith.cmpi sge, %82, %100 : vector<32x32xi32>
    %c34_i32_39 = arith.constant 34 : i32
    %102 = vector.broadcast %c34_i32_39 : i32 to vector<32x32xi32>
    %103 = arith.cmpi slt, %82, %102 : vector<32x32xi32>
    %104 = arith.andi %101, %103 : vector<32x32xi1>
    %cst_40 = arith.constant 0.000000e+00 : f32
    %105 = vector.broadcast %cst_40 : f32 to vector<32x32xf32>
    %106 = arith.select %104, %99, %105 : vector<32x32xi1>, vector<32x32xf32>
    %c1_i32_41 = arith.constant 1 : i32
    %107 = tpu.dynamic_rotate %3 by %c1_i32_41 dim 1 : vector<32x32xf32>, i32 -> vector<32x32xf32>
    %c1_i32_42 = arith.constant 1 : i32
    %108 = vector.broadcast %c1_i32_42 : i32 to vector<32x32xi32>
    %109 = arith.cmpi sge, %82, %108 : vector<32x32xi32>
    %c33_i32_43 = arith.constant 33 : i32
    %110 = vector.broadcast %c33_i32_43 : i32 to vector<32x32xi32>
    %111 = arith.cmpi slt, %82, %110 : vector<32x32xi32>
    %112 = arith.andi %109, %111 : vector<32x32xi1>
    %cst_44 = arith.constant 0.000000e+00 : f32
    %113 = vector.broadcast %cst_44 : f32 to vector<32x32xf32>
    %114 = arith.select %112, %107, %113 : vector<32x32xi1>, vector<32x32xf32>
    %c0_i32_45 = arith.constant 0 : i32
    %115 = vector.broadcast %c0_i32_45 : i32 to vector<32x32xi32>
    %116 = arith.cmpi sge, %82, %115 : vector<32x32xi32>
    %c32_i32_46 = arith.constant 32 : i32
    %117 = vector.broadcast %c32_i32_46 : i32 to vector<32x32xi32>
    %118 = arith.cmpi slt, %82, %117 : vector<32x32xi32>
    %119 = arith.andi %116, %118 : vector<32x32xi1>
    %cst_47 = arith.constant 0.000000e+00 : f32
    %120 = vector.broadcast %cst_47 : f32 to vector<32x32xf32>
    %121 = arith.select %119, %3, %120 : vector<32x32xi1>, vector<32x32xf32>
    %c31_i32_48 = arith.constant 31 : i32
    %122 = tpu.dynamic_rotate %3 by %c31_i32_48 dim 1 : vector<32x32xf32>, i32 -> vector<32x32xf32>
    %c-1_i32_49 = arith.constant -1 : i32
    %123 = vector.broadcast %c-1_i32_49 : i32 to vector<32x32xi32>
    %124 = arith.cmpi sge, %82, %123 : vector<32x32xi32>
    %c31_i32_50 = arith.constant 31 : i32
    %125 = vector.broadcast %c31_i32_50 : i32 to vector<32x32xi32>
    %126 = arith.cmpi slt, %82, %125 : vector<32x32xi32>
    %127 = arith.andi %124, %126 : vector<32x32xi1>
    %cst_51 = arith.constant 0.000000e+00 : f32
    %128 = vector.broadcast %cst_51 : f32 to vector<32x32xf32>
    %129 = arith.select %127, %122, %128 : vector<32x32xi1>, vector<32x32xf32>
    %c30_i32_52 = arith.constant 30 : i32
    %130 = tpu.dynamic_rotate %3 by %c30_i32_52 dim 1 : vector<32x32xf32>, i32 -> vector<32x32xf32>
    %c-2_i32_53 = arith.constant -2 : i32
    %131 = vector.broadcast %c-2_i32_53 : i32 to vector<32x32xi32>
    %132 = arith.cmpi sge, %82, %131 : vector<32x32xi32>
    %c30_i32_54 = arith.constant 30 : i32
    %133 = vector.broadcast %c30_i32_54 : i32 to vector<32x32xi32>
    %134 = arith.cmpi slt, %82, %133 : vector<32x32xi32>
    %135 = arith.andi %132, %134 : vector<32x32xi1>
    %cst_55 = arith.constant 0.000000e+00 : f32
    %136 = vector.broadcast %cst_55 : f32 to vector<32x32xf32>
    %137 = arith.select %135, %130, %136 : vector<32x32xi1>, vector<32x32xf32>
    %c29_i32_56 = arith.constant 29 : i32
    %138 = tpu.dynamic_rotate %3 by %c29_i32_56 dim 1 : vector<32x32xf32>, i32 -> vector<32x32xf32>
    %c-3_i32_57 = arith.constant -3 : i32
    %139 = vector.broadcast %c-3_i32_57 : i32 to vector<32x32xi32>
    %140 = arith.cmpi sge, %82, %139 : vector<32x32xi32>
    %c29_i32_58 = arith.constant 29 : i32
    %141 = vector.broadcast %c29_i32_58 : i32 to vector<32x32xi32>
    %142 = arith.cmpi slt, %82, %141 : vector<32x32xi32>
    %143 = arith.andi %140, %142 : vector<32x32xi1>
    %cst_59 = arith.constant 0.000000e+00 : f32
    %144 = vector.broadcast %cst_59 : f32 to vector<32x32xf32>
    %145 = arith.select %143, %138, %144 : vector<32x32xi1>, vector<32x32xf32>
    %c28_i32_60 = arith.constant 28 : i32
    %146 = tpu.dynamic_rotate %3 by %c28_i32_60 dim 1 : vector<32x32xf32>, i32 -> vector<32x32xf32>
    %c-4_i32_61 = arith.constant -4 : i32
    %147 = vector.broadcast %c-4_i32_61 : i32 to vector<32x32xi32>
    %148 = arith.cmpi sge, %82, %147 : vector<32x32xi32>
    %c28_i32_62 = arith.constant 28 : i32
    %149 = vector.broadcast %c28_i32_62 : i32 to vector<32x32xi32>
    %150 = arith.cmpi slt, %82, %149 : vector<32x32xi32>
    %151 = arith.andi %148, %150 : vector<32x32xi1>
    %cst_63 = arith.constant 0.000000e+00 : f32
    %152 = vector.broadcast %cst_63 : f32 to vector<32x32xf32>
    %153 = arith.select %151, %146, %152 : vector<32x32xi1>, vector<32x32xf32>
    %154 = tpu.concatenate %90, %98, %106, %114, %121, %129, %137, %145, %153 in 0 : vector<32x32xf32>, vector<32x32xf32>, vector<32x32xf32>, vector<32x32xf32>, vector<32x32xf32>, vector<32x32xf32>, vector<32x32xf32>, vector<32x32xf32>, vector<32x32xf32> -> vector<288x32xf32>
    %cst_64 = arith.constant dense<0.000000e+00> : vector<16x32xf32>
    %155 = tpu.matmul %81, %154, %cst_64 {dimension_numbers = #tpu.dot_dimension_numbers<[1], [0], [0], [1], [0, 0, 1, 1], [], []>} : vector<16x288xf32>, vector<288x32xf32>, vector<16x32xf32> -> vector<16x32xf32>
    %156 = arith.addf %80, %155 : vector<16x32xf32>
    %c0_65 = arith.constant 0 : index
    %c0_66 = arith.constant 0 : index
    %157 = vector.load %arg6[%c0_65, %c0_66] : memref<16x1xf32, #tpu.memory_space<vmem>>, vector<16x1xf32>
    %158 = vector.broadcast %157 : vector<16x1xf32> to vector<16x32xf32>
    %159 = arith.mulf %156, %158 : vector<16x32xf32>
    %c0_67 = arith.constant 0 : index
    %c0_68 = arith.constant 0 : index
    %160 = vector.load %arg7[%c0_67, %c0_68] : memref<16x1xf32, #tpu.memory_space<vmem>>, vector<16x1xf32>
    %161 = vector.broadcast %160 : vector<16x1xf32> to vector<16x32xf32>
    %162 = arith.addf %159, %161 : vector<16x32xf32>
    %cst_69 = arith.constant 0.000000e+00 : f32
    %163 = vector.broadcast %cst_69 : f32 to vector<16x32xf32>
    %164 = arith.maximumf %162, %163 : vector<16x32xf32>
    %c0_70 = arith.constant 0 : index
    %c0_71 = arith.constant 0 : index
    %165 = vector.load %arg8[%c0_70, %c0_71] : memref<16x144xf32, #tpu.memory_space<vmem>>, vector<16x144xf32>
    %c0_72 = arith.constant 0 : index
    %c0_73 = arith.constant 0 : index
    %166 = vector.load %arg9[%c0_72, %c0_73] : memref<16x1xf32, #tpu.memory_space<vmem>>, vector<16x1xf32>
    %c0_74 = arith.constant 0 : index
    %c0_75 = arith.constant 0 : index
    %167 = vector.load %arg10[%c0_74, %c0_75] : memref<16x1xf32, #tpu.memory_space<vmem>>, vector<16x1xf32>
    %168 = tpu.iota {dimensions = array<i32: 1>} : vector<16x32xi32>
    %c4_i32_76 = arith.constant 4 : i32
    %169 = tpu.dynamic_rotate %164 by %c4_i32_76 dim 1 : vector<16x32xf32>, i32 -> vector<16x32xf32>
    %c4_i32_77 = arith.constant 4 : i32
    %170 = vector.broadcast %c4_i32_77 : i32 to vector<16x32xi32>
    %171 = arith.cmpi sge, %168, %170 : vector<16x32xi32>
    %c36_i32_78 = arith.constant 36 : i32
    %172 = vector.broadcast %c36_i32_78 : i32 to vector<16x32xi32>
    %173 = arith.cmpi slt, %168, %172 : vector<16x32xi32>
    %174 = arith.andi %171, %173 : vector<16x32xi1>
    %cst_79 = arith.constant 0.000000e+00 : f32
    %175 = vector.broadcast %cst_79 : f32 to vector<16x32xf32>
    %176 = arith.select %174, %169, %175 : vector<16x32xi1>, vector<16x32xf32>
    %c3_i32_80 = arith.constant 3 : i32
    %177 = tpu.dynamic_rotate %164 by %c3_i32_80 dim 1 : vector<16x32xf32>, i32 -> vector<16x32xf32>
    %c3_i32_81 = arith.constant 3 : i32
    %178 = vector.broadcast %c3_i32_81 : i32 to vector<16x32xi32>
    %179 = arith.cmpi sge, %168, %178 : vector<16x32xi32>
    %c35_i32_82 = arith.constant 35 : i32
    %180 = vector.broadcast %c35_i32_82 : i32 to vector<16x32xi32>
    %181 = arith.cmpi slt, %168, %180 : vector<16x32xi32>
    %182 = arith.andi %179, %181 : vector<16x32xi1>
    %cst_83 = arith.constant 0.000000e+00 : f32
    %183 = vector.broadcast %cst_83 : f32 to vector<16x32xf32>
    %184 = arith.select %182, %177, %183 : vector<16x32xi1>, vector<16x32xf32>
    %c2_i32_84 = arith.constant 2 : i32
    %185 = tpu.dynamic_rotate %164 by %c2_i32_84 dim 1 : vector<16x32xf32>, i32 -> vector<16x32xf32>
    %c2_i32_85 = arith.constant 2 : i32
    %186 = vector.broadcast %c2_i32_85 : i32 to vector<16x32xi32>
    %187 = arith.cmpi sge, %168, %186 : vector<16x32xi32>
    %c34_i32_86 = arith.constant 34 : i32
    %188 = vector.broadcast %c34_i32_86 : i32 to vector<16x32xi32>
    %189 = arith.cmpi slt, %168, %188 : vector<16x32xi32>
    %190 = arith.andi %187, %189 : vector<16x32xi1>
    %cst_87 = arith.constant 0.000000e+00 : f32
    %191 = vector.broadcast %cst_87 : f32 to vector<16x32xf32>
    %192 = arith.select %190, %185, %191 : vector<16x32xi1>, vector<16x32xf32>
    %c1_i32_88 = arith.constant 1 : i32
    %193 = tpu.dynamic_rotate %164 by %c1_i32_88 dim 1 : vector<16x32xf32>, i32 -> vector<16x32xf32>
    %c1_i32_89 = arith.constant 1 : i32
    %194 = vector.broadcast %c1_i32_89 : i32 to vector<16x32xi32>
    %195 = arith.cmpi sge, %168, %194 : vector<16x32xi32>
    %c33_i32_90 = arith.constant 33 : i32
    %196 = vector.broadcast %c33_i32_90 : i32 to vector<16x32xi32>
    %197 = arith.cmpi slt, %168, %196 : vector<16x32xi32>
    %198 = arith.andi %195, %197 : vector<16x32xi1>
    %cst_91 = arith.constant 0.000000e+00 : f32
    %199 = vector.broadcast %cst_91 : f32 to vector<16x32xf32>
    %200 = arith.select %198, %193, %199 : vector<16x32xi1>, vector<16x32xf32>
    %c0_i32_92 = arith.constant 0 : i32
    %201 = vector.broadcast %c0_i32_92 : i32 to vector<16x32xi32>
    %202 = arith.cmpi sge, %168, %201 : vector<16x32xi32>
    %c32_i32_93 = arith.constant 32 : i32
    %203 = vector.broadcast %c32_i32_93 : i32 to vector<16x32xi32>
    %204 = arith.cmpi slt, %168, %203 : vector<16x32xi32>
    %205 = arith.andi %202, %204 : vector<16x32xi1>
    %cst_94 = arith.constant 0.000000e+00 : f32
    %206 = vector.broadcast %cst_94 : f32 to vector<16x32xf32>
    %207 = arith.select %205, %164, %206 : vector<16x32xi1>, vector<16x32xf32>
    %c31_i32_95 = arith.constant 31 : i32
    %208 = tpu.dynamic_rotate %164 by %c31_i32_95 dim 1 : vector<16x32xf32>, i32 -> vector<16x32xf32>
    %c-1_i32_96 = arith.constant -1 : i32
    %209 = vector.broadcast %c-1_i32_96 : i32 to vector<16x32xi32>
    %210 = arith.cmpi sge, %168, %209 : vector<16x32xi32>
    %c31_i32_97 = arith.constant 31 : i32
    %211 = vector.broadcast %c31_i32_97 : i32 to vector<16x32xi32>
    %212 = arith.cmpi slt, %168, %211 : vector<16x32xi32>
    %213 = arith.andi %210, %212 : vector<16x32xi1>
    %cst_98 = arith.constant 0.000000e+00 : f32
    %214 = vector.broadcast %cst_98 : f32 to vector<16x32xf32>
    %215 = arith.select %213, %208, %214 : vector<16x32xi1>, vector<16x32xf32>
    %c30_i32_99 = arith.constant 30 : i32
    %216 = tpu.dynamic_rotate %164 by %c30_i32_99 dim 1 : vector<16x32xf32>, i32 -> vector<16x32xf32>
    %c-2_i32_100 = arith.constant -2 : i32
    %217 = vector.broadcast %c-2_i32_100 : i32 to vector<16x32xi32>
    %218 = arith.cmpi sge, %168, %217 : vector<16x32xi32>
    %c30_i32_101 = arith.constant 30 : i32
    %219 = vector.broadcast %c30_i32_101 : i32 to vector<16x32xi32>
    %220 = arith.cmpi slt, %168, %219 : vector<16x32xi32>
    %221 = arith.andi %218, %220 : vector<16x32xi1>
    %cst_102 = arith.constant 0.000000e+00 : f32
    %222 = vector.broadcast %cst_102 : f32 to vector<16x32xf32>
    %223 = arith.select %221, %216, %222 : vector<16x32xi1>, vector<16x32xf32>
    %c29_i32_103 = arith.constant 29 : i32
    %224 = tpu.dynamic_rotate %164 by %c29_i32_103 dim 1 : vector<16x32xf32>, i32 -> vector<16x32xf32>
    %c-3_i32_104 = arith.constant -3 : i32
    %225 = vector.broadcast %c-3_i32_104 : i32 to vector<16x32xi32>
    %226 = arith.cmpi sge, %168, %225 : vector<16x32xi32>
    %c29_i32_105 = arith.constant 29 : i32
    %227 = vector.broadcast %c29_i32_105 : i32 to vector<16x32xi32>
    %228 = arith.cmpi slt, %168, %227 : vector<16x32xi32>
    %229 = arith.andi %226, %228 : vector<16x32xi1>
    %cst_106 = arith.constant 0.000000e+00 : f32
    %230 = vector.broadcast %cst_106 : f32 to vector<16x32xf32>
    %231 = arith.select %229, %224, %230 : vector<16x32xi1>, vector<16x32xf32>
    %c28_i32_107 = arith.constant 28 : i32
    %232 = tpu.dynamic_rotate %164 by %c28_i32_107 dim 1 : vector<16x32xf32>, i32 -> vector<16x32xf32>
    %c-4_i32_108 = arith.constant -4 : i32
    %233 = vector.broadcast %c-4_i32_108 : i32 to vector<16x32xi32>
    %234 = arith.cmpi sge, %168, %233 : vector<16x32xi32>
    %c28_i32_109 = arith.constant 28 : i32
    %235 = vector.broadcast %c28_i32_109 : i32 to vector<16x32xi32>
    %236 = arith.cmpi slt, %168, %235 : vector<16x32xi32>
    %237 = arith.andi %234, %236 : vector<16x32xi1>
    %cst_110 = arith.constant 0.000000e+00 : f32
    %238 = vector.broadcast %cst_110 : f32 to vector<16x32xf32>
    %239 = arith.select %237, %232, %238 : vector<16x32xi1>, vector<16x32xf32>
    %240 = tpu.concatenate %176, %184, %192, %200, %207, %215, %223, %231, %239 in 0 : vector<16x32xf32>, vector<16x32xf32>, vector<16x32xf32>, vector<16x32xf32>, vector<16x32xf32>, vector<16x32xf32>, vector<16x32xf32>, vector<16x32xf32>, vector<16x32xf32> -> vector<144x32xf32>
    %cst_111 = arith.constant dense<0.000000e+00> : vector<16x32xf32>
    %241 = tpu.matmul %165, %240, %cst_111 {dimension_numbers = #tpu.dot_dimension_numbers<[1], [0], [0], [1], [0, 0, 1, 1], [], []>} : vector<16x144xf32>, vector<144x32xf32>, vector<16x32xf32> -> vector<16x32xf32>
    %242 = vector.broadcast %166 : vector<16x1xf32> to vector<16x32xf32>
    %243 = arith.mulf %241, %242 : vector<16x32xf32>
    %244 = vector.broadcast %167 : vector<16x1xf32> to vector<16x32xf32>
    %245 = arith.addf %243, %244 : vector<16x32xf32>
    %cst_112 = arith.constant 0.000000e+00 : f32
    %246 = vector.broadcast %cst_112 : f32 to vector<16x32xf32>
    %247 = arith.maximumf %245, %246 : vector<16x32xf32>
    %c0_113 = arith.constant 0 : index
    %c0_114 = arith.constant 0 : index
    %c0_115 = arith.constant 0 : index
    %248 = vector.load %arg11[%c0_113, %c0_114, %c0_115] : memref<1x16x32xf32, #tpu.memory_space<vmem>>, vector<1x16x32xf32>
    %249 = vector.shape_cast %248 : vector<1x16x32xf32> to vector<16x32xf32>
    %250 = vector.shape_cast %247 : vector<16x32xf32> to vector<1x16x32xf32>
    tpu.vector_store %arg11[%c0_113, %c0_114, %c0_115], %250 {strides = array<i32>} : memref<1x16x32xf32, #tpu.memory_space<vmem>>, vector<1x16x32xf32>,
    return
  }
  func.func @transform_0(%arg0: i32) -> (i32, i32, i32) {
    %c0_i32 = arith.constant 0 : i32
    %c0_i32_0 = arith.constant 0 : i32
    %c0_i32_1 = arith.constant 0 : i32
    return %arg0, %c0_i32, %c0_i32_0 : i32, i32, i32
  }
  func.func @transform_1(%arg0: i32) -> (i32, i32, i32) {
    %c0_i32 = arith.constant 0 : i32
    %c0_i32_0 = arith.constant 0 : i32
    %c0_i32_1 = arith.constant 0 : i32
    return %arg0, %c0_i32, %c0_i32_0 : i32, i32, i32
  }
  func.func @transform_2(%arg0: i32) -> (i32, i32) {
    %c0_i32 = arith.constant 0 : i32
    %c0_i32_0 = arith.constant 0 : i32
    %c0_i32_1 = arith.constant 0 : i32
    return %c0_i32, %c0_i32_0 : i32, i32
  }
  func.func @transform_3(%arg0: i32) -> (i32, i32) {
    %c0_i32 = arith.constant 0 : i32
    %c0_i32_0 = arith.constant 0 : i32
    %c0_i32_1 = arith.constant 0 : i32
    return %c0_i32, %c0_i32_0 : i32, i32
  }
  func.func @transform_4(%arg0: i32) -> (i32, i32) {
    %c0_i32 = arith.constant 0 : i32
    %c0_i32_0 = arith.constant 0 : i32
    %c0_i32_1 = arith.constant 0 : i32
    return %c0_i32, %c0_i32_0 : i32, i32
  }
  func.func @transform_5(%arg0: i32) -> (i32, i32) {
    %c0_i32 = arith.constant 0 : i32
    %c0_i32_0 = arith.constant 0 : i32
    %c0_i32_1 = arith.constant 0 : i32
    return %c0_i32, %c0_i32_0 : i32, i32
  }
  func.func @transform_6(%arg0: i32) -> (i32, i32) {
    %c0_i32 = arith.constant 0 : i32
    %c0_i32_0 = arith.constant 0 : i32
    %c0_i32_1 = arith.constant 0 : i32
    return %c0_i32, %c0_i32_0 : i32, i32
  }
  func.func @transform_7(%arg0: i32) -> (i32, i32) {
    %c0_i32 = arith.constant 0 : i32
    %c0_i32_0 = arith.constant 0 : i32
    %c0_i32_1 = arith.constant 0 : i32
    return %c0_i32, %c0_i32_0 : i32, i32
  }
  func.func @transform_8(%arg0: i32) -> (i32, i32) {
    %c0_i32 = arith.constant 0 : i32
    %c0_i32_0 = arith.constant 0 : i32
    %c0_i32_1 = arith.constant 0 : i32
    return %c0_i32, %c0_i32_0 : i32, i32
  }
  func.func @transform_9(%arg0: i32) -> (i32, i32) {
    %c0_i32 = arith.constant 0 : i32
    %c0_i32_0 = arith.constant 0 : i32
    %c0_i32_1 = arith.constant 0 : i32
    return %c0_i32, %c0_i32_0 : i32, i32
  }
  func.func @transform_10(%arg0: i32) -> (i32, i32, i32) {
    %c0_i32 = arith.constant 0 : i32
    %c0_i32_0 = arith.constant 0 : i32
    %c0_i32_1 = arith.constant 0 : i32
    return %arg0, %c0_i32, %c0_i32_0 : i32, i32, i32
  }
}

module attributes {stable_mosaic.version = 11 : i64} {
  func.func @_up_block_kernel(%arg0: i32, %arg1: memref<1x8x64xf32, #tpu.memory_space<vmem>>, %arg2: memref<1x16x32xf32, #tpu.memory_space<vmem>>, %arg3: memref<32x64xf32, #tpu.memory_space<vmem>>, %arg4: memref<8x72xf32, #tpu.memory_space<vmem>>, %arg5: memref<8x144xf32, #tpu.memory_space<vmem>>, %arg6: memref<8x1xf32, #tpu.memory_space<vmem>>, %arg7: memref<8x1xf32, #tpu.memory_space<vmem>>, %arg8: memref<8x72xf32, #tpu.memory_space<vmem>>, %arg9: memref<8x1xf32, #tpu.memory_space<vmem>>, %arg10: memref<8x1xf32, #tpu.memory_space<vmem>>, %arg11: memref<8x72xf32, #tpu.memory_space<vmem>>, %arg12: memref<8x1xf32, #tpu.memory_space<vmem>>, %arg13: memref<8x1xf32, #tpu.memory_space<vmem>>, %arg14: memref<1x8x64xf32, #tpu.memory_space<vmem>>) attributes {dimension_semantics = [#tpu.dimension_semantics<parallel>], iteration_bounds = array<i64: 2>, scalar_prefetch = 0 : i64, scratch_operands = 0 : i64, tpu.core_type = #tpu.core_type<tc>, window_params = [{transform_indices = @transform_0, window_bounds = array<i64: 1, 8, 64>}, {transform_indices = @transform_1, window_bounds = array<i64: 1, 16, 32>}, {pipeline_mode = #tpu.pipeline_mode<synchronous>, transform_indices = @transform_2, window_bounds = array<i64: 32, 64>}, {pipeline_mode = #tpu.pipeline_mode<synchronous>, transform_indices = @transform_3, window_bounds = array<i64: 8, 72>}, {pipeline_mode = #tpu.pipeline_mode<synchronous>, transform_indices = @transform_4, window_bounds = array<i64: 8, 144>}, {pipeline_mode = #tpu.pipeline_mode<synchronous>, transform_indices = @transform_5, window_bounds = array<i64: 8, 1>}, {pipeline_mode = #tpu.pipeline_mode<synchronous>, transform_indices = @transform_6, window_bounds = array<i64: 8, 1>}, {pipeline_mode = #tpu.pipeline_mode<synchronous>, transform_indices = @transform_7, window_bounds = array<i64: 8, 72>}, {pipeline_mode = #tpu.pipeline_mode<synchronous>, transform_indices = @transform_8, window_bounds = array<i64: 8, 1>}, {pipeline_mode = #tpu.pipeline_mode<synchronous>, transform_indices = @transform_9, window_bounds = array<i64: 8, 1>}, {pipeline_mode = #tpu.pipeline_mode<synchronous>, transform_indices = @transform_10, window_bounds = array<i64: 8, 72>}, {pipeline_mode = #tpu.pipeline_mode<synchronous>, transform_indices = @transform_11, window_bounds = array<i64: 8, 1>}, {pipeline_mode = #tpu.pipeline_mode<synchronous>, transform_indices = @transform_12, window_bounds = array<i64: 8, 1>}, {transform_indices = @transform_13, window_bounds = array<i64: 1, 8, 64>}]} {
    %c0 = arith.constant 0 : index
    %c0_0 = arith.constant 0 : index
    %c0_1 = arith.constant 0 : index
    %0 = vector.load %arg2[%c0, %c0_0, %c0_1] : memref<1x16x32xf32, #tpu.memory_space<vmem>>, vector<1x16x32xf32>
    %1 = vector.shape_cast %0 : vector<1x16x32xf32> to vector<16x32xf32>
    %c0_2 = arith.constant 0 : index
    %c0_3 = arith.constant 0 : index
    %2 = vector.load %arg3[%c0_2, %c0_3] : memref<32x64xf32, #tpu.memory_space<vmem>>, vector<32x64xf32>
    %cst = arith.constant dense<0.000000e+00> : vector<16x64xf32>
    %3 = tpu.matmul %1, %2, %cst {dimension_numbers = #tpu.dot_dimension_numbers<[1], [0], [0], [1], [0, 0, 1, 1], [], []>} : vector<16x32xf32>, vector<32x64xf32>, vector<16x64xf32> -> vector<16x64xf32>
    %c0_4 = arith.constant 0 : index
    %c0_5 = arith.constant 0 : index
    %4 = vector.load %arg4[%c0_4, %c0_5] : memref<8x72xf32, #tpu.memory_space<vmem>>, vector<8x72xf32>
    %c0_6 = arith.constant 0 : index
    %c0_7 = arith.constant 0 : index
    %c0_8 = arith.constant 0 : index
    %5 = vector.load %arg1[%c0_6, %c0_7, %c0_8] : memref<1x8x64xf32, #tpu.memory_space<vmem>>, vector<1x8x64xf32>
    %6 = vector.shape_cast %5 : vector<1x8x64xf32> to vector<8x64xf32>
    %7 = tpu.iota {dimensions = array<i32: 1>} : vector<8x64xi32>
    %c4_i32 = arith.constant 4 : i32
    %8 = tpu.dynamic_rotate %6 by %c4_i32 dim 1 : vector<8x64xf32>, i32 -> vector<8x64xf32>
    %c4_i32_9 = arith.constant 4 : i32
    %9 = vector.broadcast %c4_i32_9 : i32 to vector<8x64xi32>
    %10 = arith.cmpi sge, %7, %9 : vector<8x64xi32>
    %c68_i32 = arith.constant 68 : i32
    %11 = vector.broadcast %c68_i32 : i32 to vector<8x64xi32>
    %12 = arith.cmpi slt, %7, %11 : vector<8x64xi32>
    %13 = arith.andi %10, %12 : vector<8x64xi1>
    %cst_10 = arith.constant 0.000000e+00 : f32
    %14 = vector.broadcast %cst_10 : f32 to vector<8x64xf32>
    %15 = arith.select %13, %8, %14 : vector<8x64xi1>, vector<8x64xf32>
    %c3_i32 = arith.constant 3 : i32
    %16 = tpu.dynamic_rotate %6 by %c3_i32 dim 1 : vector<8x64xf32>, i32 -> vector<8x64xf32>
    %c3_i32_11 = arith.constant 3 : i32
    %17 = vector.broadcast %c3_i32_11 : i32 to vector<8x64xi32>
    %18 = arith.cmpi sge, %7, %17 : vector<8x64xi32>
    %c67_i32 = arith.constant 67 : i32
    %19 = vector.broadcast %c67_i32 : i32 to vector<8x64xi32>
    %20 = arith.cmpi slt, %7, %19 : vector<8x64xi32>
    %21 = arith.andi %18, %20 : vector<8x64xi1>
    %cst_12 = arith.constant 0.000000e+00 : f32
    %22 = vector.broadcast %cst_12 : f32 to vector<8x64xf32>
    %23 = arith.select %21, %16, %22 : vector<8x64xi1>, vector<8x64xf32>
    %c2_i32 = arith.constant 2 : i32
    %24 = tpu.dynamic_rotate %6 by %c2_i32 dim 1 : vector<8x64xf32>, i32 -> vector<8x64xf32>
    %c2_i32_13 = arith.constant 2 : i32
    %25 = vector.broadcast %c2_i32_13 : i32 to vector<8x64xi32>
    %26 = arith.cmpi sge, %7, %25 : vector<8x64xi32>
    %c66_i32 = arith.constant 66 : i32
    %27 = vector.broadcast %c66_i32 : i32 to vector<8x64xi32>
    %28 = arith.cmpi slt, %7, %27 : vector<8x64xi32>
    %29 = arith.andi %26, %28 : vector<8x64xi1>
    %cst_14 = arith.constant 0.000000e+00 : f32
    %30 = vector.broadcast %cst_14 : f32 to vector<8x64xf32>
    %31 = arith.select %29, %24, %30 : vector<8x64xi1>, vector<8x64xf32>
    %c1_i32 = arith.constant 1 : i32
    %32 = tpu.dynamic_rotate %6 by %c1_i32 dim 1 : vector<8x64xf32>, i32 -> vector<8x64xf32>
    %c1_i32_15 = arith.constant 1 : i32
    %33 = vector.broadcast %c1_i32_15 : i32 to vector<8x64xi32>
    %34 = arith.cmpi sge, %7, %33 : vector<8x64xi32>
    %c65_i32 = arith.constant 65 : i32
    %35 = vector.broadcast %c65_i32 : i32 to vector<8x64xi32>
    %36 = arith.cmpi slt, %7, %35 : vector<8x64xi32>
    %37 = arith.andi %34, %36 : vector<8x64xi1>
    %cst_16 = arith.constant 0.000000e+00 : f32
    %38 = vector.broadcast %cst_16 : f32 to vector<8x64xf32>
    %39 = arith.select %37, %32, %38 : vector<8x64xi1>, vector<8x64xf32>
    %c0_i32 = arith.constant 0 : i32
    %40 = vector.broadcast %c0_i32 : i32 to vector<8x64xi32>
    %41 = arith.cmpi sge, %7, %40 : vector<8x64xi32>
    %c64_i32 = arith.constant 64 : i32
    %42 = vector.broadcast %c64_i32 : i32 to vector<8x64xi32>
    %43 = arith.cmpi slt, %7, %42 : vector<8x64xi32>
    %44 = arith.andi %41, %43 : vector<8x64xi1>
    %cst_17 = arith.constant 0.000000e+00 : f32
    %45 = vector.broadcast %cst_17 : f32 to vector<8x64xf32>
    %46 = arith.select %44, %6, %45 : vector<8x64xi1>, vector<8x64xf32>
    %c63_i32 = arith.constant 63 : i32
    %47 = tpu.dynamic_rotate %6 by %c63_i32 dim 1 : vector<8x64xf32>, i32 -> vector<8x64xf32>
    %c-1_i32 = arith.constant -1 : i32
    %48 = vector.broadcast %c-1_i32 : i32 to vector<8x64xi32>
    %49 = arith.cmpi sge, %7, %48 : vector<8x64xi32>
    %c63_i32_18 = arith.constant 63 : i32
    %50 = vector.broadcast %c63_i32_18 : i32 to vector<8x64xi32>
    %51 = arith.cmpi slt, %7, %50 : vector<8x64xi32>
    %52 = arith.andi %49, %51 : vector<8x64xi1>
    %cst_19 = arith.constant 0.000000e+00 : f32
    %53 = vector.broadcast %cst_19 : f32 to vector<8x64xf32>
    %54 = arith.select %52, %47, %53 : vector<8x64xi1>, vector<8x64xf32>
    %c62_i32 = arith.constant 62 : i32
    %55 = tpu.dynamic_rotate %6 by %c62_i32 dim 1 : vector<8x64xf32>, i32 -> vector<8x64xf32>
    %c-2_i32 = arith.constant -2 : i32
    %56 = vector.broadcast %c-2_i32 : i32 to vector<8x64xi32>
    %57 = arith.cmpi sge, %7, %56 : vector<8x64xi32>
    %c62_i32_20 = arith.constant 62 : i32
    %58 = vector.broadcast %c62_i32_20 : i32 to vector<8x64xi32>
    %59 = arith.cmpi slt, %7, %58 : vector<8x64xi32>
    %60 = arith.andi %57, %59 : vector<8x64xi1>
    %cst_21 = arith.constant 0.000000e+00 : f32
    %61 = vector.broadcast %cst_21 : f32 to vector<8x64xf32>
    %62 = arith.select %60, %55, %61 : vector<8x64xi1>, vector<8x64xf32>
    %c61_i32 = arith.constant 61 : i32
    %63 = tpu.dynamic_rotate %6 by %c61_i32 dim 1 : vector<8x64xf32>, i32 -> vector<8x64xf32>
    %c-3_i32 = arith.constant -3 : i32
    %64 = vector.broadcast %c-3_i32 : i32 to vector<8x64xi32>
    %65 = arith.cmpi sge, %7, %64 : vector<8x64xi32>
    %c61_i32_22 = arith.constant 61 : i32
    %66 = vector.broadcast %c61_i32_22 : i32 to vector<8x64xi32>
    %67 = arith.cmpi slt, %7, %66 : vector<8x64xi32>
    %68 = arith.andi %65, %67 : vector<8x64xi1>
    %cst_23 = arith.constant 0.000000e+00 : f32
    %69 = vector.broadcast %cst_23 : f32 to vector<8x64xf32>
    %70 = arith.select %68, %63, %69 : vector<8x64xi1>, vector<8x64xf32>
    %c60_i32 = arith.constant 60 : i32
    %71 = tpu.dynamic_rotate %6 by %c60_i32 dim 1 : vector<8x64xf32>, i32 -> vector<8x64xf32>
    %c-4_i32 = arith.constant -4 : i32
    %72 = vector.broadcast %c-4_i32 : i32 to vector<8x64xi32>
    %73 = arith.cmpi sge, %7, %72 : vector<8x64xi32>
    %c60_i32_24 = arith.constant 60 : i32
    %74 = vector.broadcast %c60_i32_24 : i32 to vector<8x64xi32>
    %75 = arith.cmpi slt, %7, %74 : vector<8x64xi32>
    %76 = arith.andi %73, %75 : vector<8x64xi1>
    %cst_25 = arith.constant 0.000000e+00 : f32
    %77 = vector.broadcast %cst_25 : f32 to vector<8x64xf32>
    %78 = arith.select %76, %71, %77 : vector<8x64xi1>, vector<8x64xf32>
    %79 = tpu.concatenate %15, %23, %31, %39, %46, %54, %62, %70, %78 in 0 : vector<8x64xf32>, vector<8x64xf32>, vector<8x64xf32>, vector<8x64xf32>, vector<8x64xf32>, vector<8x64xf32>, vector<8x64xf32>, vector<8x64xf32>, vector<8x64xf32> -> vector<72x64xf32>
    %cst_26 = arith.constant dense<0.000000e+00> : vector<8x64xf32>
    %80 = tpu.matmul %4, %79, %cst_26 {dimension_numbers = #tpu.dot_dimension_numbers<[1], [0], [0], [1], [0, 0, 1, 1], [], []>} : vector<8x72xf32>, vector<72x64xf32>, vector<8x64xf32> -> vector<8x64xf32>
    %c0_27 = arith.constant 0 : index
    %c0_28 = arith.constant 0 : index
    %81 = vector.load %arg5[%c0_27, %c0_28] : memref<8x144xf32, #tpu.memory_space<vmem>>, vector<8x144xf32>
    %82 = tpu.iota {dimensions = array<i32: 1>} : vector<16x64xi32>
    %c4_i32_29 = arith.constant 4 : i32
    %83 = tpu.dynamic_rotate %3 by %c4_i32_29 dim 1 : vector<16x64xf32>, i32 -> vector<16x64xf32>
    %c4_i32_30 = arith.constant 4 : i32
    %84 = vector.broadcast %c4_i32_30 : i32 to vector<16x64xi32>
    %85 = arith.cmpi sge, %82, %84 : vector<16x64xi32>
    %c68_i32_31 = arith.constant 68 : i32
    %86 = vector.broadcast %c68_i32_31 : i32 to vector<16x64xi32>
    %87 = arith.cmpi slt, %82, %86 : vector<16x64xi32>
    %88 = arith.andi %85, %87 : vector<16x64xi1>
    %cst_32 = arith.constant 0.000000e+00 : f32
    %89 = vector.broadcast %cst_32 : f32 to vector<16x64xf32>
    %90 = arith.select %88, %83, %89 : vector<16x64xi1>, vector<16x64xf32>
    %c3_i32_33 = arith.constant 3 : i32
    %91 = tpu.dynamic_rotate %3 by %c3_i32_33 dim 1 : vector<16x64xf32>, i32 -> vector<16x64xf32>
    %c3_i32_34 = arith.constant 3 : i32
    %92 = vector.broadcast %c3_i32_34 : i32 to vector<16x64xi32>
    %93 = arith.cmpi sge, %82, %92 : vector<16x64xi32>
    %c67_i32_35 = arith.constant 67 : i32
    %94 = vector.broadcast %c67_i32_35 : i32 to vector<16x64xi32>
    %95 = arith.cmpi slt, %82, %94 : vector<16x64xi32>
    %96 = arith.andi %93, %95 : vector<16x64xi1>
    %cst_36 = arith.constant 0.000000e+00 : f32
    %97 = vector.broadcast %cst_36 : f32 to vector<16x64xf32>
    %98 = arith.select %96, %91, %97 : vector<16x64xi1>, vector<16x64xf32>
    %c2_i32_37 = arith.constant 2 : i32
    %99 = tpu.dynamic_rotate %3 by %c2_i32_37 dim 1 : vector<16x64xf32>, i32 -> vector<16x64xf32>
    %c2_i32_38 = arith.constant 2 : i32
    %100 = vector.broadcast %c2_i32_38 : i32 to vector<16x64xi32>
    %101 = arith.cmpi sge, %82, %100 : vector<16x64xi32>
    %c66_i32_39 = arith.constant 66 : i32
    %102 = vector.broadcast %c66_i32_39 : i32 to vector<16x64xi32>
    %103 = arith.cmpi slt, %82, %102 : vector<16x64xi32>
    %104 = arith.andi %101, %103 : vector<16x64xi1>
    %cst_40 = arith.constant 0.000000e+00 : f32
    %105 = vector.broadcast %cst_40 : f32 to vector<16x64xf32>
    %106 = arith.select %104, %99, %105 : vector<16x64xi1>, vector<16x64xf32>
    %c1_i32_41 = arith.constant 1 : i32
    %107 = tpu.dynamic_rotate %3 by %c1_i32_41 dim 1 : vector<16x64xf32>, i32 -> vector<16x64xf32>
    %c1_i32_42 = arith.constant 1 : i32
    %108 = vector.broadcast %c1_i32_42 : i32 to vector<16x64xi32>
    %109 = arith.cmpi sge, %82, %108 : vector<16x64xi32>
    %c65_i32_43 = arith.constant 65 : i32
    %110 = vector.broadcast %c65_i32_43 : i32 to vector<16x64xi32>
    %111 = arith.cmpi slt, %82, %110 : vector<16x64xi32>
    %112 = arith.andi %109, %111 : vector<16x64xi1>
    %cst_44 = arith.constant 0.000000e+00 : f32
    %113 = vector.broadcast %cst_44 : f32 to vector<16x64xf32>
    %114 = arith.select %112, %107, %113 : vector<16x64xi1>, vector<16x64xf32>
    %c0_i32_45 = arith.constant 0 : i32
    %115 = vector.broadcast %c0_i32_45 : i32 to vector<16x64xi32>
    %116 = arith.cmpi sge, %82, %115 : vector<16x64xi32>
    %c64_i32_46 = arith.constant 64 : i32
    %117 = vector.broadcast %c64_i32_46 : i32 to vector<16x64xi32>
    %118 = arith.cmpi slt, %82, %117 : vector<16x64xi32>
    %119 = arith.andi %116, %118 : vector<16x64xi1>
    %cst_47 = arith.constant 0.000000e+00 : f32
    %120 = vector.broadcast %cst_47 : f32 to vector<16x64xf32>
    %121 = arith.select %119, %3, %120 : vector<16x64xi1>, vector<16x64xf32>
    %c63_i32_48 = arith.constant 63 : i32
    %122 = tpu.dynamic_rotate %3 by %c63_i32_48 dim 1 : vector<16x64xf32>, i32 -> vector<16x64xf32>
    %c-1_i32_49 = arith.constant -1 : i32
    %123 = vector.broadcast %c-1_i32_49 : i32 to vector<16x64xi32>
    %124 = arith.cmpi sge, %82, %123 : vector<16x64xi32>
    %c63_i32_50 = arith.constant 63 : i32
    %125 = vector.broadcast %c63_i32_50 : i32 to vector<16x64xi32>
    %126 = arith.cmpi slt, %82, %125 : vector<16x64xi32>
    %127 = arith.andi %124, %126 : vector<16x64xi1>
    %cst_51 = arith.constant 0.000000e+00 : f32
    %128 = vector.broadcast %cst_51 : f32 to vector<16x64xf32>
    %129 = arith.select %127, %122, %128 : vector<16x64xi1>, vector<16x64xf32>
    %c62_i32_52 = arith.constant 62 : i32
    %130 = tpu.dynamic_rotate %3 by %c62_i32_52 dim 1 : vector<16x64xf32>, i32 -> vector<16x64xf32>
    %c-2_i32_53 = arith.constant -2 : i32
    %131 = vector.broadcast %c-2_i32_53 : i32 to vector<16x64xi32>
    %132 = arith.cmpi sge, %82, %131 : vector<16x64xi32>
    %c62_i32_54 = arith.constant 62 : i32
    %133 = vector.broadcast %c62_i32_54 : i32 to vector<16x64xi32>
    %134 = arith.cmpi slt, %82, %133 : vector<16x64xi32>
    %135 = arith.andi %132, %134 : vector<16x64xi1>
    %cst_55 = arith.constant 0.000000e+00 : f32
    %136 = vector.broadcast %cst_55 : f32 to vector<16x64xf32>
    %137 = arith.select %135, %130, %136 : vector<16x64xi1>, vector<16x64xf32>
    %c61_i32_56 = arith.constant 61 : i32
    %138 = tpu.dynamic_rotate %3 by %c61_i32_56 dim 1 : vector<16x64xf32>, i32 -> vector<16x64xf32>
    %c-3_i32_57 = arith.constant -3 : i32
    %139 = vector.broadcast %c-3_i32_57 : i32 to vector<16x64xi32>
    %140 = arith.cmpi sge, %82, %139 : vector<16x64xi32>
    %c61_i32_58 = arith.constant 61 : i32
    %141 = vector.broadcast %c61_i32_58 : i32 to vector<16x64xi32>
    %142 = arith.cmpi slt, %82, %141 : vector<16x64xi32>
    %143 = arith.andi %140, %142 : vector<16x64xi1>
    %cst_59 = arith.constant 0.000000e+00 : f32
    %144 = vector.broadcast %cst_59 : f32 to vector<16x64xf32>
    %145 = arith.select %143, %138, %144 : vector<16x64xi1>, vector<16x64xf32>
    %c60_i32_60 = arith.constant 60 : i32
    %146 = tpu.dynamic_rotate %3 by %c60_i32_60 dim 1 : vector<16x64xf32>, i32 -> vector<16x64xf32>
    %c-4_i32_61 = arith.constant -4 : i32
    %147 = vector.broadcast %c-4_i32_61 : i32 to vector<16x64xi32>
    %148 = arith.cmpi sge, %82, %147 : vector<16x64xi32>
    %c60_i32_62 = arith.constant 60 : i32
    %149 = vector.broadcast %c60_i32_62 : i32 to vector<16x64xi32>
    %150 = arith.cmpi slt, %82, %149 : vector<16x64xi32>
    %151 = arith.andi %148, %150 : vector<16x64xi1>
    %cst_63 = arith.constant 0.000000e+00 : f32
    %152 = vector.broadcast %cst_63 : f32 to vector<16x64xf32>
    %153 = arith.select %151, %146, %152 : vector<16x64xi1>, vector<16x64xf32>
    %154 = tpu.concatenate %90, %98, %106, %114, %121, %129, %137, %145, %153 in 0 : vector<16x64xf32>, vector<16x64xf32>, vector<16x64xf32>, vector<16x64xf32>, vector<16x64xf32>, vector<16x64xf32>, vector<16x64xf32>, vector<16x64xf32>, vector<16x64xf32> -> vector<144x64xf32>
    %cst_64 = arith.constant dense<0.000000e+00> : vector<8x64xf32>
    %155 = tpu.matmul %81, %154, %cst_64 {dimension_numbers = #tpu.dot_dimension_numbers<[1], [0], [0], [1], [0, 0, 1, 1], [], []>} : vector<8x144xf32>, vector<144x64xf32>, vector<8x64xf32> -> vector<8x64xf32>
    %156 = arith.addf %80, %155 : vector<8x64xf32>
    %c0_65 = arith.constant 0 : index
    %c0_66 = arith.constant 0 : index
    %157 = vector.load %arg6[%c0_65, %c0_66] : memref<8x1xf32, #tpu.memory_space<vmem>>, vector<8x1xf32>
    %158 = vector.broadcast %157 : vector<8x1xf32> to vector<8x64xf32>
    %159 = arith.mulf %156, %158 : vector<8x64xf32>
    %c0_67 = arith.constant 0 : index
    %c0_68 = arith.constant 0 : index
    %160 = vector.load %arg7[%c0_67, %c0_68] : memref<8x1xf32, #tpu.memory_space<vmem>>, vector<8x1xf32>
    %161 = vector.broadcast %160 : vector<8x1xf32> to vector<8x64xf32>
    %162 = arith.addf %159, %161 : vector<8x64xf32>
    %cst_69 = arith.constant 0.000000e+00 : f32
    %163 = vector.broadcast %cst_69 : f32 to vector<8x64xf32>
    %164 = arith.maximumf %162, %163 : vector<8x64xf32>
    %c0_70 = arith.constant 0 : index
    %c0_71 = arith.constant 0 : index
    %165 = vector.load %arg8[%c0_70, %c0_71] : memref<8x72xf32, #tpu.memory_space<vmem>>, vector<8x72xf32>
    %c0_72 = arith.constant 0 : index
    %c0_73 = arith.constant 0 : index
    %166 = vector.load %arg9[%c0_72, %c0_73] : memref<8x1xf32, #tpu.memory_space<vmem>>, vector<8x1xf32>
    %c0_74 = arith.constant 0 : index
    %c0_75 = arith.constant 0 : index
    %167 = vector.load %arg10[%c0_74, %c0_75] : memref<8x1xf32, #tpu.memory_space<vmem>>, vector<8x1xf32>
    %168 = tpu.iota {dimensions = array<i32: 1>} : vector<8x64xi32>
    %c4_i32_76 = arith.constant 4 : i32
    %169 = tpu.dynamic_rotate %164 by %c4_i32_76 dim 1 : vector<8x64xf32>, i32 -> vector<8x64xf32>
    %c4_i32_77 = arith.constant 4 : i32
    %170 = vector.broadcast %c4_i32_77 : i32 to vector<8x64xi32>
    %171 = arith.cmpi sge, %168, %170 : vector<8x64xi32>
    %c68_i32_78 = arith.constant 68 : i32
    %172 = vector.broadcast %c68_i32_78 : i32 to vector<8x64xi32>
    %173 = arith.cmpi slt, %168, %172 : vector<8x64xi32>
    %174 = arith.andi %171, %173 : vector<8x64xi1>
    %cst_79 = arith.constant 0.000000e+00 : f32
    %175 = vector.broadcast %cst_79 : f32 to vector<8x64xf32>
    %176 = arith.select %174, %169, %175 : vector<8x64xi1>, vector<8x64xf32>
    %c3_i32_80 = arith.constant 3 : i32
    %177 = tpu.dynamic_rotate %164 by %c3_i32_80 dim 1 : vector<8x64xf32>, i32 -> vector<8x64xf32>
    %c3_i32_81 = arith.constant 3 : i32
    %178 = vector.broadcast %c3_i32_81 : i32 to vector<8x64xi32>
    %179 = arith.cmpi sge, %168, %178 : vector<8x64xi32>
    %c67_i32_82 = arith.constant 67 : i32
    %180 = vector.broadcast %c67_i32_82 : i32 to vector<8x64xi32>
    %181 = arith.cmpi slt, %168, %180 : vector<8x64xi32>
    %182 = arith.andi %179, %181 : vector<8x64xi1>
    %cst_83 = arith.constant 0.000000e+00 : f32
    %183 = vector.broadcast %cst_83 : f32 to vector<8x64xf32>
    %184 = arith.select %182, %177, %183 : vector<8x64xi1>, vector<8x64xf32>
    %c2_i32_84 = arith.constant 2 : i32
    %185 = tpu.dynamic_rotate %164 by %c2_i32_84 dim 1 : vector<8x64xf32>, i32 -> vector<8x64xf32>
    %c2_i32_85 = arith.constant 2 : i32
    %186 = vector.broadcast %c2_i32_85 : i32 to vector<8x64xi32>
    %187 = arith.cmpi sge, %168, %186 : vector<8x64xi32>
    %c66_i32_86 = arith.constant 66 : i32
    %188 = vector.broadcast %c66_i32_86 : i32 to vector<8x64xi32>
    %189 = arith.cmpi slt, %168, %188 : vector<8x64xi32>
    %190 = arith.andi %187, %189 : vector<8x64xi1>
    %cst_87 = arith.constant 0.000000e+00 : f32
    %191 = vector.broadcast %cst_87 : f32 to vector<8x64xf32>
    %192 = arith.select %190, %185, %191 : vector<8x64xi1>, vector<8x64xf32>
    %c1_i32_88 = arith.constant 1 : i32
    %193 = tpu.dynamic_rotate %164 by %c1_i32_88 dim 1 : vector<8x64xf32>, i32 -> vector<8x64xf32>
    %c1_i32_89 = arith.constant 1 : i32
    %194 = vector.broadcast %c1_i32_89 : i32 to vector<8x64xi32>
    %195 = arith.cmpi sge, %168, %194 : vector<8x64xi32>
    %c65_i32_90 = arith.constant 65 : i32
    %196 = vector.broadcast %c65_i32_90 : i32 to vector<8x64xi32>
    %197 = arith.cmpi slt, %168, %196 : vector<8x64xi32>
    %198 = arith.andi %195, %197 : vector<8x64xi1>
    %cst_91 = arith.constant 0.000000e+00 : f32
    %199 = vector.broadcast %cst_91 : f32 to vector<8x64xf32>
    %200 = arith.select %198, %193, %199 : vector<8x64xi1>, vector<8x64xf32>
    %c0_i32_92 = arith.constant 0 : i32
    %201 = vector.broadcast %c0_i32_92 : i32 to vector<8x64xi32>
    %202 = arith.cmpi sge, %168, %201 : vector<8x64xi32>
    %c64_i32_93 = arith.constant 64 : i32
    %203 = vector.broadcast %c64_i32_93 : i32 to vector<8x64xi32>
    %204 = arith.cmpi slt, %168, %203 : vector<8x64xi32>
    %205 = arith.andi %202, %204 : vector<8x64xi1>
    %cst_94 = arith.constant 0.000000e+00 : f32
    %206 = vector.broadcast %cst_94 : f32 to vector<8x64xf32>
    %207 = arith.select %205, %164, %206 : vector<8x64xi1>, vector<8x64xf32>
    %c63_i32_95 = arith.constant 63 : i32
    %208 = tpu.dynamic_rotate %164 by %c63_i32_95 dim 1 : vector<8x64xf32>, i32 -> vector<8x64xf32>
    %c-1_i32_96 = arith.constant -1 : i32
    %209 = vector.broadcast %c-1_i32_96 : i32 to vector<8x64xi32>
    %210 = arith.cmpi sge, %168, %209 : vector<8x64xi32>
    %c63_i32_97 = arith.constant 63 : i32
    %211 = vector.broadcast %c63_i32_97 : i32 to vector<8x64xi32>
    %212 = arith.cmpi slt, %168, %211 : vector<8x64xi32>
    %213 = arith.andi %210, %212 : vector<8x64xi1>
    %cst_98 = arith.constant 0.000000e+00 : f32
    %214 = vector.broadcast %cst_98 : f32 to vector<8x64xf32>
    %215 = arith.select %213, %208, %214 : vector<8x64xi1>, vector<8x64xf32>
    %c62_i32_99 = arith.constant 62 : i32
    %216 = tpu.dynamic_rotate %164 by %c62_i32_99 dim 1 : vector<8x64xf32>, i32 -> vector<8x64xf32>
    %c-2_i32_100 = arith.constant -2 : i32
    %217 = vector.broadcast %c-2_i32_100 : i32 to vector<8x64xi32>
    %218 = arith.cmpi sge, %168, %217 : vector<8x64xi32>
    %c62_i32_101 = arith.constant 62 : i32
    %219 = vector.broadcast %c62_i32_101 : i32 to vector<8x64xi32>
    %220 = arith.cmpi slt, %168, %219 : vector<8x64xi32>
    %221 = arith.andi %218, %220 : vector<8x64xi1>
    %cst_102 = arith.constant 0.000000e+00 : f32
    %222 = vector.broadcast %cst_102 : f32 to vector<8x64xf32>
    %223 = arith.select %221, %216, %222 : vector<8x64xi1>, vector<8x64xf32>
    %c61_i32_103 = arith.constant 61 : i32
    %224 = tpu.dynamic_rotate %164 by %c61_i32_103 dim 1 : vector<8x64xf32>, i32 -> vector<8x64xf32>
    %c-3_i32_104 = arith.constant -3 : i32
    %225 = vector.broadcast %c-3_i32_104 : i32 to vector<8x64xi32>
    %226 = arith.cmpi sge, %168, %225 : vector<8x64xi32>
    %c61_i32_105 = arith.constant 61 : i32
    %227 = vector.broadcast %c61_i32_105 : i32 to vector<8x64xi32>
    %228 = arith.cmpi slt, %168, %227 : vector<8x64xi32>
    %229 = arith.andi %226, %228 : vector<8x64xi1>
    %cst_106 = arith.constant 0.000000e+00 : f32
    %230 = vector.broadcast %cst_106 : f32 to vector<8x64xf32>
    %231 = arith.select %229, %224, %230 : vector<8x64xi1>, vector<8x64xf32>
    %c60_i32_107 = arith.constant 60 : i32
    %232 = tpu.dynamic_rotate %164 by %c60_i32_107 dim 1 : vector<8x64xf32>, i32 -> vector<8x64xf32>
    %c-4_i32_108 = arith.constant -4 : i32
    %233 = vector.broadcast %c-4_i32_108 : i32 to vector<8x64xi32>
    %234 = arith.cmpi sge, %168, %233 : vector<8x64xi32>
    %c60_i32_109 = arith.constant 60 : i32
    %235 = vector.broadcast %c60_i32_109 : i32 to vector<8x64xi32>
    %236 = arith.cmpi slt, %168, %235 : vector<8x64xi32>
    %237 = arith.andi %234, %236 : vector<8x64xi1>
    %cst_110 = arith.constant 0.000000e+00 : f32
    %238 = vector.broadcast %cst_110 : f32 to vector<8x64xf32>
    %239 = arith.select %237, %232, %238 : vector<8x64xi1>, vector<8x64xf32>
    %240 = tpu.concatenate %176, %184, %192, %200, %207, %215, %223, %231, %239 in 0 : vector<8x64xf32>, vector<8x64xf32>, vector<8x64xf32>, vector<8x64xf32>, vector<8x64xf32>, vector<8x64xf32>, vector<8x64xf32>, vector<8x64xf32>, vector<8x64xf32> -> vector<72x64xf32>
    %cst_111 = arith.constant dense<0.000000e+00> : vector<8x64xf32>
    %241 = tpu.matmul %165, %240, %cst_111 {dimension_numbers = #tpu.dot_dimension_numbers<[1], [0], [0], [1], [0, 0, 1, 1], [], []>} : vector<8x72xf32>, vector<72x64xf32>, vector<8x64xf32> -> vector<8x64xf32>
    %242 = vector.broadcast %166 : vector<8x1xf32> to vector<8x64xf32>
    %243 = arith.mulf %241, %242 : vector<8x64xf32>
    %244 = vector.broadcast %167 : vector<8x1xf32> to vector<8x64xf32>
    %245 = arith.addf %243, %244 : vector<8x64xf32>
    %cst_112 = arith.constant 0.000000e+00 : f32
    %246 = vector.broadcast %cst_112 : f32 to vector<8x64xf32>
    %247 = arith.maximumf %245, %246 : vector<8x64xf32>
    %c0_113 = arith.constant 0 : index
    %c0_114 = arith.constant 0 : index
    %248 = vector.load %arg11[%c0_113, %c0_114] : memref<8x72xf32, #tpu.memory_space<vmem>>, vector<8x72xf32>
    %c0_115 = arith.constant 0 : index
    %c0_116 = arith.constant 0 : index
    %249 = vector.load %arg12[%c0_115, %c0_116] : memref<8x1xf32, #tpu.memory_space<vmem>>, vector<8x1xf32>
    %c0_117 = arith.constant 0 : index
    %c0_118 = arith.constant 0 : index
    %250 = vector.load %arg13[%c0_117, %c0_118] : memref<8x1xf32, #tpu.memory_space<vmem>>, vector<8x1xf32>
    %251 = tpu.iota {dimensions = array<i32: 1>} : vector<8x64xi32>
    %c4_i32_119 = arith.constant 4 : i32
    %252 = tpu.dynamic_rotate %247 by %c4_i32_119 dim 1 : vector<8x64xf32>, i32 -> vector<8x64xf32>
    %c4_i32_120 = arith.constant 4 : i32
    %253 = vector.broadcast %c4_i32_120 : i32 to vector<8x64xi32>
    %254 = arith.cmpi sge, %251, %253 : vector<8x64xi32>
    %c68_i32_121 = arith.constant 68 : i32
    %255 = vector.broadcast %c68_i32_121 : i32 to vector<8x64xi32>
    %256 = arith.cmpi slt, %251, %255 : vector<8x64xi32>
    %257 = arith.andi %254, %256 : vector<8x64xi1>
    %cst_122 = arith.constant 0.000000e+00 : f32
    %258 = vector.broadcast %cst_122 : f32 to vector<8x64xf32>
    %259 = arith.select %257, %252, %258 : vector<8x64xi1>, vector<8x64xf32>
    %c3_i32_123 = arith.constant 3 : i32
    %260 = tpu.dynamic_rotate %247 by %c3_i32_123 dim 1 : vector<8x64xf32>, i32 -> vector<8x64xf32>
    %c3_i32_124 = arith.constant 3 : i32
    %261 = vector.broadcast %c3_i32_124 : i32 to vector<8x64xi32>
    %262 = arith.cmpi sge, %251, %261 : vector<8x64xi32>
    %c67_i32_125 = arith.constant 67 : i32
    %263 = vector.broadcast %c67_i32_125 : i32 to vector<8x64xi32>
    %264 = arith.cmpi slt, %251, %263 : vector<8x64xi32>
    %265 = arith.andi %262, %264 : vector<8x64xi1>
    %cst_126 = arith.constant 0.000000e+00 : f32
    %266 = vector.broadcast %cst_126 : f32 to vector<8x64xf32>
    %267 = arith.select %265, %260, %266 : vector<8x64xi1>, vector<8x64xf32>
    %c2_i32_127 = arith.constant 2 : i32
    %268 = tpu.dynamic_rotate %247 by %c2_i32_127 dim 1 : vector<8x64xf32>, i32 -> vector<8x64xf32>
    %c2_i32_128 = arith.constant 2 : i32
    %269 = vector.broadcast %c2_i32_128 : i32 to vector<8x64xi32>
    %270 = arith.cmpi sge, %251, %269 : vector<8x64xi32>
    %c66_i32_129 = arith.constant 66 : i32
    %271 = vector.broadcast %c66_i32_129 : i32 to vector<8x64xi32>
    %272 = arith.cmpi slt, %251, %271 : vector<8x64xi32>
    %273 = arith.andi %270, %272 : vector<8x64xi1>
    %cst_130 = arith.constant 0.000000e+00 : f32
    %274 = vector.broadcast %cst_130 : f32 to vector<8x64xf32>
    %275 = arith.select %273, %268, %274 : vector<8x64xi1>, vector<8x64xf32>
    %c1_i32_131 = arith.constant 1 : i32
    %276 = tpu.dynamic_rotate %247 by %c1_i32_131 dim 1 : vector<8x64xf32>, i32 -> vector<8x64xf32>
    %c1_i32_132 = arith.constant 1 : i32
    %277 = vector.broadcast %c1_i32_132 : i32 to vector<8x64xi32>
    %278 = arith.cmpi sge, %251, %277 : vector<8x64xi32>
    %c65_i32_133 = arith.constant 65 : i32
    %279 = vector.broadcast %c65_i32_133 : i32 to vector<8x64xi32>
    %280 = arith.cmpi slt, %251, %279 : vector<8x64xi32>
    %281 = arith.andi %278, %280 : vector<8x64xi1>
    %cst_134 = arith.constant 0.000000e+00 : f32
    %282 = vector.broadcast %cst_134 : f32 to vector<8x64xf32>
    %283 = arith.select %281, %276, %282 : vector<8x64xi1>, vector<8x64xf32>
    %c0_i32_135 = arith.constant 0 : i32
    %284 = vector.broadcast %c0_i32_135 : i32 to vector<8x64xi32>
    %285 = arith.cmpi sge, %251, %284 : vector<8x64xi32>
    %c64_i32_136 = arith.constant 64 : i32
    %286 = vector.broadcast %c64_i32_136 : i32 to vector<8x64xi32>
    %287 = arith.cmpi slt, %251, %286 : vector<8x64xi32>
    %288 = arith.andi %285, %287 : vector<8x64xi1>
    %cst_137 = arith.constant 0.000000e+00 : f32
    %289 = vector.broadcast %cst_137 : f32 to vector<8x64xf32>
    %290 = arith.select %288, %247, %289 : vector<8x64xi1>, vector<8x64xf32>
    %c63_i32_138 = arith.constant 63 : i32
    %291 = tpu.dynamic_rotate %247 by %c63_i32_138 dim 1 : vector<8x64xf32>, i32 -> vector<8x64xf32>
    %c-1_i32_139 = arith.constant -1 : i32
    %292 = vector.broadcast %c-1_i32_139 : i32 to vector<8x64xi32>
    %293 = arith.cmpi sge, %251, %292 : vector<8x64xi32>
    %c63_i32_140 = arith.constant 63 : i32
    %294 = vector.broadcast %c63_i32_140 : i32 to vector<8x64xi32>
    %295 = arith.cmpi slt, %251, %294 : vector<8x64xi32>
    %296 = arith.andi %293, %295 : vector<8x64xi1>
    %cst_141 = arith.constant 0.000000e+00 : f32
    %297 = vector.broadcast %cst_141 : f32 to vector<8x64xf32>
    %298 = arith.select %296, %291, %297 : vector<8x64xi1>, vector<8x64xf32>
    %c62_i32_142 = arith.constant 62 : i32
    %299 = tpu.dynamic_rotate %247 by %c62_i32_142 dim 1 : vector<8x64xf32>, i32 -> vector<8x64xf32>
    %c-2_i32_143 = arith.constant -2 : i32
    %300 = vector.broadcast %c-2_i32_143 : i32 to vector<8x64xi32>
    %301 = arith.cmpi sge, %251, %300 : vector<8x64xi32>
    %c62_i32_144 = arith.constant 62 : i32
    %302 = vector.broadcast %c62_i32_144 : i32 to vector<8x64xi32>
    %303 = arith.cmpi slt, %251, %302 : vector<8x64xi32>
    %304 = arith.andi %301, %303 : vector<8x64xi1>
    %cst_145 = arith.constant 0.000000e+00 : f32
    %305 = vector.broadcast %cst_145 : f32 to vector<8x64xf32>
    %306 = arith.select %304, %299, %305 : vector<8x64xi1>, vector<8x64xf32>
    %c61_i32_146 = arith.constant 61 : i32
    %307 = tpu.dynamic_rotate %247 by %c61_i32_146 dim 1 : vector<8x64xf32>, i32 -> vector<8x64xf32>
    %c-3_i32_147 = arith.constant -3 : i32
    %308 = vector.broadcast %c-3_i32_147 : i32 to vector<8x64xi32>
    %309 = arith.cmpi sge, %251, %308 : vector<8x64xi32>
    %c61_i32_148 = arith.constant 61 : i32
    %310 = vector.broadcast %c61_i32_148 : i32 to vector<8x64xi32>
    %311 = arith.cmpi slt, %251, %310 : vector<8x64xi32>
    %312 = arith.andi %309, %311 : vector<8x64xi1>
    %cst_149 = arith.constant 0.000000e+00 : f32
    %313 = vector.broadcast %cst_149 : f32 to vector<8x64xf32>
    %314 = arith.select %312, %307, %313 : vector<8x64xi1>, vector<8x64xf32>
    %c60_i32_150 = arith.constant 60 : i32
    %315 = tpu.dynamic_rotate %247 by %c60_i32_150 dim 1 : vector<8x64xf32>, i32 -> vector<8x64xf32>
    %c-4_i32_151 = arith.constant -4 : i32
    %316 = vector.broadcast %c-4_i32_151 : i32 to vector<8x64xi32>
    %317 = arith.cmpi sge, %251, %316 : vector<8x64xi32>
    %c60_i32_152 = arith.constant 60 : i32
    %318 = vector.broadcast %c60_i32_152 : i32 to vector<8x64xi32>
    %319 = arith.cmpi slt, %251, %318 : vector<8x64xi32>
    %320 = arith.andi %317, %319 : vector<8x64xi1>
    %cst_153 = arith.constant 0.000000e+00 : f32
    %321 = vector.broadcast %cst_153 : f32 to vector<8x64xf32>
    %322 = arith.select %320, %315, %321 : vector<8x64xi1>, vector<8x64xf32>
    %323 = tpu.concatenate %259, %267, %275, %283, %290, %298, %306, %314, %322 in 0 : vector<8x64xf32>, vector<8x64xf32>, vector<8x64xf32>, vector<8x64xf32>, vector<8x64xf32>, vector<8x64xf32>, vector<8x64xf32>, vector<8x64xf32>, vector<8x64xf32> -> vector<72x64xf32>
    %cst_154 = arith.constant dense<0.000000e+00> : vector<8x64xf32>
    %324 = tpu.matmul %248, %323, %cst_154 {dimension_numbers = #tpu.dot_dimension_numbers<[1], [0], [0], [1], [0, 0, 1, 1], [], []>} : vector<8x72xf32>, vector<72x64xf32>, vector<8x64xf32> -> vector<8x64xf32>
    %325 = vector.broadcast %249 : vector<8x1xf32> to vector<8x64xf32>
    %326 = arith.mulf %324, %325 : vector<8x64xf32>
    %327 = vector.broadcast %250 : vector<8x1xf32> to vector<8x64xf32>
    %328 = arith.addf %326, %327 : vector<8x64xf32>
    %c0_155 = arith.constant 0 : index
    %c0_156 = arith.constant 0 : index
    %c0_157 = arith.constant 0 : index
    %329 = vector.load %arg14[%c0_155, %c0_156, %c0_157] : memref<1x8x64xf32, #tpu.memory_space<vmem>>, vector<1x8x64xf32>
    %330 = vector.shape_cast %329 : vector<1x8x64xf32> to vector<8x64xf32>
    %331 = vector.shape_cast %328 : vector<8x64xf32> to vector<1x8x64xf32>
    tpu.vector_store %arg14[%c0_155, %c0_156, %c0_157], %331 {strides = array<i32>} : memref<1x8x64xf32, #tpu.memory_space<vmem>>, vector<1x8x64xf32>,
    return
  }
  func.func @transform_0(%arg0: i32) -> (i32, i32, i32) {
    %c0_i32 = arith.constant 0 : i32
    %c0_i32_0 = arith.constant 0 : i32
    %c0_i32_1 = arith.constant 0 : i32
    return %arg0, %c0_i32, %c0_i32_0 : i32, i32, i32
  }
  func.func @transform_1(%arg0: i32) -> (i32, i32, i32) {
    %c0_i32 = arith.constant 0 : i32
    %c0_i32_0 = arith.constant 0 : i32
    %c0_i32_1 = arith.constant 0 : i32
    return %arg0, %c0_i32, %c0_i32_0 : i32, i32, i32
  }
  func.func @transform_2(%arg0: i32) -> (i32, i32) {
    %c0_i32 = arith.constant 0 : i32
    %c0_i32_0 = arith.constant 0 : i32
    %c0_i32_1 = arith.constant 0 : i32
    return %c0_i32, %c0_i32_0 : i32, i32
  }
  func.func @transform_3(%arg0: i32) -> (i32, i32) {
    %c0_i32 = arith.constant 0 : i32
    %c0_i32_0 = arith.constant 0 : i32
    %c0_i32_1 = arith.constant 0 : i32
    return %c0_i32, %c0_i32_0 : i32, i32
  }
  func.func @transform_4(%arg0: i32) -> (i32, i32) {
    %c0_i32 = arith.constant 0 : i32
    %c0_i32_0 = arith.constant 0 : i32
    %c0_i32_1 = arith.constant 0 : i32
    return %c0_i32, %c0_i32_0 : i32, i32
  }
  func.func @transform_5(%arg0: i32) -> (i32, i32) {
    %c0_i32 = arith.constant 0 : i32
    %c0_i32_0 = arith.constant 0 : i32
    %c0_i32_1 = arith.constant 0 : i32
    return %c0_i32, %c0_i32_0 : i32, i32
  }
  func.func @transform_6(%arg0: i32) -> (i32, i32) {
    %c0_i32 = arith.constant 0 : i32
    %c0_i32_0 = arith.constant 0 : i32
    %c0_i32_1 = arith.constant 0 : i32
    return %c0_i32, %c0_i32_0 : i32, i32
  }
  func.func @transform_7(%arg0: i32) -> (i32, i32) {
    %c0_i32 = arith.constant 0 : i32
    %c0_i32_0 = arith.constant 0 : i32
    %c0_i32_1 = arith.constant 0 : i32
    return %c0_i32, %c0_i32_0 : i32, i32
  }
  func.func @transform_8(%arg0: i32) -> (i32, i32) {
    %c0_i32 = arith.constant 0 : i32
    %c0_i32_0 = arith.constant 0 : i32
    %c0_i32_1 = arith.constant 0 : i32
    return %c0_i32, %c0_i32_0 : i32, i32
  }
  func.func @transform_9(%arg0: i32) -> (i32, i32) {
    %c0_i32 = arith.constant 0 : i32
    %c0_i32_0 = arith.constant 0 : i32
    %c0_i32_1 = arith.constant 0 : i32
    return %c0_i32, %c0_i32_0 : i32, i32
  }
  func.func @transform_10(%arg0: i32) -> (i32, i32) {
    %c0_i32 = arith.constant 0 : i32
    %c0_i32_0 = arith.constant 0 : i32
    %c0_i32_1 = arith.constant 0 : i32
    return %c0_i32, %c0_i32_0 : i32, i32
  }
  func.func @transform_11(%arg0: i32) -> (i32, i32) {
    %c0_i32 = arith.constant 0 : i32
    %c0_i32_0 = arith.constant 0 : i32
    %c0_i32_1 = arith.constant 0 : i32
    return %c0_i32, %c0_i32_0 : i32, i32
  }
  func.func @transform_12(%arg0: i32) -> (i32, i32) {
    %c0_i32 = arith.constant 0 : i32
    %c0_i32_0 = arith.constant 0 : i32
    %c0_i32_1 = arith.constant 0 : i32
    return %c0_i32, %c0_i32_0 : i32, i32
  }
  func.func @transform_13(%arg0: i32) -> (i32, i32, i32) {
    %c0_i32 = arith.constant 0 : i32
    %c0_i32_0 = arith.constant 0 : i32
    %c0_i32_1 = arith.constant 0 : i32
    return %arg0, %c0_i32, %c0_i32_0 : i32, i32, i32
  }
}

</mosaic_0001>

<bundles_post_ra>
// kernel: _lambda_.5
= control target key start
LH: loop header
LB: loop body
LE: loop exit
PB: predicated region body
PF: predicated region fallthrough
CT: control target
= control target key end

     0   :  { %s826_s24 = smov 0   ;;  %s991_s0 = inlined_call_operand.vmem [shape: f32[2,8,64], index: 0, kind: input, shape index: {}]   ;;  %s992_s1 = inlined_call_operand.vmem [shape: f32[8,72], index: 1, kind: input, shape index: {}]   ;;  %s993_s2 = inlined_call_operand.vmem [shape: f32[8,1], index: 2, kind: input, shape index: {}]   ;;  %s994_s3 = inlined_call_operand.vmem [shape: f32[8,1], index: 3, kind: input, shape index: {}]   ;;  %s995_s4 = inlined_call_operand.vmem [shape: f32[8,72], index: 4, kind: input, shape index: {}]   ;;  %s996_s5 = inlined_call_operand.vmem [shape: f32[8,1], index: 5, kind: input, shape index: {}]   ;;  %s997_s6 = inlined_call_operand.vmem [shape: f32[8,1], index: 6, kind: input, shape index: {}]   ;;  %s998_s7 = inlined_call_operand.vmem [shape: f32[2,8,64], index: 7, kind: output, shape index: {}]  }
   0x1 LB: > { %s619_s25 = sadd.s32 4294967295, %s771_s24   ;;  %p623_p0 = scmp.ge.s32.totalorder %s771_s24, 1  ;;  %s771_s24 = sphi %s826_s24, %s17_s24  }
   0x2   : > { %p236_p1 = scmp.lt.s32.totalorder %s771_s24, 3 }
   0x4   : > { %p237_p2 = pnand %p623_p0, %p236_p1 }
   0x5   : > { %p266_p3 = scmp.lt.s32.totalorder (!%p237_p2), %s619_s25, 1  ;;  %s773_s30 = smov (!%p237_p2), 64   ;;  %vm280_vm0 = vcmask (!%p237_p2), 1048064   ;;  %v774_v3 = vmov (!%p237_p2), 0.0|0.0   ;;  %vm781_vm1 = vmmov (!%p237_p2), 0   ;;  %v782_v6 = vmov (!%p237_p2), 0.0  }
   0x6   : > { %240 = sbr.rel (%p237_p2) target bundleno = 1190 (0x4a6), region = 48  ;;  %710 = vmatprep.subr.bf16.mxu0 (!%p237_p2), %v774_v3  ;;  %726 = vmatprep.subr.bf16.mxu1 (!%p237_p2), %v774_v3  ;;  %s775_s8 = smov (!%p237_p2), 66   ;;  %v276_v7 = vld [vmem:[%s993_s2] sm:$0xff] (!%p237_p2)  ;;  %v783_v8 = vmov (!%p237_p2), 0   ;;  %v278_v10 = vlaneseq (!%p237_p2) }
   0x7   : > { %s776_s9 = smov (!%p237_p2), 68   ;;  %s777_s10 = smov (!%p237_p2), 127   ;;  %686 = vmatprep.mubr.msk.f32.mxu0 (!%p237_p2), %vm781_vm1, %v782_v6  ;;  %707 = vmatprep.mubr.msk.f32.mxu1 (!%p237_p2), %vm781_vm1, %v782_v6  ;;  %v277_v9 = vld [vmem:[%s994_s3] sm:$0xff] (!%p237_p2) }
   0x8   : > { %s778_s11 = smov (!%p237_p2), 67   ;;  %s779_s12 = smov (!%p237_p2), 125   ;;  %763 = vset.pattern.permute.xlu0 (!%p237_p2), %v783_v8  ;;  %764 = vset.pattern.permute.xlu1 (!%p237_p2), %v783_v8  ;;  %v869_v11 = vand.u32 (!%p237_p2), 127, %v278_v10  ;;  %v275_v29 = vld [vmem:[%s992_s1] sm:$0xff] (!%p237_p2) }
   0x9   : > { %s780_s13 = smov (!%p237_p2), 65   ;;  %s784_s16 = smov (!%p237_p2), 126   ;;  %v437_v42 = vld [vmem:[%s997_s6] sm:$0xff] (!%p237_p2) }
   0xa   : > { %s785_s17 = smov (!%p237_p2), 124   ;;  %vm287_vm2 = vcmp.ge.s32.totalorder (!%p237_p2), %v869_v11, 4  ;;  %vm288_vm3 = vcmp.lt.s32.totalorder (!%p237_p2), %v869_v11, 68  ;;  %vm295_vm4 = vcmp.ge.s32.totalorder (!%p237_p2), %v869_v11, 3  ;;  %vm296_vm5 = vcmp.lt.s32.totalorder (!%p237_p2), %v869_v11, 67  ;;  %v436_v43 = vld [vmem:[%s996_s5] sm:$0xff] (!%p237_p2) }
   0xb   : > { %vm875_vm6 = vmand (!%p237_p2), %vm287_vm2, %vm288_vm3  ;;  %vm302_vm8 = vcmp.ge.s32.totalorder (!%p237_p2), %v869_v11, 2  ;;  %vm303_vm9 = vcmp.lt.s32.totalorder (!%p237_p2), %v869_v11, 66  ;;  %vm309_vm10 = vcmp.ge.s32.totalorder (!%p237_p2), %v869_v11, 1  ;;  %vm310_vm11 = vcmp.lt.s32.totalorder (!%p237_p2), %v869_v11, 65  ;;  %v435_v55 = vld [vmem:[%s995_s4] sm:$0xff] (!%p237_p2) }
   0xc   : > { %vm879_vm7 = vmand (!%p237_p2), %vm295_vm4, %vm296_vm5  ;;  %vm317_vm1 = vcmp.lt.s32.totalorder (!%p237_p2), %v869_v11, 64  ;;  %vm321_vm2 = vcmp.lt.s32.totalorder (!%p237_p2), %v869_v11, 63  ;;  %vm328_vm4 = vcmp.lt.s32.totalorder (!%p237_p2), %v869_v11, 62  ;;  %vm335_vm5 = vcmp.lt.s32.totalorder (!%p237_p2), %v869_v11, 61 }
   0xd   : > { %s1012_s25 = smov (!%p266_p3, %s619_s25), 1  ;;  %vm712_vm12 = vmpackc.low %vm879_vm7, %vm875_vm6 }
   0xe   : > { %s624_s26 = sshll.u32 %s1012_s25, 3  ;;  %vm891_vm13 = vmand %vm302_vm8, %vm303_vm9  ;;  %vm342_vm9 = vcmp.lt.s32.totalorder %v869_v11, 60 }
   0xf   : > { %s269_s29 = scalar_lea.vmem %s991_s0, %s624_s26  ;;  %vm895_vm14 = vmand %vm309_vm10, %vm310_vm11  ;;  %vm348_vm10 = vcmask 588800  }
  0x10   : > { %v842_v0 = vld [vmem:[%s269_s29] sm:$0xff]  ;;  %vm716_vm15 = vmpackc.low %vm895_vm14, %vm891_vm13 }
  0x11   : > { %281 = vrot.lane.b32.xlu0 %v842_v0, %s773_s30  ;;  %vm917_vm3 = vmpackc.low %vm321_vm2, %vm317_vm1 }
  0x12   : > { %vm927_vm8 = vmpackc.low %vm335_vm5, %vm328_vm4 }
  0x83   : > { %v282_v1 = vpop.permute.xlu0 %281 }
  0x84   : > { %v283_v2 = vsel %vm280_vm0, %v282_v1, %v842_v0 }
  0x85   : > { %284 = vrot.lane.b32.xlu0 %v283_v2, %s773_s30 }
  0xf7   : > { %v285_v4 = vpop.permute.xlu0 %284 }
  0xf8   : > { %v286_v5 = vsel %vm280_vm0, %v285_v4, %v842_v0 }
  0xf9   : > { %305 = vrot.lane.b32.xlu0 %v286_v5, %s775_s8  ;;  %291 = vrot.lane.b32.xlu1 %v286_v5, %s776_s9 }
  0xfd   : > { %323 = vrot.lane.b32.xlu0 %v286_v5, %s777_s10  ;;  %298 = vrot.lane.b32.xlu1 %v286_v5, %s778_s11 }
 0x101   : > { %337 = vrot.lane.b32.xlu0 %v286_v5, %s779_s12  ;;  %312 = vrot.lane.b32.xlu1 %v286_v5, %s780_s13 }
 0x105   : > { %330 = vrot.lane.b32.xlu1 %v286_v5, %s784_s16  ;;  %424 = vperm.xlu0 %763, %v276_v7  }
 0x109   : > { %344 = vrot.lane.b32.xlu1 %v286_v5, %s785_s17 }
 0x10d   : > { %430 = vperm.xlu1 %764, %v277_v9  }
 0x16b   : > { %v292_v13 = vpop.permute.xlu1 %291  ;;  %v306_v15 = vpop.permute.xlu0 %305 }
 0x16f   : > { %v299_v16 = vpop.permute.xlu1 %298  ;;  %v324_v22 = vpop.permute.xlu0 %323 }
 0x170   : > { %v711_v18 = vpack.c.bf16 %v299_v16, %v292_v13  ;;  %v719_v24 = vpack.c.bf16 %v324_v22, %v842_v0 }
 0x172   : > { %713 = vmatpush3.bf16.msk.msra.mxu0 %vm712_vm12, %v711_v18 }
 0x173   : > { %v313_v20 = vpop.permute.xlu1 %312  ;;  %714 = vmatprep.subr.bf16.mxu0 %v774_v3  ;;  %v338_v26 = vpop.permute.xlu0 %337 }
 0x174   : > { %v715_v21 = vpack.c.bf16 %v313_v20, %v306_v15 }
 0x176   : > { %717 = vmatpush3.bf16.msk.msra.mxu0 %vm716_vm15, %v715_v21 }
 0x177   : > { %718 = vmatprep.subr.bf16.mxu0 %v774_v3  ;;  %v331_v25 = vpop.permute.xlu1 %330 }
 0x178   : > { %v723_v28 = vpack.c.bf16 %v338_v26, %v331_v25 }
 0x17a   : > { %721 = vmatpush3.bf16.msk.msra.mxu0 %vm917_vm3, %v719_v24 }
 0x17b   : > { %722 = vmatprep.subr.bf16.mxu0 %v774_v3  ;;  %v345_v30 = vpop.permute.xlu1 %344 }
 0x17e   : > { %725 = vmatpush3.bf16.msk.msra.mxu0 %vm927_vm8, %v723_v28 }
 0x17f   : > { %684 = vmatprep.subr.mxu0 %v782_v6 }
 0x182   : > { %685 = vmatpush3.msk.msra.mxu0 %vm342_vm9, %v345_v30 }
 0x183   : > { %687 = vmatmul.mubr.msk.f32.vlgmr.msra.gmra.mrb[0].mxu0 %vm348_vm10, %v275_v29 }
 0x184   : > { %v425_v31 = vpop.permute.xlu0 %424 }
 0x18c   : > { %v431_v33 = vpop.permute.xlu1 %430 }
 0x256   : > { %v418_v32 = vpop.f32.mrb[0].mxu0 }
 0x257   : > { %v427_v34 = vmul.f32 %v425_v31, %v418_v32  ;;  %v688_v35 = vpop.f32.mrb[1].mxu0 }
 0x259   : > { %v433_v36 = vadd.f32 %v431_v33, %v427_v34 }
 0x25b   : > { %v434_v37 = vmax.f32 %v433_v36, 0.0 }
 0x25d   : > { %438 = vrot.lane.b32.xlu1 %v434_v37, %s773_s30 }
 0x2cf   : > { %v439_v38 = vpop.permute.xlu1 %438 }
 0x2d0   : > { %v440_v39 = vsel %vm280_vm0, %v439_v38, %v434_v37 }
 0x2d1   : > { %441 = vrot.lane.b32.xlu0 %v440_v39, %s773_s30 }
 0x343   : > { %v442_v40 = vpop.permute.xlu0 %441 }
 0x344   : > { %v443_v41 = vsel %vm280_vm0, %v442_v40, %v434_v37  ;;  %vm564_vm0 = vcmask 523264  }
 0x345   : > { %449 = vrot.lane.b32.xlu0 %v443_v41, %s778_s11  ;;  %445 = vrot.lane.b32.xlu1 %v443_v41, %s776_s9 }
 0x349   : > { %457 = vrot.lane.b32.xlu0 %v443_v41, %s780_s13  ;;  %453 = vrot.lane.b32.xlu1 %v443_v41, %s775_s8 }
 0x34d   : > { %466 = vrot.lane.b32.xlu0 %v443_v41, %s784_s16  ;;  %462 = vrot.lane.b32.xlu1 %v443_v41, %s777_s10  ;;  %s273_s10 = scalar_lea.vmem %s998_s7, %s624_s26 }
 0x351   : > { %474 = vrot.lane.b32.xlu0 %v443_v41, %s785_s17  ;;  %470 = vrot.lane.b32.xlu1 %v443_v41, %s779_s12 }
 0x355   : > { %559 = vperm.xlu0 %763, %v437_v42   ;;  %553 = vperm.xlu1 %764, %v436_v43  }
 0x3b7   : > { %v450_v44 = vpop.permute.xlu0 %449  ;;  %v446_v45 = vpop.permute.xlu1 %445 }
 0x3b8   : > { %v727_v46 = vpack.c.bf16 %v450_v44, %v446_v45 }
 0x3ba   : > { %729 = vmatpush3.bf16.msk.msra.mxu1 %vm712_vm12, %v727_v46 }
 0x3bb   : > { %v458_v47 = vpop.permute.xlu0 %457  ;;  %v454_v48 = vpop.permute.xlu1 %453  ;;  %730 = vmatprep.subr.bf16.mxu1 %v774_v3 }
 0x3bc   : > { %v731_v49 = vpack.c.bf16 %v458_v47, %v454_v48 }
 0x3be   : > { %733 = vmatpush3.bf16.msk.msra.mxu1 %vm716_vm15, %v731_v49 }
 0x3bf   : > { %v463_v50 = vpop.permute.xlu1 %462  ;;  %734 = vmatprep.subr.bf16.mxu1 %v774_v3  ;;  %v467_v52 = vpop.permute.xlu0 %466 }
 0x3c0   : > { %v735_v51 = vpack.c.bf16 %v463_v50, %v434_v37 }
 0x3c2   : > { %737 = vmatpush3.bf16.msk.msra.mxu1 %vm917_vm3, %v735_v51 }
 0x3c3   : > { %v471_v53 = vpop.permute.xlu1 %470  ;;  %738 = vmatprep.subr.bf16.mxu1 %v774_v3  ;;  %v475_v56 = vpop.permute.xlu0 %474 }
 0x3c4   : > { %v739_v54 = vpack.c.bf16 %v471_v53, %v467_v52 }
 0x3c6   : > { %741 = vmatpush3.bf16.msk.msra.mxu1 %vm927_vm8, %v739_v54 }
 0x3c7   : > { %705 = vmatprep.subr.mxu1 %v782_v6 }
 0x3ca   : > { %706 = vmatpush3.msk.msra.mxu1 %vm342_vm9, %v475_v56 }
 0x3cb   : > { %708 = vmatmul.mubr.msk.f32.vlgmr.msra.gmra.mrb[0].mxu1 %vm348_vm10, %v435_v55 }
 0x3d4   : > { %v554_v57 = vpop.permute.xlu1 %553  ;;  %v560_v61 = vpop.permute.xlu0 %559 }
 0x49e   : > { %v547_v58 = vpop.f32.mrb[0].mxu1 }
 0x49f   : > { %v556_v59 = vmul.f32 %v554_v57, %v547_v58  ;;  %v709_v60 = vpop.f32.mrb[1].mxu1 }
 0x4a1   : > { %v562_v62 = vadd.f32 %v560_v61, %v556_v59 }
 0x4a3   : > { %v563_v63 = vmax.f32 %v562_v62, 0.0 }
 0x4a5   : > { %565 = vst.msk [vmem:[%s273_s10] sm:$0xff] %vm564_vm0, %v563_v63 }
 0x4a6 PF: > { %s17_s24 = sadd.s32 1, %s771_s24  }
 0x4a7   : > { %p14_p4 = scmp.ge.s32.totalorder %s17_s24, 4  }
 0x4a9   :  { %16 = sbr.rel (!%p14_p4) target bundleno = 1 (0x1), region = 78 }

// kernel: _lambda_.6
= control target key start
LH: loop header
LB: loop body
LE: loop exit
PB: predicated region body
PF: predicated region fallthrough
CT: control target
= control target key end

     0   :  { %s1267_s27 = smov 0   ;;  %s1525_s0 = inlined_call_operand.vmem [shape: f32[2,8,64], index: 0, kind: input, shape index: {}]   ;;  %s1526_s1 = inlined_call_operand.vmem [shape: f32[2,64,32], index: 1, kind: input, shape index: {}]   ;;  %s1527_s2 = inlined_call_operand.vmem [shape: f32[16,72], index: 2, kind: input, shape index: {}]   ;;  %s1528_s3 = inlined_call_operand.vmem [shape: f32[16,1], index: 3, kind: input, shape index: {}]   ;;  %s1529_s4 = inlined_call_operand.vmem [shape: f32[16,1], index: 4, kind: input, shape index: {}]   ;;  %s1530_s5 = inlined_call_operand.vmem [shape: f32[16,144], index: 5, kind: input, shape index: {}]   ;;  %s1531_s6 = inlined_call_operand.vmem [shape: f32[16,1], index: 6, kind: input, shape index: {}]   ;;  %s1532_s7 = inlined_call_operand.vmem [shape: f32[16,1], index: 7, kind: input, shape index: {}]   ;;  %s1533_s8 = inlined_call_operand.vmem [shape: f32[2,16,32], index: 8, kind: output, shape index: {}]  }
   0x1 LB: > { %s904_s28 = sadd.s32 4294967295, %s1207_s27   ;;  %p908_p0 = scmp.ge.s32.totalorder %s1207_s27, 1  ;;  %s1207_s27 = sphi %s1267_s27, %s18_s27  }
   0x2   : > { %p261_p1 = scmp.lt.s32.totalorder %s1207_s27, 3 }
   0x4   : > { %p262_p2 = pnand %p908_p0, %p261_p1 }
   0x5   : > { %v304_v0 = vld [vmem:[%s1526_s1] sm:$0xff] (!%p262_p2)  ;;  %v305_v1 = vld [vmem:[%s1526_s1 + $0x8] sm:$0xff] (!%p262_p2)  ;;  %v306_v2 = vld [vmem:[%s1526_s1 + $0x10] sm:$0xff] (!%p262_p2)  ;;  %v1209_v3 = vmov (!%p262_p2), 0.0|0.0   ;;  %vm1210_vm0 = vmmov (!%p262_p2), 0   ;;  %v1211_v6 = vmov (!%p262_p2), 0.0   ;;  %v472_v42 = vlaneseq (!%p262_p2) }
   0x6   : > { %265 = sbr.rel (%p262_p2) target bundleno = 1462 (0x5b6), region = 52  ;;  %1044 = vmatprep.subr.bf16.mxu0 (!%p262_p2), %v1209_v3  ;;  %v1045_v4 = vpack.c.bf16 (!%p262_p2), %v305_v1, %v304_v0  ;;  %v307_v5 = vld [vmem:[%s1526_s1 + $0x18] sm:$0xff] (!%p262_p2)  ;;  %1001 = vmatprep.mubr.msk.f32.mxu0 (!%p262_p2), %vm1210_vm0, %v1211_v6  ;;  %p294_p3 = scmp.lt.s32.totalorder (!%p262_p2), %s904_s28, 1  ;;  %v308_v8 = vld [vmem:[%s1526_s1 + $0x20] sm:$0xff] (!%p262_p2)  ;;  %v309_v9 = vld [vmem:[%s1526_s1 + $0x28] sm:$0xff] (!%p262_p2)  ;;  %vm312_vm1 = vcmask (!%p262_p2), 523264  }
   0x7   : > { %1092 = vmatprep.subr.bf16.mxu1 (!%p262_p2), %v1209_v3  ;;  %v1048_v7 = vpack.c.bf16 (!%p262_p2), %v307_v5, %v306_v2  ;;  %v1051_v10 = vpack.c.bf16 (!%p262_p2), %v309_v9, %v308_v8  ;;  %v310_v11 = vld [vmem:[%s1526_s1 + $0x30] sm:$0xff] (!%p262_p2)  ;;  %v311_v12 = vld [vmem:[%s1526_s1 + $0x38] sm:$0xff] (!%p262_p2)  ;;  %v913_v14 = vld [vmem:[%s1526_s1 + $0x40] sm:$0xff] (!%p262_p2)  ;;  %vm474_vm2 = vcmask (!%p262_p2), 1047808   ;;  %s1213_s24 = smov (!%p262_p2), 98   ;;  %s1214_s25 = smov (!%p262_p2), 100  }
   0x8   : > { %1046 = vmatpush3.bf16.msra.mxu0 (!%p262_p2), %v1045_v4  ;;  %v1054_v13 = vpack.c.bf16 (!%p262_p2), %v311_v12, %v310_v11  ;;  %v914_v15 = vld [vmem:[%s1526_s1 + $0x48] sm:$0xff] (!%p262_p2)  ;;  %v915_v18 = vld [vmem:[%s1526_s1 + $0x50] sm:$0xff] (!%p262_p2)  ;;  %v916_v19 = vld [vmem:[%s1526_s1 + $0x58] sm:$0xff] (!%p262_p2)  ;;  %s1216_s29 = smov (!%p262_p2), 99   ;;  %s1217_s30 = smov (!%p262_p2), 125   ;;  %vm542_vm3 = vcmask (!%p262_p2), 588800  }
   0x9   : > { %1047 = vmatprep.subr.bf16.mxu0 (!%p262_p2), %v1209_v3  ;;  %v1057_v17 = vpack.c.bf16 (!%p262_p2), %v914_v15, %v913_v14  ;;  %v1060_v20 = vpack.c.bf16 (!%p262_p2), %v916_v19, %v915_v18  ;;  %v917_v21 = vld [vmem:[%s1526_s1 + $0x60] sm:$0xff] (!%p262_p2)  ;;  %v918_v22 = vld [vmem:[%s1526_s1 + $0x68] sm:$0xff] (!%p262_p2)  ;;  %v919_v24 = vld [vmem:[%s1526_s1 + $0x70] sm:$0xff] (!%p262_p2)  ;;  %s1218_s9 = smov (!%p262_p2), 97   ;;  %s1219_s14 = smov (!%p262_p2), 126   ;;  %v1220_v38 = vmov (!%p262_p2), 0  }
   0xa   : > { %v1063_v23 = vpack.c.bf16 (!%p262_p2), %v918_v22, %v917_v21  ;;  %v920_v25 = vld [vmem:[%s1526_s1 + $0x78] sm:$0xff] (!%p262_p2)  ;;  %v466_v36 = vld [vmem:[%s1527_s2] sm:$0xff] (!%p262_p2)  ;;  %1149 = vset.pattern.permute.xlu0 (!%p262_p2), %v1220_v38  ;;  %1150 = vset.pattern.permute.xlu1 (!%p262_p2), %v1220_v38  ;;  %v471_v39 = vld [vmem:[%s1529_s4 + $0x8] sm:$0xff] (!%p262_p2)  ;;  %s1221_s17 = smov (!%p262_p2), 124   ;;  %v1375_v43 = vand.u32 (!%p262_p2), 127, %v472_v42 }
   0xb   : > { %v1066_v26 = vpack.c.bf16 (!%p262_p2), %v920_v25, %v919_v24  ;;  %v468_v37 = vld [vmem:[%s1528_s3] sm:$0xff] (!%p262_p2)  ;;  %v469_v40 = vld [vmem:[%s1528_s3 + $0x8] sm:$0xff] (!%p262_p2) }
   0xc   : > { %1049 = vmatpush3.bf16.msra.mxu0 (!%p262_p2), %v1048_v7  ;;  %v470_v41 = vld [vmem:[%s1529_s4] sm:$0xff] (!%p262_p2)  ;;  %vm481_vm4 = vcmp.ge.s32.totalorder (!%p262_p2), %v1375_v43, 4  ;;  %vm482_vm5 = vcmp.lt.s32.totalorder (!%p262_p2), %v1375_v43, 36  ;;  %vm489_vm6 = vcmp.ge.s32.totalorder (!%p262_p2), %v1375_v43, 3  ;;  %vm490_vm7 = vcmp.lt.s32.totalorder (!%p262_p2), %v1375_v43, 35  ;;  %v467_v60 = vld [vmem:[%s1527_s2 + $0x8] sm:$0xff] (!%p262_p2) }
   0xd   : > { %s1543_s28 = smov (!%p294_p3, %s904_s28), 1  ;;  %1050 = vmatprep.subr.bf16.mxu0 %v1209_v3  ;;  %vm1381_vm8 = vmand %vm481_vm4, %vm482_vm5  ;;  %vm496_vm10 = vcmp.ge.s32.totalorder %v1375_v43, 2  ;;  %vm497_vm11 = vcmp.lt.s32.totalorder %v1375_v43, 34  ;;  %vm503_vm12 = vcmp.ge.s32.totalorder %v1375_v43, 1  ;;  %vm504_vm13 = vcmp.lt.s32.totalorder %v1375_v43, 33  ;;  %v654_v24 = vld [vmem:[%s1531_s6] sm:$0xff] }
   0xe   : > { %s909_s23 = sshll.u32 %s1543_s28, 3  ;;  %vm1385_vm9 = vmand %vm489_vm6, %vm490_vm7  ;;  %vm515_vm4 = vcmp.lt.s32.totalorder %v1375_v43, 31  ;;  %vm522_vm7 = vcmp.lt.s32.totalorder %v1375_v43, 30  ;;  %v657_v25 = vld [vmem:[%s1532_s7 + $0x8] sm:$0xff]  ;;  %s955_s20 = sshll.u32 %s1543_s28, 4 }
   0xf   : > { %s297_s26 = scalar_lea.vmem %s1525_s0, %s909_s23  ;;  %s1212_s23 = smov 32   ;;  %vm1069_vm14 = vmpackc.low %vm1385_vm9, %vm1381_vm8 }
  0x10   : > { %1052 = vmatpush3.bf16.msra.mxu0 %v1051_v10  ;;  %v303_v16 = vld [vmem:[%s297_s26] sm:$0xff]  ;;  %s1215_s26 = smov 127   ;;  %vm1397_vm15 = vmand %vm496_vm10, %vm497_vm11  ;;  %vm529_vm10 = vcmp.lt.s32.totalorder %v1375_v43, 29  ;;  %s302_s10 = scalar_lea.vmem %s1533_s8, %s955_s20 }
  0x11   : > { %1053 = vmatprep.subr.bf16.mxu0 %v1209_v3  ;;  %vm1087_vm11 = vmpackc.low %vm529_vm10, %vm522_vm7 }
  0x14   : > { %1055 = vmatpush3.bf16.msra.mxu0 %v1054_v13 }
  0x15   : > { %1056 = vmatprep.subr.bf16.mxu0 %v1209_v3 }
  0x17   : > { %1002 = vmatmul.mubr.msk.f32.vlgmr.msra.gmra.mrb[0].mxu0 %vm312_vm1, %v303_v16 }
  0x18   : > { %1058 = vmatpush3.bf16.msra.mxu0 %v1057_v17  ;;  %1020 = vmatprep.mubr.msk.f32.mxu0 %vm1210_vm0, %v1211_v6  ;;  %vm1401_vm0 = vmand %vm503_vm12, %vm504_vm13  ;;  %vm536_vm12 = vcmp.lt.s32.totalorder %v1375_v43, 28 }
  0x19   : > { %1059 = vmatprep.subr.bf16.mxu0 %v1209_v3  ;;  %vm1075_vm5 = vmpackc.low %vm1401_vm0, %vm1397_vm15 }
  0x1a   : > { %vm1098_vm13 = vmpackc.low %vm1385_vm9, %vm1385_vm9 }
  0x1b   : > { %vm1106_vm9 = vmpackc.low %vm1401_vm0, %vm1401_vm0 }
  0x1c   : > { %1061 = vmatpush3.bf16.msra.mxu0 %v1060_v20  ;;  %vm1118_vm0 = vmpackc.low %vm522_vm7, %vm522_vm7 }
  0x1d   : > { %1062 = vmatprep.subr.bf16.mxu0 %v1209_v3 }
  0x20   : > { %1064 = vmatpush3.bf16.msra.mxu0 %v1063_v23  ;;  %v655_v23 = vld [vmem:[%s1531_s6 + $0x8] sm:$0xff] }
  0x21   : > { %1065 = vmatprep.subr.bf16.mxu0 %v1209_v3 }
  0x24   : > { %1067 = vmatpush3.bf16.msra.mxu0 %v1066_v26  ;;  %v656_v26 = vld [vmem:[%s1532_s7] sm:$0xff] }
  0x27   : > { %1021 = vmatmul.mubr.msk.f32.vlgmr.msra.gmra.mrb[2].mxu0 %vm312_vm1, %v303_v16  ;;  %vm511_vm1 = vcmp.lt.s32.totalorder %v1375_v43, 32 }
  0x28   : > { %1041 = vmatprep.mubr.msk.f32.mxu0 %vm542_vm3, %v466_v36  ;;  %vm1081_vm6 = vmpackc.low %vm515_vm4, %vm511_vm1 }
  0xea   : > { %v382_v27 = vpop.f32.mrb[0].mxu0 }
  0xeb   : > { %v1003_v28 = vpop.f32.mrb[1].mxu0 }
  0xfa   : > { %v461_v29 = vpop.f32.mrb[2].mxu0 }
  0xfb   : > { %v1342_v30 = vmax.f32 %v382_v27, %v461_v29  ;;  %v1022_v31 = vpop.f32.mrb[3].mxu0  ;;  %v651_v27 = vld [vmem:[%s1530_s5 + $0x8] sm:$0xff] }
  0xfd   : > { %475 = vrot.lane.b32.xlu0 %v1342_v30, %s1212_s23 }
 0x16f   : > { %v476_v32 = vpop.permute.xlu0 %475 }
 0x170   : > { %v477_v33 = vsel %vm474_vm2, %v476_v32, %v1342_v30 }
 0x171   : > { %478 = vrot.lane.b32.xlu0 %v477_v33, %s1212_s23 }
 0x1e3   : > { %v479_v34 = vpop.permute.xlu0 %478 }
 0x1e4   : > { %v480_v35 = vsel %vm474_vm2, %v479_v34, %v1342_v30 }
 0x1e5   : > { %499 = vrot.lane.b32.xlu0 %v480_v35, %s1213_s24  ;;  %485 = vrot.lane.b32.xlu1 %v480_v35, %s1214_s25 }
 0x1e9   : > { %517 = vrot.lane.b32.xlu0 %v480_v35, %s1215_s26  ;;  %492 = vrot.lane.b32.xlu1 %v480_v35, %s1216_s29 }
 0x1ed   : > { %531 = vrot.lane.b32.xlu0 %v480_v35, %s1217_s30  ;;  %506 = vrot.lane.b32.xlu1 %v480_v35, %s1218_s9 }
 0x1f1   : > { %524 = vrot.lane.b32.xlu1 %v480_v35, %s1219_s14  ;;  %626 = vperm.xlu0 %1149, %v468_v37  }
 0x1f5   : > { %538 = vrot.lane.b32.xlu1 %v480_v35, %s1221_s17  ;;  %643 = vperm.xlu0 %1149, %v471_v39  }
 0x1f9   : > { %631 = vperm.xlu1 %1150, %v469_v40  }
 0x1fd   : > { %638 = vperm.xlu1 %1150, %v470_v41  }
 0x257   : > { %v486_v45 = vpop.permute.xlu1 %485  ;;  %v500_v47 = vpop.permute.xlu0 %499 }
 0x25b   : > { %v493_v48 = vpop.permute.xlu1 %492  ;;  %v518_v52 = vpop.permute.xlu0 %517 }
 0x25c   : > { %v1068_v50 = vpack.c.bf16 %v493_v48, %v486_v45  ;;  %v1080_v55 = vpack.c.bf16 %v518_v52, %v1342_v30 }
 0x25e   : > { %1070 = vmatprep.subr.msk.bf16.mxu0 %vm1069_vm14, %v1068_v50 }
 0x25f   : > { %1073 = vmatpush3.bf16.msk.msra.mxu0 %vm1069_vm14, %v1068_v50  ;;  %v507_v53 = vpop.permute.xlu1 %506  ;;  %v532_v57 = vpop.permute.xlu0 %531  ;;  %vm1110_vm14 = vmpackc.low %vm511_vm1, %vm511_vm1 }
 0x260   : > { %v1074_v54 = vpack.c.bf16 %v507_v53, %v500_v47  ;;  %vm1122_vm1 = vmpackc.low %vm529_vm10, %vm529_vm10 }
 0x262   : > { %1076 = vmatprep.subr.msk.bf16.mxu0 %vm1075_vm5, %v1074_v54 }
 0x263   : > { %1079 = vmatpush3.bf16.msk.msra.mxu0 %vm1075_vm5, %v1074_v54  ;;  %v525_v56 = vpop.permute.xlu1 %524  ;;  %vm846_vm5 = vcmask 261120  }
 0x264   : > { %1082 = vmatprep.subr.msk.bf16.mxu0 %vm1081_vm6, %v1080_v55  ;;  %v1086_v58 = vpack.c.bf16 %v532_v57, %v525_v56 }
 0x267   : > { %1085 = vmatpush3.bf16.msk.msra.mxu0 %vm1081_vm6, %v1080_v55  ;;  %v539_v59 = vpop.permute.xlu1 %538 }
 0x268   : > { %1088 = vmatprep.subr.msk.bf16.mxu0 %vm1087_vm11, %v1086_v58 }
 0x26b   : > { %1091 = vmatpush3.bf16.msk.msra.mxu0 %vm1087_vm11, %v1086_v58 }
 0x26c   : > { %1039 = vmatprep.subr.msk.mxu0 %vm536_vm12, %v539_v59 }
 0x26f   : > { %1040 = vmatpush3.msk.msra.mxu0 %vm536_vm12, %v539_v59 }
 0x270   : > { %1042 = vmatmul.mubr.msk.f32.vlgmr.msra.gmra.mrb[4].mxu0 %vm542_vm3, %v467_v60  ;;  %v627_v61 = vpop.permute.xlu0 %626  ;;  %vm1094_vm3 = vmpackc.low %vm1381_vm8, %vm1381_vm8 }
 0x271   : > { %vm1102_vm8 = vmpackc.low %vm1397_vm15, %vm1397_vm15 }
 0x272   : > { %vm1114_vm15 = vmpackc.low %vm515_vm4, %vm515_vm4 }
 0x273   : > { %vm1126_vm4 = vmpackc.low %vm536_vm12, %vm536_vm12 }
 0x274   : > { %v644_v2 = vpop.permute.xlu0 %643 }
 0x278   : > { %v632_v62 = vpop.permute.xlu1 %631 }
 0x27c   : > { %v639_v5 = vpop.permute.xlu1 %638 }
 0x343   : > { %v1043_v63 = vpop.f32.mrb[4].mxu0 }
 0x344   : > { %v635_v0 = vmul.f32 %v1043_v63, %v632_v62  ;;  %v615_v1 = vpop.f32.mrb[5].mxu0  ;;  %v650_v62 = vld [vmem:[%s1530_s5] sm:$0xff]  ;;  %v653_v63 = vld [vmem:[%s1530_s5 + $0x18] sm:$0xff] }
 0x345   : > { %v634_v4 = vmul.f32 %v627_v61, %v615_v1 }
 0x346   : > { %v647_v6 = vadd.f32 %v644_v2, %v635_v0 }
 0x347   : > { %v646_v7 = vadd.f32 %v639_v5, %v634_v4 }
 0x348   : > { %v1431_v8 = vmax.f32 %v647_v6, 0.0 }
 0x349   : > { %v1433_v9 = vmax.f32 %v646_v7, 0.0 }
 0x34b   : > { %v1151_v10 = vpack.i.bf16 %v1431_v8, %v1433_v9  ;;  %v1109_v48 = vpack.c.bf16 %v1431_v8, %v1433_v9 }
 0x34d   : > { %1152 = vrot.lane.b32.xlu1 %v1151_v10, %s1212_s23 }
 0x3bf   : > { %v1153_v11 = vpop.permute.xlu1 %1152 }
 0x3c0   : > { %v1155_v12 = vunpack.i.h.bf16 %v1153_v11  ;;  %v1154_v13 = vunpack.i.l.bf16 %v1153_v11 }
 0x3c2   : > { %v660_v14 = vsel %vm474_vm2, %v1154_v13, %v1433_v9  ;;  %v663_v15 = vsel %vm474_vm2, %v1155_v12, %v1431_v8 }
 0x3c3   : > { %v1156_v16 = vpack.i.bf16 %v663_v15, %v660_v14 }
 0x3c5   : > { %1157 = vrot.lane.b32.xlu0 %v1156_v16, %s1212_s23 }
 0x437   : > { %v1158_v17 = vpop.permute.xlu0 %1157 }
 0x438   : > { %v1160_v18 = vunpack.i.h.bf16 %v1158_v17  ;;  %v1159_v19 = vunpack.i.l.bf16 %v1158_v17 }
 0x43a   : > { %v669_v20 = vsel %vm474_vm2, %v1160_v18, %v1431_v8  ;;  %v668_v21 = vsel %vm474_vm2, %v1159_v19, %v1433_v9  ;;  %vm738_vm2 = vcmask 130048  }
 0x43b   : > { %v1166_v22 = vpack.i.bf16 %v669_v20, %v668_v21  ;;  %951 = vmatprep.mubr.msk.f32.mxu1 %vm738_vm2, %v651_v27 }
 0x43d   : > { %1167 = vrot.lane.b32.xlu0 %v1166_v22, %s1216_s29  ;;  %1162 = vrot.lane.b32.xlu1 %v1166_v22, %s1214_s25 }
 0x441   : > { %1177 = vrot.lane.b32.xlu0 %v1166_v22, %s1218_s9  ;;  %1172 = vrot.lane.b32.xlu1 %v1166_v22, %s1213_s24 }
 0x445   : > { %1187 = vrot.lane.b32.xlu0 %v1166_v22, %s1219_s14  ;;  %1182 = vrot.lane.b32.xlu1 %v1166_v22, %s1215_s26 }
 0x449   : > { %1197 = vrot.lane.b32.xlu0 %v1166_v22, %s1221_s17  ;;  %1192 = vrot.lane.b32.xlu1 %v1166_v22, %s1217_s30 }
 0x44d   : > { %827 = vperm.xlu0 %1149, %v655_v23   ;;  %822 = vperm.xlu1 %1150, %v654_v24  }
 0x451   : > { %839 = vperm.xlu0 %1149, %v657_v25   ;;  %834 = vperm.xlu1 %1150, %v656_v26  }
 0x4af   : > { %v1168_v28 = vpop.permute.xlu0 %1167  ;;  %v1163_v29 = vpop.permute.xlu1 %1162 }
 0x4b0   : > { %v1165_v30 = vunpack.i.h.bf16 %v1163_v29  ;;  %v1164_v31 = vunpack.i.l.bf16 %v1163_v29  ;;  %v1170_v32 = vunpack.i.h.bf16 %v1168_v28  ;;  %v1169_v33 = vunpack.i.l.bf16 %v1168_v28 }
 0x4b2   : > { %v1093_v34 = vpack.c.bf16 %v1165_v30, %v1164_v31  ;;  %v1097_v36 = vpack.c.bf16 %v1170_v32, %v1169_v33 }
 0x4b3   : > { %v1173_v35 = vpop.permute.xlu1 %1172  ;;  %v1178_v39 = vpop.permute.xlu0 %1177 }
 0x4b4   : > { %1095 = vmatpush1.bf16.msk.msra.mxu1 %vm1094_vm3, %v1093_v34  ;;  %v1175_v37 = vunpack.i.h.bf16 %v1173_v35  ;;  %v1174_v38 = vunpack.i.l.bf16 %v1173_v35  ;;  %v1180_v40 = vunpack.i.h.bf16 %v1178_v39  ;;  %v1179_v41 = vunpack.i.l.bf16 %v1178_v39 }
 0x4b5   : > { %1096 = vmatprep.subr.bf16.mxu1 %v1209_v3 }
 0x4b6   : > { %v1101_v42 = vpack.c.bf16 %v1175_v37, %v1174_v38  ;;  %v1105_v44 = vpack.c.bf16 %v1180_v40, %v1179_v41 }
 0x4b7   : > { %v1183_v45 = vpop.permute.xlu1 %1182  ;;  %v1188_v49 = vpop.permute.xlu0 %1187 }
 0x4b8   : > { %1099 = vmatpush1.bf16.msk.msra.mxu1 %vm1098_vm13, %v1097_v36  ;;  %v1185_v46 = vunpack.i.h.bf16 %v1183_v45  ;;  %v1184_v47 = vunpack.i.l.bf16 %v1183_v45  ;;  %v1190_v50 = vunpack.i.h.bf16 %v1188_v49  ;;  %v1189_v51 = vunpack.i.l.bf16 %v1188_v49 }
 0x4b9   : > { %1100 = vmatprep.subr.bf16.mxu1 %v1209_v3 }
 0x4ba   : > { %v1113_v52 = vpack.c.bf16 %v1185_v46, %v1184_v47  ;;  %v1117_v54 = vpack.c.bf16 %v1190_v50, %v1189_v51 }
 0x4bb   : > { %v1193_v53 = vpop.permute.xlu1 %1192  ;;  %v1198_v57 = vpop.permute.xlu0 %1197 }
 0x4bc   : > { %1103 = vmatpush1.bf16.msk.msra.mxu1 %vm1102_vm8, %v1101_v42  ;;  %v1195_v55 = vunpack.i.h.bf16 %v1193_v53  ;;  %v1194_v56 = vunpack.i.l.bf16 %v1193_v53  ;;  %v1200_v58 = vunpack.i.h.bf16 %v1198_v57  ;;  %v1199_v59 = vunpack.i.l.bf16 %v1198_v57 }
 0x4bd   : > { %1104 = vmatprep.subr.bf16.mxu1 %v1209_v3 }
 0x4be   : > { %v1121_v60 = vpack.c.bf16 %v1195_v55, %v1194_v56  ;;  %v1125_v61 = vpack.c.bf16 %v1200_v58, %v1199_v59 }
 0x4c0   : > { %1107 = vmatpush1.bf16.msk.msra.mxu1 %vm1106_vm9, %v1105_v44 }
 0x4c1   : > { %1108 = vmatprep.subr.bf16.mxu1 %v1209_v3 }
 0x4c4   : > { %1111 = vmatpush1.bf16.msk.msra.mxu1 %vm1110_vm14, %v1109_v48 }
 0x4c5   : > { %1112 = vmatprep.subr.bf16.mxu1 %v1209_v3 }
 0x4c8   : > { %1115 = vmatpush1.bf16.msk.msra.mxu1 %vm1114_vm15, %v1113_v52 }
 0x4c9   : > { %1116 = vmatprep.subr.bf16.mxu1 %v1209_v3 }
 0x4cc   : > { %1119 = vmatpush1.bf16.msk.msra.mxu1 %vm1118_vm0, %v1117_v54  ;;  %v823_v43 = vpop.permute.xlu1 %822  ;;  %v828_v0 = vpop.permute.xlu0 %827 }
 0x4cd   : > { %1120 = vmatprep.subr.bf16.mxu1 %v1209_v3 }
 0x4d0   : > { %1123 = vmatpush1.bf16.msk.msra.mxu1 %vm1122_vm1, %v1121_v60  ;;  %v835_v5 = vpop.permute.xlu1 %834  ;;  %v840_v11 = vpop.permute.xlu0 %839 }
 0x4d1   : > { %1124 = vmatprep.subr.bf16.mxu1 %v1209_v3  ;;  %v652_v3 = vld [vmem:[%s1530_s5 + $0x10] sm:$0xff] }
 0x4d4   : > { %1127 = vmatpush1.bf16.msk.msra.mxu1 %vm1126_vm4, %v1125_v61 }
 0x4d7   : > { %810 = vmatmul.mubr.f32.vlgmr.msra.gmra.mrb[0].mxu1 %v650_v62 }
 0x4d8   : > { %952 = vmatprep.mubr.msk.f32.mxu1 %vm738_vm2, %v653_v63 }
 0x4db   : > { %815 = vmatmul.mubr.f32.gmra.mrb[2].mxu1 %v652_v3 }
 0x5aa   : > { %v811_v1 = vpop.f32.mrb[0].mxu1 }
 0x5ab   : > { %v830_v2 = vmul.f32 %v823_v43, %v811_v1  ;;  %v813_v4 = vpop.f32.mrb[1].mxu1 }
 0x5ad   : > { %v842_v6 = vadd.f32 %v835_v5, %v830_v2 }
 0x5ae   : > { %v816_v7 = vpop.f32.mrb[2].mxu1 }
 0x5af   : > { %v844_v8 = vmax.f32 %v842_v6, 0.0  ;;  %v831_v9 = vmul.f32 %v828_v0, %v816_v7  ;;  %v818_v10 = vpop.f32.mrb[3].mxu1 }
 0x5b1   : > { %847 = vst.msk [vmem:[%s302_s10] sm:$0xff] %vm846_vm5, %v844_v8  ;;  %v843_v12 = vadd.f32 %v840_v11, %v831_v9 }
 0x5b3   : > { %v845_v13 = vmax.f32 %v843_v12, 0.0 }
 0x5b5   : > { %848 = vst.msk [vmem:[%s302_s10 + $0x8] sm:$0xff] %vm846_vm5, %v845_v13 }
 0x5b6 PF: > { %s18_s27 = sadd.s32 1, %s1207_s27  }
 0x5b7   : > { %p15_p4 = scmp.ge.s32.totalorder %s18_s27, 4  }
 0x5b9   :  { %17 = sbr.rel (!%p15_p4) target bundleno = 1 (0x1), region = 83 }

// kernel: _lambda_.7
= control target key start
LH: loop header
LB: loop body
LE: loop exit
PB: predicated region body
PF: predicated region fallthrough
CT: control target
= control target key end

     0   :  { %s1755_s27 = smov 0   ;;  %s2108_s0 = inlined_call_operand.vmem [shape: f32[2,16,32], index: 0, kind: input, shape index: {}]   ;;  %s2109_s1 = inlined_call_operand.vmem [shape: f32[2,32,16], index: 1, kind: input, shape index: {}]   ;;  %s2110_s2 = inlined_call_operand.vmem [shape: f32[32,144], index: 2, kind: input, shape index: {}]   ;;  %s2111_s3 = inlined_call_operand.vmem [shape: f32[32,1], index: 3, kind: input, shape index: {}]   ;;  %s2112_s4 = inlined_call_operand.vmem [shape: f32[32,1], index: 4, kind: input, shape index: {}]   ;;  %s2113_s5 = inlined_call_operand.vmem [shape: f32[32,288], index: 5, kind: input, shape index: {}]   ;;  %s2114_s6 = inlined_call_operand.vmem [shape: f32[32,1], index: 6, kind: input, shape index: {}]   ;;  %s2115_s7 = inlined_call_operand.vmem [shape: f32[32,1], index: 7, kind: input, shape index: {}]   ;;  %s2116_s8 = inlined_call_operand.vmem [shape: f32[2,32,16], index: 8, kind: output, shape index: {}]  }
   0x1 LB: > { %s1225_s28 = sadd.s32 4294967295, %s1697_s27   ;;  %p1229_p0 = scmp.ge.s32.totalorder %s1697_s27, 1  ;;  %s1697_s27 = sphi %s1755_s27, %s18_s27  }
   0x2   : > { %p262_p1 = scmp.lt.s32.totalorder %s1697_s27, 3 }
   0x4   : > { %p263_p2 = pnand %p1229_p0, %p262_p1 }
   0x5   : > { %v308_v0 = vld [vmem:[%s2109_s1] sm:$0xff] (!%p263_p2)  ;;  %v309_v1 = vld [vmem:[%s2109_s1 + $0x8] sm:$0xff] (!%p263_p2)  ;;  %p296_p3 = scmp.lt.s32.totalorder (!%p263_p2), %s1225_s28, 1  ;;  %v310_v5 = vld [vmem:[%s2109_s1 + $0x10] sm:$0xff] (!%p263_p2)  ;;  %vm312_vm0 = vcmask (!%p263_p2), 261120   ;;  %s1699_s29 = smov (!%p263_p2), 16   ;;  %v492_v44 = vlaneseq (!%p263_p2) }
   0x6   : > { %266 = sbr.rel (%p263_p2) target bundleno = 1489 (0x5d1), region = 52  ;;  %v1236_v2 = vld [vmem:[%s2109_s1 + $0x20] sm:$0xff] (!%p263_p2)  ;;  %v1408_v3 = vpack.c.bf16 (!%p263_p2), %v309_v1, %v308_v0  ;;  %v1237_v4 = vld [vmem:[%s2109_s1 + $0x28] sm:$0xff] (!%p263_p2)  ;;  %v311_v6 = vld [vmem:[%s2109_s1 + $0x18] sm:$0xff] (!%p263_p2)  ;;  %vm494_vm1 = vcmask (!%p263_p2), 1047680   ;;  %v1700_v27 = vmov (!%p263_p2), 0.0|0.0  }
   0x7   : > { %v1416_v7 = vpack.c.bf16 (!%p263_p2), %v1237_v4, %v1236_v2  ;;  %v1412_v8 = vpack.c.bf16 (!%p263_p2), %v311_v6, %v310_v5  ;;  %v1238_v9 = vld [vmem:[%s2109_s1 + $0x30] sm:$0xff] (!%p263_p2)  ;;  %v1239_v10 = vld [vmem:[%s2109_s1 + $0x38] sm:$0xff] (!%p263_p2)  ;;  %s1701_s30 = smov (!%p263_p2), 114   ;;  %s1702_s9 = smov (!%p263_p2), 116   ;;  %v477_v34 = vld [vmem:[%s2110_s2 + $0x8] sm:$0xff] (!%p263_p2)  ;;  %vm602_vm2 = vcmask (!%p263_p2), 130048  }
   0x8   : > { %1409 = vmatprep.subr.bf16.mxu0 (!%p263_p2), %v1408_v3  ;;  %v1420_v11 = vpack.c.bf16 (!%p263_p2), %v1239_v10, %v1238_v9  ;;  %s1703_s10 = smov (!%p263_p2), 127   ;;  %s1704_s11 = smov (!%p263_p2), 115   ;;  %v484_v35 = vld [vmem:[%s2111_s3] sm:$0xff] (!%p263_p2)  ;;  %v485_v36 = vld [vmem:[%s2111_s3 + $0x8] sm:$0xff] (!%p263_p2)  ;;  %v1709_v37 = vmov (!%p263_p2), 0   ;;  %v487_v40 = vld [vmem:[%s2111_s3 + $0x18] sm:$0xff] (!%p263_p2) }
   0x9   : > { %1417 = vmatprep.subr.bf16.mxu1 (!%p263_p2), %v1416_v7  ;;  %1411 = vmatpush3.bf16.msra.mxu0 (!%p263_p2), %v1408_v3  ;;  %s1705_s12 = smov (!%p263_p2), 125   ;;  %s1706_s13 = smov (!%p263_p2), 113   ;;  %v489_v38 = vld [vmem:[%s2112_s4 + $0x8] sm:$0xff] (!%p263_p2)  ;;  %v488_v39 = vld [vmem:[%s2112_s4] sm:$0xff] (!%p263_p2)  ;;  %v486_v41 = vld [vmem:[%s2111_s3 + $0x10] sm:$0xff] (!%p263_p2)  ;;  %v1850_v45 = vand.u32 (!%p263_p2), 127, %v492_v44 }
   0xa   : > { %1419 = vmatpush3.bf16.msra.mxu1 (!%p263_p2), %v1416_v7  ;;  %1413 = vmatprep.subr.bf16.mxu0 (!%p263_p2), %v1412_v8  ;;  %s1707_s14 = smov (!%p263_p2), 126   ;;  %s1708_s15 = smov (!%p263_p2), 124   ;;  %v491_v42 = vld [vmem:[%s2112_s4 + $0x18] sm:$0xff] (!%p263_p2)  ;;  %v490_v43 = vld [vmem:[%s2112_s4 + $0x10] sm:$0xff] (!%p263_p2) }
   0xb   : > { %1421 = vmatprep.subr.bf16.mxu1 (!%p263_p2), %v1420_v11  ;;  %1590 = vset.pattern.permute.xlu1 (!%p263_p2), %v1709_v37  ;;  %vm507_vm3 = vcmp.ge.s32.totalorder (!%p263_p2), %v1850_v45, 4  ;;  %vm508_vm4 = vcmp.lt.s32.totalorder (!%p263_p2), %v1850_v45, 20  ;;  %vm520_vm6 = vcmp.ge.s32.totalorder (!%p263_p2), %v1850_v45, 3  ;;  %vm521_vm7 = vcmp.lt.s32.totalorder (!%p263_p2), %v1850_v45, 19  ;;  %v755_v0 = vld [vmem:[%s2113_s5 + $0x18] sm:$0xff] (!%p263_p2) }
   0xc   : > { %1589 = vset.pattern.permute.xlu0 (!%p263_p2), %v1709_v37  ;;  %vm509_vm5 = vmand (!%p263_p2), %vm507_vm3, %vm508_vm4  ;;  %vm531_vm10 = vcmp.ge.s32.totalorder (!%p263_p2), %v1850_v45, 2  ;;  %vm532_vm11 = vcmp.lt.s32.totalorder (!%p263_p2), %v1850_v45, 18  ;;  %vm542_vm14 = vcmp.ge.s32.totalorder (!%p263_p2), %v1850_v45, 1  ;;  %vm543_vm15 = vcmp.lt.s32.totalorder (!%p263_p2), %v1850_v45, 17 }
   0xd   : > { %s2136_s28 = smov (!%p296_p3, %s1225_s28), 1  ;;  %1415 = vmatpush3.bf16.msra.mxu0 %v1412_v8  ;;  %vm1856_vm8 = vmpackc.low %vm509_vm5, %vm509_vm5 }
   0xe   : > { %s1306_s23 = sshll.u32 %s2136_s28, 4  ;;  %1423 = vmatpush3.bf16.msra.mxu1 %v1420_v11  ;;  %1424 = vmatprep.subr.bf16.mxu0 %v1700_v27  ;;  %vm522_vm9 = vmand %vm520_vm6, %vm521_vm7  ;;  %vm554_vm6 = vcmp.lt.s32.totalorder %v1850_v45, 16 }
   0xf   : > { %s300_s26 = scalar_lea.vmem %s2108_s0, %s1306_s23  ;;  %vm1865_vm12 = vmpackc.low %vm522_vm9, %vm522_vm9  ;;  %vm559_vm9 = vcmp.lt.s32.totalorder %v1850_v45, 15 }
  0x10   : > { %v306_v12 = vld [vmem:[%s300_s26] sm:$0xff]  ;;  %v307_v13 = vld [vmem:[%s300_s26 + $0x8] sm:$0xff]  ;;  %vm533_vm13 = vmand %vm531_vm10, %vm532_vm11  ;;  %vm570_vm11 = vcmp.lt.s32.totalorder %v1850_v45, 14 }
  0x11   : > { %1380 = vmatprep.mubr.msk.f32.mxu0 %vm312_vm0, %v306_v12  ;;  %1391 = vmatprep.mubr.msk.f32.mxu1 %vm312_vm0, %v306_v12  ;;  %vm1874_vm3 = vmpackc.low %vm533_vm13, %vm533_vm13 }
  0x12   : > { %1381 = vmatmul.mubr.msk.f32.vlgmr.msra.gmra.mrb[0].mxu0 %vm312_vm0, %v307_v13  ;;  %1392 = vmatmul.mubr.msk.f32.vlgmr.msra.gmra.mrb[0].mxu1 %vm312_vm0, %v307_v13  ;;  %vm544_vm4 = vmand %vm542_vm14, %vm543_vm15  ;;  %vm581_vm14 = vcmp.lt.s32.totalorder %v1850_v45, 13 }
  0x13   : > { %1260 = vmatprep.mubr.msk.f32.mxu0 %vm602_vm2, %v477_v34  ;;  %vm1881_vm5 = vmpackc.low %vm544_vm4, %vm544_vm4  ;;  %vm592_vm4 = vcmp.lt.s32.totalorder %v1850_v45, 12 }
  0x14   : > { %vm1889_vm7 = vmpackc.low %vm554_vm6, %vm554_vm6 }
  0x15   : > { %vm1899_vm10 = vmpackc.low %vm559_vm9, %vm559_vm9 }
  0x16   : > { %vm1907_vm13 = vmpackc.low %vm570_vm11, %vm570_vm11 }
  0x17   : > { %vm1915_vm15 = vmpackc.low %vm581_vm14, %vm581_vm14 }
  0x18   : > { %vm1923_vm6 = vmpackc.low %vm592_vm4, %vm592_vm4 }
  0xe5   : > { %v1382_v14 = vpop.f32.mrb[0].mxu0  ;;  %v1393_v15 = vpop.f32.mrb[0].mxu1 }
  0xe6   : > { %v385_v16 = vpop.f32.mrb[1].mxu0  ;;  %v1797_v17 = vmax.f32 %v1382_v14, %v1393_v15  ;;  %v465_v18 = vpop.f32.mrb[1].mxu1 }
  0xe7   : > { %v1799_v19 = vmax.f32 %v385_v16, %v465_v18  ;;  %v756_v18 = vld [vmem:[%s2113_s5 + $0x20] sm:$0xff] }
  0xe9   : > { %v1539_v20 = vpack.i.bf16 %v1797_v17, %v1799_v19  ;;  %v1441_v4 = vpack.c.bf16 %v1797_v17, %v1799_v19 }
  0xeb   : > { %1540 = vrot.lane.b32.xlu0 %v1539_v20, %s1699_s29 }
 0x15d   : > { %v1541_v21 = vpop.permute.xlu0 %1540 }
 0x15e   : > { %v1543_v22 = vunpack.i.h.bf16 %v1541_v21  ;;  %v1542_v23 = vunpack.i.l.bf16 %v1541_v21 }
 0x160   : > { %v497_v24 = vsel %vm494_vm1, %v1542_v23, %v1799_v19  ;;  %v500_v25 = vsel %vm494_vm1, %v1543_v22, %v1797_v17  ;;  %v754_v22 = vld [vmem:[%s2113_s5 + $0x10] sm:$0xff] }
 0x161   : > { %v1544_v26 = vpack.i.bf16 %v500_v25, %v497_v24  ;;  %v476_v24 = vld [vmem:[%s2110_s2] sm:$0xff]  ;;  %v479_v25 = vld [vmem:[%s2110_s2 + $0x18] sm:$0xff] }
 0x163   : > { %1545 = vrot.lane.b32.xlu0 %v1544_v26, %s1699_s29  ;;  %v478_v26 = vld [vmem:[%s2110_s2 + $0x10] sm:$0xff] }
 0x1d5   : > { %v1546_v28 = vpop.permute.xlu0 %1545 }
 0x1d6   : > { %v1548_v29 = vunpack.i.h.bf16 %v1546_v28  ;;  %v1547_v30 = vunpack.i.l.bf16 %v1546_v28  ;;  %v480_v28 = vld [vmem:[%s2110_s2 + $0x20] sm:$0xff] }
 0x1d8   : > { %v506_v31 = vsel %vm494_vm1, %v1548_v29, %v1797_v17  ;;  %v505_v32 = vsel %vm494_vm1, %v1547_v30, %v1799_v19  ;;  %v483_v29 = vld [vmem:[%s2110_s2 + $0x38] sm:$0xff]  ;;  %v482_v30 = vld [vmem:[%s2110_s2 + $0x30] sm:$0xff] }
 0x1d9   : > { %v1559_v33 = vpack.i.bf16 %v506_v31, %v505_v32 }
 0x1db   : > { %1560 = vrot.lane.b32.xlu0 %v1559_v33, %s1701_s30  ;;  %1550 = vrot.lane.b32.xlu1 %v1559_v33, %s1702_s9 }
 0x1df   : > { %1570 = vrot.lane.b32.xlu0 %v1559_v33, %s1703_s10  ;;  %1555 = vrot.lane.b32.xlu1 %v1559_v33, %s1704_s11 }
 0x1e3   : > { %1580 = vrot.lane.b32.xlu0 %v1559_v33, %s1705_s12  ;;  %1565 = vrot.lane.b32.xlu1 %v1559_v33, %s1706_s13 }
 0x1e7   : > { %1575 = vrot.lane.b32.xlu1 %v1559_v33, %s1707_s14  ;;  %702 = vperm.xlu0 %1589, %v484_v35  }
 0x1eb   : > { %1585 = vrot.lane.b32.xlu1 %v1559_v33, %s1708_s15  ;;  %731 = vperm.xlu0 %1589, %v489_v38  }
 0x1ef   : > { %707 = vperm.xlu1 %1590, %v485_v36   ;;  %717 = vperm.xlu0 %1589, %v487_v40  }
 0x1f3   : > { %726 = vperm.xlu1 %1590, %v488_v39   ;;  %741 = vperm.xlu0 %1589, %v491_v42  }
 0x1f7   : > { %712 = vperm.xlu1 %1590, %v486_v41  }
 0x1fb   : > { %736 = vperm.xlu1 %1590, %v490_v43  }
 0x24d   : > { %v1551_v46 = vpop.permute.xlu1 %1550  ;;  %v1561_v51 = vpop.permute.xlu0 %1560 }
 0x24e   : > { %v1553_v47 = vunpack.i.h.bf16 %v1551_v46  ;;  %v1552_v48 = vunpack.i.l.bf16 %v1551_v46  ;;  %v1563_v56 = vunpack.i.h.bf16 %v1561_v51  ;;  %v1562_v57 = vunpack.i.l.bf16 %v1561_v51 }
 0x250   : > { %v1425_v50 = vpack.c.bf16 %v1553_v47, %v1552_v48  ;;  %v1433_v61 = vpack.c.bf16 %v1563_v56, %v1562_v57 }
 0x251   : > { %v1556_v52 = vpop.permute.xlu1 %1555  ;;  %v1571_v2 = vpop.permute.xlu0 %1570 }
 0x252   : > { %v1558_v53 = vunpack.i.h.bf16 %v1556_v52  ;;  %v1557_v54 = vunpack.i.l.bf16 %v1556_v52  ;;  %1427 = vmatpush1.bf16.msk.msra.mxu0 %vm1856_vm8, %v1425_v50  ;;  %v1573_v5 = vunpack.i.h.bf16 %v1571_v2  ;;  %v1572_v6 = vunpack.i.l.bf16 %v1571_v2 }
 0x253   : > { %1428 = vmatprep.subr.bf16.mxu0 %v1700_v27 }
 0x254   : > { %v1429_v58 = vpack.c.bf16 %v1558_v53, %v1557_v54  ;;  %v1445_v9 = vpack.c.bf16 %v1573_v5, %v1572_v6 }
 0x255   : > { %v1566_v59 = vpop.permute.xlu1 %1565  ;;  %v1581_v12 = vpop.permute.xlu0 %1580 }
 0x256   : > { %1431 = vmatpush1.bf16.msk.msra.mxu0 %vm1865_vm12, %v1429_v58  ;;  %v1568_v62 = vunpack.i.h.bf16 %v1566_v59  ;;  %v1567_v63 = vunpack.i.l.bf16 %v1566_v59  ;;  %v1583_v14 = vunpack.i.h.bf16 %v1581_v12  ;;  %v1582_v15 = vunpack.i.l.bf16 %v1581_v12 }
 0x257   : > { %1432 = vmatprep.subr.bf16.mxu0 %v1700_v27 }
 0x258   : > { %v1437_v1 = vpack.c.bf16 %v1568_v62, %v1567_v63  ;;  %v1453_v19 = vpack.c.bf16 %v1583_v14, %v1582_v15 }
 0x259   : > { %v1576_v7 = vpop.permute.xlu1 %1575 }
 0x25a   : > { %1435 = vmatpush1.bf16.msk.msra.mxu0 %vm1874_vm3, %v1433_v61  ;;  %v1578_v10 = vunpack.i.h.bf16 %v1576_v7  ;;  %v1577_v11 = vunpack.i.l.bf16 %v1576_v7 }
 0x25b   : > { %1436 = vmatprep.subr.bf16.mxu0 %v1700_v27 }
 0x25c   : > { %v1449_v16 = vpack.c.bf16 %v1578_v10, %v1577_v11 }
 0x25d   : > { %v1586_v17 = vpop.permute.xlu1 %1585 }
 0x25e   : > { %1439 = vmatpush1.bf16.msk.msra.mxu0 %vm1881_vm5, %v1437_v1  ;;  %v1588_v20 = vunpack.i.h.bf16 %v1586_v17  ;;  %v1587_v21 = vunpack.i.l.bf16 %v1586_v17 }
 0x25f   : > { %1440 = vmatprep.subr.bf16.mxu0 %v1700_v27 }
 0x260   : > { %v1457_v23 = vpack.c.bf16 %v1588_v20, %v1587_v21 }
 0x262   : > { %1443 = vmatpush1.bf16.msk.msra.mxu0 %vm1889_vm7, %v1441_v4 }
 0x263   : > { %1444 = vmatprep.subr.bf16.mxu0 %v1700_v27 }
 0x266   : > { %1447 = vmatpush1.bf16.msk.msra.mxu0 %vm1899_vm10, %v1445_v9  ;;  %v703_v32 = vpop.permute.xlu0 %702 }
 0x267   : > { %1448 = vmatprep.subr.bf16.mxu0 %v1700_v27 }
 0x26a   : > { %1451 = vmatpush1.bf16.msk.msra.mxu0 %vm1907_vm13, %v1449_v16  ;;  %v732_v37 = vpop.permute.xlu0 %731 }
 0x26b   : > { %1452 = vmatprep.subr.bf16.mxu0 %v1700_v27 }
 0x26e   : > { %1455 = vmatpush1.bf16.msk.msra.mxu0 %vm1915_vm15, %v1453_v19  ;;  %v708_v31 = vpop.permute.xlu1 %707  ;;  %v718_v44 = vpop.permute.xlu0 %717 }
 0x26f   : > { %1456 = vmatprep.subr.bf16.mxu0 %v1700_v27  ;;  %v481_v27 = vld [vmem:[%s2110_s2 + $0x28] sm:$0xff] }
 0x272   : > { %1459 = vmatpush1.bf16.msk.msra.mxu0 %vm1923_vm6, %v1457_v23  ;;  %v727_v33 = vpop.permute.xlu1 %726  ;;  %v742_v59 = vpop.permute.xlu0 %741 }
 0x275   : > { %680 = vmatmul.mubr.f32.vlgmr.msra.gmra.mrb[2].mxu0 %v476_v24 }
 0x276   : > { %1261 = vmatprep.mubr.msk.f32.mxu0 %vm602_vm2, %v479_v25  ;;  %v713_v42 = vpop.permute.xlu1 %712 }
 0x279   : > { %685 = vmatmul.mubr.f32.gmra.mrb[4].mxu0 %v478_v26 }
 0x27a   : > { %1262 = vmatprep.mubr.msk.f32.mxu0 %vm602_vm2, %v481_v27  ;;  %v737_v53 = vpop.permute.xlu1 %736 }
 0x27d   : > { %690 = vmatmul.mubr.f32.gmra.mrb[6].mxu0 %v480_v28 }
 0x27e   : > { %1263 = vmatprep.mubr.msk.f32.mxu0 %vm602_vm2, %v483_v29 }
 0x281   : > { %695 = vmatmul.mubr.f32.gmra.mrb[8].mxu0 %v482_v30 }
 0x348   : > { %v681_v34 = vpop.f32.mrb[2].mxu0 }
 0x349   : > { %v720_v35 = vmul.f32 %v703_v32, %v681_v34  ;;  %v683_v36 = vpop.f32.mrb[3].mxu0  ;;  %v764_v32 = vld [vmem:[%s2114_s6] sm:$0xff] }
 0x34a   : > { %v768_v34 = vld [vmem:[%s2115_s7] sm:$0xff]  ;;  %v770_v36 = vld [vmem:[%s2115_s7 + $0x10] sm:$0xff] }
 0x34b   : > { %v744_v39 = vadd.f32 %v727_v33, %v720_v35  ;;  %v766_v33 = vld [vmem:[%s2114_s6 + $0x10] sm:$0xff]  ;;  %v765_v35 = vld [vmem:[%s2114_s6 + $0x8] sm:$0xff] }
 0x34c   : > { %v686_v38 = vpop.f32.mrb[4].mxu0 }
 0x34d   : > { %v721_v40 = vmul.f32 %v708_v31, %v686_v38  ;;  %v688_v41 = vpop.f32.mrb[5].mxu0  ;;  %v748_v46 = vmax.f32 %v744_v39, 0.0  ;;  %v753_v31 = vld [vmem:[%s2113_s5 + $0x8] sm:$0xff]  ;;  %v771_v39 = vld [vmem:[%s2115_s7 + $0x18] sm:$0xff] }
 0x34e   : > { %1008 = vmatprep.mubr.f32.mxu1 %v753_v31  ;;  %v769_v38 = vld [vmem:[%s2115_s7 + $0x8] sm:$0xff] }
 0x34f   : > { %v745_v43 = vadd.f32 %v732_v37, %v721_v40  ;;  %v767_v37 = vld [vmem:[%s2114_s6 + $0x18] sm:$0xff] }
 0x350   : > { %v691_v45 = vpop.f32.mrb[6].mxu0 }
 0x351   : > { %v749_v47 = vmax.f32 %v745_v43, 0.0  ;;  %v722_v48 = vmul.f32 %v713_v42, %v691_v45  ;;  %v693_v50 = vpop.f32.mrb[7].mxu0 }
 0x353   : > { %v1591_v51 = vpack.i.bf16 %v749_v47, %v748_v46  ;;  %v1460_v52 = vpack.c.bf16 %v749_v47, %v748_v46  ;;  %v746_v56 = vadd.f32 %v737_v53, %v722_v48 }
 0x354   : > { %v696_v54 = vpop.f32.mrb[8].mxu0 }
 0x355   : > { %v723_v57 = vmul.f32 %v718_v44, %v696_v54  ;;  %1592 = vrot.lane.b32.xlu1 %v1591_v51, %s1699_s29  ;;  %v698_v58 = vpop.f32.mrb[9].mxu0  ;;  %1462 = vmatprep.subr.msk.bf16.mxu1 %vm1889_vm7, %v1460_v52  ;;  %v1956_v62 = vmax.f32 %v746_v56, 0.0 }
 0x357   : > { %v747_v61 = vadd.f32 %v742_v59, %v723_v57 }
 0x359   : > { %v1958_v63 = vmax.f32 %v747_v61, 0.0 }
 0x35b   : > { %v1596_v1 = vpack.i.bf16 %v1958_v63, %v1956_v62  ;;  %v1466_v45 = vpack.c.bf16 %v1958_v63, %v1956_v62 }
 0x35d   : > { %1597 = vrot.lane.b32.xlu0 %v1596_v1, %s1699_s29 }
 0x3c7   : > { %v1593_v2 = vpop.permute.xlu1 %1592 }
 0x3c8   : > { %v1595_v4 = vunpack.i.h.bf16 %v1593_v2  ;;  %v1594_v5 = vunpack.i.l.bf16 %v1593_v2 }
 0x3ca   : > { %v774_v6 = vsel %vm494_vm1, %v1594_v5, %v748_v46  ;;  %v777_v7 = vsel %vm494_vm1, %v1595_v4, %v749_v47 }
 0x3cb   : > { %v1601_v9 = vpack.i.bf16 %v777_v7, %v774_v6 }
 0x3cd   : > { %1602 = vrot.lane.b32.xlu1 %v1601_v9, %s1699_s29 }
 0x3cf   : > { %v1598_v10 = vpop.permute.xlu0 %1597 }
 0x3d0   : > { %v1600_v11 = vunpack.i.h.bf16 %v1598_v10  ;;  %v1599_v12 = vunpack.i.l.bf16 %v1598_v10 }
 0x3d2   : > { %v780_v14 = vsel %vm494_vm1, %v1599_v12, %v1956_v62  ;;  %v783_v15 = vsel %vm494_vm1, %v1600_v11, %v1958_v63 }
 0x3d3   : > { %v1606_v16 = vpack.i.bf16 %v783_v15, %v780_v14 }
 0x3d5   : > { %1607 = vrot.lane.b32.xlu0 %v1606_v16, %s1699_s29  ;;  %s1307_s29 = sshll.u32 %s2136_s28, 5 }
 0x43f   : > { %v1603_v17 = vpop.permute.xlu1 %1602 }
 0x440   : > { %v1605_v19 = vunpack.i.h.bf16 %v1603_v17  ;;  %v1604_v20 = vunpack.i.l.bf16 %v1603_v17 }
 0x442   : > { %v793_v21 = vsel %vm494_vm1, %v1605_v19, %v749_v47  ;;  %v792_v23 = vsel %vm494_vm1, %v1604_v20, %v748_v46 }
 0x443   : > { %v1611_v24 = vpack.i.bf16 %v793_v21, %v792_v23 }
 0x445   : > { %1612 = vrot.lane.b32.xlu1 %v1611_v24, %s1702_s9 }
 0x447   : > { %v1608_v25 = vpop.permute.xlu0 %1607 }
 0x448   : > { %v1610_v26 = vunpack.i.h.bf16 %v1608_v25  ;;  %v1609_v27 = vunpack.i.l.bf16 %v1608_v25 }
 0x449   : > { %1617 = vrot.lane.b32.xlu1 %v1611_v24, %s1703_s10 }
 0x44a   : > { %v795_v28 = vsel %vm494_vm1, %v1610_v26, %v1958_v63  ;;  %v794_v29 = vsel %vm494_vm1, %v1609_v27, %v1956_v62 }
 0x44b   : > { %v1631_v30 = vpack.i.bf16 %v795_v28, %v794_v29 }
 0x44d   : > { %1632 = vrot.lane.b32.xlu1 %v1631_v30, %s1703_s10  ;;  %1622 = vrot.lane.b32.xlu0 %v1631_v30, %s1702_s9 }
 0x451   : > { %1637 = vrot.lane.b32.xlu1 %v1611_v24, %s1707_s14  ;;  %1627 = vrot.lane.b32.xlu0 %v1611_v24, %s1704_s11 }
 0x455   : > { %1652 = vrot.lane.b32.xlu1 %v1631_v30, %s1707_s14  ;;  %1642 = vrot.lane.b32.xlu0 %v1631_v30, %s1704_s11  ;;  %s305_s14 = scalar_lea.vmem %s2116_s8, %s1307_s29 }
 0x459   : > { %1657 = vrot.lane.b32.xlu1 %v1611_v24, %s1705_s12  ;;  %1647 = vrot.lane.b32.xlu0 %v1611_v24, %s1701_s30 }
 0x45d   : > { %1672 = vrot.lane.b32.xlu1 %v1631_v30, %s1705_s12  ;;  %1662 = vrot.lane.b32.xlu0 %v1631_v30, %s1701_s30 }
 0x461   : > { %1682 = vrot.lane.b32.xlu1 %v1611_v24, %s1708_s15  ;;  %1667 = vrot.lane.b32.xlu0 %v1611_v24, %s1706_s13 }
 0x465   : > { %1116 = vperm.xlu1 %1590, %v764_v32   ;;  %1677 = vrot.lane.b32.xlu0 %v1631_v30, %s1706_s13 }
 0x469   : > { %1126 = vperm.xlu1 %1590, %v766_v33   ;;  %1687 = vrot.lane.b32.xlu0 %v1631_v30, %s1708_s15 }
 0x46d   : > { %1140 = vperm.xlu1 %1590, %v768_v34   ;;  %1121 = vperm.xlu0 %1589, %v765_v35  }
 0x471   : > { %1150 = vperm.xlu1 %1590, %v770_v36   ;;  %1131 = vperm.xlu0 %1589, %v767_v37  }
 0x475   : > { %1145 = vperm.xlu0 %1589, %v769_v38  }
 0x479   : > { %1155 = vperm.xlu0 %1589, %v771_v39  }
 0x4b7   : > { %v1613_v40 = vpop.permute.xlu1 %1612 }
 0x4b8   : > { %v1615_v41 = vunpack.i.h.bf16 %v1613_v40  ;;  %v1614_v42 = vunpack.i.l.bf16 %v1613_v40 }
 0x4ba   : > { %v1463_v43 = vpack.c.bf16 %v1615_v41, %v1614_v42 }
 0x4bb   : > { %v1618_v44 = vpop.permute.xlu1 %1617 }
 0x4bc   : > { %1465 = vmatpush3.bf16.msk.msra.mxu1 %vm1856_vm8, %v1463_v43  ;;  %v1620_v46 = vunpack.i.h.bf16 %v1618_v44  ;;  %v1619_v47 = vunpack.i.l.bf16 %v1618_v44  ;;  %v752_v43 = vld [vmem:[%s2113_s5] sm:$0xff] }
 0x4bd   : > { %1468 = vmatprep.subr.msk.bf16.mxu1 %vm1889_vm7, %v1466_v45  ;;  %v759_v45 = vld [vmem:[%s2113_s5 + $0x38] sm:$0xff] }
 0x4be   : > { %v1472_v54 = vpack.c.bf16 %v1620_v46, %v1619_v47  ;;  %v758_v46 = vld [vmem:[%s2113_s5 + $0x30] sm:$0xff] }
 0x4bf   : > { %v1633_v48 = vpop.permute.xlu1 %1632  ;;  %v1623_v50 = vpop.permute.xlu0 %1622  ;;  %v762_v47 = vld [vmem:[%s2113_s5 + $0x50] sm:$0xff] }
 0x4c0   : > { %v1625_v51 = vunpack.i.h.bf16 %v1623_v50  ;;  %v1624_v52 = vunpack.i.l.bf16 %v1623_v50  ;;  %v1635_v56 = vunpack.i.h.bf16 %v1633_v48  ;;  %v1634_v57 = vunpack.i.l.bf16 %v1633_v48  ;;  %v761_v48 = vld [vmem:[%s2113_s5 + $0x48] sm:$0xff] }
 0x4c1   : > { %v757_v50 = vld [vmem:[%s2113_s5 + $0x28] sm:$0xff] }
 0x4c2   : > { %v1469_v53 = vpack.c.bf16 %v1625_v51, %v1624_v52  ;;  %v1478_v63 = vpack.c.bf16 %v1635_v56, %v1634_v57  ;;  %v760_v51 = vld [vmem:[%s2113_s5 + $0x40] sm:$0xff]  ;;  %v763_v52 = vld [vmem:[%s2113_s5 + $0x58] sm:$0xff] }
 0x4c3   : > { %v1638_v58 = vpop.permute.xlu1 %1637  ;;  %v1628_v59 = vpop.permute.xlu0 %1627 }
 0x4c4   : > { %v1630_v61 = vunpack.i.h.bf16 %v1628_v59  ;;  %v1629_v62 = vunpack.i.l.bf16 %v1628_v59  ;;  %1471 = vmatpush3.bf16.msk.msra.mxu1 %vm1856_vm8, %v1469_v53  ;;  %v1640_v1 = vunpack.i.h.bf16 %v1638_v58  ;;  %v1639_v2 = vunpack.i.l.bf16 %v1638_v58 }
 0x4c5   : > { %1474 = vmatprep.subr.msk.bf16.mxu1 %vm1899_vm10, %v1472_v54 }
 0x4c6   : > { %v1475_v3 = vpack.c.bf16 %v1630_v61, %v1629_v62  ;;  %v1484_v49 = vpack.c.bf16 %v1640_v1, %v1639_v2 }
 0x4c7   : > { %v1653_v4 = vpop.permute.xlu1 %1652  ;;  %v1643_v5 = vpop.permute.xlu0 %1642 }
 0x4c8   : > { %v1645_v6 = vunpack.i.h.bf16 %v1643_v5  ;;  %v1644_v7 = vunpack.i.l.bf16 %v1643_v5  ;;  %1477 = vmatpush3.bf16.msk.msra.mxu1 %vm1865_vm12, %v1475_v3  ;;  %v1655_v10 = vunpack.i.h.bf16 %v1653_v4  ;;  %v1654_v11 = vunpack.i.l.bf16 %v1653_v4 }
 0x4c9   : > { %1480 = vmatprep.subr.msk.bf16.mxu1 %vm1899_vm10, %v1478_v63 }
 0x4ca   : > { %v1481_v9 = vpack.c.bf16 %v1645_v6, %v1644_v7  ;;  %v1490_v19 = vpack.c.bf16 %v1655_v10, %v1654_v11 }
 0x4cb   : > { %v1658_v12 = vpop.permute.xlu1 %1657  ;;  %v1648_v14 = vpop.permute.xlu0 %1647 }
 0x4cc   : > { %v1650_v15 = vunpack.i.h.bf16 %v1648_v14  ;;  %v1649_v16 = vunpack.i.l.bf16 %v1648_v14  ;;  %1483 = vmatpush3.bf16.msk.msra.mxu1 %vm1865_vm12, %v1481_v9  ;;  %v1660_v20 = vunpack.i.h.bf16 %v1658_v12  ;;  %v1659_v21 = vunpack.i.l.bf16 %v1658_v12 }
 0x4cd   : > { %1486 = vmatprep.subr.msk.bf16.mxu1 %vm1907_vm13, %v1484_v49 }
 0x4ce   : > { %v1487_v17 = vpack.c.bf16 %v1650_v15, %v1649_v16  ;;  %v1496_v55 = vpack.c.bf16 %v1660_v20, %v1659_v21 }
 0x4cf   : > { %v1673_v8 = vpop.permute.xlu1 %1672  ;;  %v1663_v23 = vpop.permute.xlu0 %1662 }
 0x4d0   : > { %v1665_v24 = vunpack.i.h.bf16 %v1663_v23  ;;  %v1664_v25 = vunpack.i.l.bf16 %v1663_v23  ;;  %1489 = vmatpush3.bf16.msk.msra.mxu1 %vm1874_vm3, %v1487_v17  ;;  %v1675_v27 = vunpack.i.h.bf16 %v1673_v8  ;;  %v1674_v28 = vunpack.i.l.bf16 %v1673_v8 }
 0x4d1   : > { %1492 = vmatprep.subr.msk.bf16.mxu1 %vm1907_vm13, %v1490_v19 }
 0x4d2   : > { %v1493_v26 = vpack.c.bf16 %v1665_v24, %v1664_v25  ;;  %v1502_v34 = vpack.c.bf16 %v1675_v27, %v1674_v28 }
 0x4d3   : > { %v1668_v29 = vpop.permute.xlu0 %1667  ;;  %v1683_v30 = vpop.permute.xlu1 %1682 }
 0x4d4   : > { %v1670_v31 = vunpack.i.h.bf16 %v1668_v29  ;;  %v1669_v32 = vunpack.i.l.bf16 %v1668_v29  ;;  %1495 = vmatpush3.bf16.msk.msra.mxu1 %vm1874_vm3, %v1493_v26  ;;  %v1685_v35 = vunpack.i.h.bf16 %v1683_v30  ;;  %v1684_v36 = vunpack.i.l.bf16 %v1683_v30 }
 0x4d5   : > { %1498 = vmatprep.subr.msk.bf16.mxu1 %vm1915_vm15, %v1496_v55 }
 0x4d6   : > { %v1499_v33 = vpack.c.bf16 %v1670_v31, %v1669_v32  ;;  %v1508_v40 = vpack.c.bf16 %v1685_v35, %v1684_v36 }
 0x4d7   : > { %v1678_v13 = vpop.permute.xlu0 %1677 }
 0x4d8   : > { %v1680_v37 = vunpack.i.h.bf16 %v1678_v13  ;;  %v1679_v38 = vunpack.i.l.bf16 %v1678_v13  ;;  %1501 = vmatpush3.bf16.msk.msra.mxu1 %vm1881_vm5, %v1499_v33 }
 0x4d9   : > { %1504 = vmatprep.subr.msk.bf16.mxu1 %vm1915_vm15, %v1502_v34 }
 0x4da   : > { %v1505_v39 = vpack.c.bf16 %v1680_v37, %v1679_v38 }
 0x4db   : > { %v1688_v60 = vpop.permute.xlu0 %1687 }
 0x4dc   : > { %v1690_v41 = vunpack.i.h.bf16 %v1688_v60  ;;  %v1689_v42 = vunpack.i.l.bf16 %v1688_v60  ;;  %1507 = vmatpush3.bf16.msk.msra.mxu1 %vm1881_vm5, %v1505_v39 }
 0x4dd   : > { %1510 = vmatprep.subr.msk.bf16.mxu1 %vm1923_vm6, %v1508_v40 }
 0x4de   : > { %v1514_v44 = vpack.c.bf16 %v1690_v41, %v1689_v42 }
 0x4df   : > { %1009 = vmatmul.mubr.f32.vlgmr.msra.gmra.mrb[2].mxu1 %v752_v43 }
 0x4e0   : > { %1513 = vmatpush3.bf16.msk.msra.mxu1 %vm1923_vm6, %v1508_v40  ;;  %1013 = vmatprep.mubr.f32.mxu1 %v756_v18 }
 0x4e1   : > { %1516 = vmatprep.subr.msk.bf16.mxu1 %vm1923_vm6, %v1514_v44 }
 0x4e3   : > { %1014 = vmatmul.mubr.f32.gmra.mrb[4].mxu1 %v755_v0 }
 0x4e4   : > { %1519 = vmatpush3.bf16.msk.msra.mxu1 %vm1923_vm6, %v1514_v44  ;;  %1018 = vmatprep.mubr.f32.mxu1 %v759_v45  ;;  %v1117_v62 = vpop.permute.xlu1 %1116 }
 0x4e7   : > { %1019 = vmatmul.mubr.f32.gmra.mrb[6].mxu1 %v758_v46 }
 0x4e8   : > { %1023 = vmatprep.mubr.f32.mxu1 %v762_v47  ;;  %v1127_v5 = vpop.permute.xlu1 %1126 }
 0x4eb   : > { %1024 = vmatmul.mubr.f32.gmra.mrb[8].mxu1 %v761_v48 }
 0x4ec   : > { %1402 = vmatprep.mubr.msk.f32.mxu1 %vm312_vm0, %v754_v22  ;;  %v1122_v59 = vpop.permute.xlu0 %1121  ;;  %v1141_v14 = vpop.permute.xlu1 %1140 }
 0x4ef   : > { %1403 = vmatmul.mubr.msk.f32.vlgmr.msra.gmra.mrb[10].mxu1 %vm312_vm0, %v757_v50 }
 0x4f0   : > { %1405 = vmatprep.mubr.msk.f32.mxu1 %vm312_vm0, %v760_v51  ;;  %v1132_v2 = vpop.permute.xlu0 %1131  ;;  %v1151_v28 = vpop.permute.xlu1 %1150 }
 0x4f3   : > { %1406 = vmatmul.mubr.msk.f32.gmra.mrb[12].mxu1 %vm312_vm0, %v763_v52 }
 0x4f4   : > { %v1146_v11 = vpop.permute.xlu0 %1145 }
 0x4f8   : > { %v1156_v26 = vpop.permute.xlu0 %1155 }
 0x5b2   : > { %v1352_v53 = vpop.f32.mrb[2].mxu1 }
 0x5b3   : > { %v1353_v54 = vpop.f32.mrb[3].mxu1 }
 0x5b4   : > { %v1354_v56 = vadd.f32 %v1353_v54, %v1352_v53 }
 0x5b6   : > { %v1355_v57 = vpop.f32.mrb[4].mxu1 }
 0x5b7   : > { %v1356_v58 = vpop.f32.mrb[5].mxu1 }
 0x5b8   : > { %v1357_v61 = vadd.f32 %v1356_v58, %v1355_v57 }
 0x5ba   : > { %v1358_v3 = vpop.f32.mrb[6].mxu1 }
 0x5bb   : > { %v1359_v63 = vpop.f32.mrb[7].mxu1 }
 0x5bc   : > { %v1360_v1 = vadd.f32 %v1359_v63, %v1358_v3 }
 0x5be   : > { %v1361_v4 = vpop.f32.mrb[8].mxu1 }
 0x5bf   : > { %v1362_v6 = vpop.f32.mrb[9].mxu1 }
 0x5c0   : > { %v1363_v7 = vadd.f32 %v1362_v6, %v1361_v4 }
 0x5c2   : > { %v1404_v9 = vpop.f32.mrb[10].mxu1 }
 0x5c3   : > { %v1101_v49 = vadd.f32 %v1404_v9, %v1357_v61  ;;  %v1095_v10 = vpop.f32.mrb[11].mxu1 }
 0x5c4   : > { %v1096_v12 = vadd.f32 %v1354_v56, %v1095_v10 }
 0x5c5   : > { %v1135_v15 = vmul.f32 %v1122_v59, %v1101_v49 }
 0x5c6   : > { %v1134_v16 = vmul.f32 %v1117_v62, %v1096_v12  ;;  %v1407_v17 = vpop.f32.mrb[12].mxu1 }
 0x5c7   : > { %v1159_v19 = vadd.f32 %v1146_v11, %v1135_v15  ;;  %v1111_v20 = vadd.f32 %v1407_v17, %v1363_v7  ;;  %v1105_v21 = vpop.f32.mrb[13].mxu1 }
 0x5c8   : > { %v1158_v8 = vadd.f32 %v1141_v14, %v1134_v16  ;;  %v1106_v23 = vadd.f32 %v1360_v1, %v1105_v21 }
 0x5c9   : > { %v1163_v24 = vmax.f32 %v1159_v19, 0.0  ;;  %v1137_v25 = vmul.f32 %v1132_v2, %v1111_v20 }
 0x5ca   : > { %v1162_v55 = vmax.f32 %v1158_v8, 0.0  ;;  %v1136_v27 = vmul.f32 %v1127_v5, %v1106_v23 }
 0x5cb   : > { %1167 = vst.msk [vmem:[%s305_s14 + $0x8] sm:$0xff] %vm602_vm2, %v1163_v24  ;;  %v1161_v29 = vadd.f32 %v1156_v26, %v1137_v25 }
 0x5cc   : > { %1166 = vst.msk [vmem:[%s305_s14] sm:$0xff] %vm602_vm2, %v1162_v55  ;;  %v1160_v30 = vadd.f32 %v1151_v28, %v1136_v27 }
 0x5cd   : > { %v1165_v31 = vmax.f32 %v1161_v29, 0.0 }
 0x5ce   : > { %v1164_v32 = vmax.f32 %v1160_v30, 0.0 }
 0x5cf   : > { %1169 = vst.msk [vmem:[%s305_s14 + $0x18] sm:$0xff] %vm602_vm2, %v1165_v31 }
 0x5d0   : > { %1168 = vst.msk [vmem:[%s305_s14 + $0x10] sm:$0xff] %vm602_vm2, %v1164_v32 }
 0x5d1 PF: > { %s18_s27 = sadd.s32 1, %s1697_s27  }
 0x5d2   : > { %p15_p4 = scmp.ge.s32.totalorder %s18_s27, 4  }
 0x5d4   :  { %17 = sbr.rel (!%p15_p4) target bundleno = 1 (0x1), region = 83 }

// kernel: _lambda_.9
= control target key start
LH: loop header
LB: loop body
LE: loop exit
PB: predicated region body
PF: predicated region fallthrough
CT: control target
= control target key end

     0   :  { %s1616_s25 = smov 0   ;;  %s1913_s0 = inlined_call_operand.vmem [shape: f32[2,8,64], index: 0, kind: input, shape index: {}]   ;;  %s1914_s1 = inlined_call_operand.vmem [shape: f32[2,16,32], index: 1, kind: input, shape index: {}]   ;;  %s1915_s2 = inlined_call_operand.vmem [shape: f32[32,64], index: 2, kind: input, shape index: {}]   ;;  %s1916_s3 = inlined_call_operand.vmem [shape: f32[8,72], index: 3, kind: input, shape index: {}]   ;;  %s1917_s4 = inlined_call_operand.vmem [shape: f32[8,144], index: 4, kind: input, shape index: {}]   ;;  %s1918_s5 = inlined_call_operand.vmem [shape: f32[8,1], index: 5, kind: input, shape index: {}]   ;;  %s1919_s6 = inlined_call_operand.vmem [shape: f32[8,1], index: 6, kind: input, shape index: {}]   ;;  %s1920_s7 = inlined_call_operand.vmem [shape: f32[8,72], index: 7, kind: input, shape index: {}]   ;;  %s1921_s8 = inlined_call_operand.vmem [shape: f32[8,1], index: 8, kind: input, shape index: {}]   ;;  %s1922_s9 = inlined_call_operand.vmem [shape: f32[8,1], index: 9, kind: input, shape index: {}]   ;;  %s1923_s10 = inlined_call_operand.vmem [shape: f32[8,72], index: 10, kind: input, shape index: {}]   ;;  %s1924_s11 = inlined_call_operand.vmem [shape: f32[8,1], index: 11, kind: input, shape index: {}]   ;;  %s1925_s12 = inlined_call_operand.vmem [shape: f32[8,1], index: 12, kind: input, shape index: {}]   ;;  %s1926_s13 = inlined_call_operand.vmem [shape: f32[2,8,64], index: 13, kind: output, shape index: {}]  }
   0x1 LB: > { %s1185_s26 = sadd.s32 4294967295, %s1531_s25   ;;  %p1189_p0 = scmp.ge.s32.totalorder %s1531_s25, 1  ;;  %s1531_s25 = sphi %s1616_s25, %s23_s25  }
   0x2   : > { %p396_p1 = scmp.lt.s32.totalorder %s1531_s25, 3 }
   0x4   : > { %p397_p2 = pnand %p1189_p0, %p396_p1 }
   0x5   : > { %v458_v0 = vld [vmem:[%s1915_s2] sm:$0xff] (!%p397_p2)  ;;  %v459_v1 = vld [vmem:[%s1915_s2 + $0x8] sm:$0xff] (!%p397_p2)  ;;  %v460_v2 = vld [vmem:[%s1915_s2 + $0x10] sm:$0xff] (!%p397_p2)  ;;  %p443_p3 = scmp.lt.s32.totalorder (!%p397_p2), %s1185_s26, 1  ;;  %vm462_vm0 = vcmask (!%p397_p2), 261120   ;;  %s1533_s28 = smov (!%p397_p2), 64   ;;  %v546_v35 = vlaneseq (!%p397_p2) }
   0x6   : > { %400 = sbr.rel (%p397_p2) target bundleno = 2030 (0x7ee), region = 72  ;;  %v1358_v3 = vpack.c.bf16 (!%p397_p2), %v459_v1, %v458_v0  ;;  %v461_v4 = vld [vmem:[%s1915_s2 + $0x18] sm:$0xff] (!%p397_p2)  ;;  %vm548_vm1 = vcmask (!%p397_p2), 1048064   ;;  %v1534_v21 = vmov (!%p397_p2), 0.0|0.0   ;;  %s1535_s29 = smov (!%p397_p2), 68   ;;  %v617_v30 = vld [vmem:[%s1917_s4 + $0x8] sm:$0xff] (!%p397_p2) }
   0x7   : > { %v1362_v5 = vpack.c.bf16 (!%p397_p2), %v461_v4, %v460_v2  ;;  %1366 = vmatprep.subr.bf16.mxu1 (!%p397_p2), %v1534_v21  ;;  %s1536_s30 = smov (!%p397_p2), 67   ;;  %s1537_s14 = smov (!%p397_p2), 66   ;;  %vm698_vm2 = vcmask (!%p397_p2), 130048   ;;  %v846_v31 = vld [vmem:[%s1918_s5] sm:$0xff] (!%p397_p2)  ;;  %vm1543_vm3 = vmmov (!%p397_p2), 0   ;;  %v1544_v33 = vmov (!%p397_p2), 0.0  }
   0x8   : > { %1359 = vmatprep.subr.bf16.mxu0 (!%p397_p2), %v1358_v3  ;;  %s1538_s15 = smov (!%p397_p2), 65   ;;  %s1539_s16 = smov (!%p397_p2), 127   ;;  %1214 = vmatprep.mubr.msk.f32.mxu1 (!%p397_p2), %vm698_vm2, %v617_v30  ;;  %v853_v32 = vld [vmem:[%s1919_s6] sm:$0xff] (!%p397_p2)  ;;  %v1545_v34 = vmov (!%p397_p2), 0   ;;  %v1704_v36 = vand.u32 (!%p397_p2), 127, %v546_v35 }
   0x9   : > { %1361 = vmatpush3.bf16.msra.mxu0 (!%p397_p2), %v1358_v3  ;;  %s1540_s17 = smov (!%p397_p2), 126   ;;  %s1542_s19 = smov (!%p397_p2), 124   ;;  %1523 = vset.pattern.permute.xlu0 (!%p397_p2), %v1545_v34 }
   0xa   : > { %1363 = vmatprep.subr.bf16.mxu0 (!%p397_p2), %v1362_v5  ;;  %1524 = vset.pattern.permute.xlu1 (!%p397_p2), %v1545_v34  ;;  %vm555_vm4 = vcmp.ge.s32.totalorder (!%p397_p2), %v1704_v36, 4  ;;  %vm556_vm5 = vcmp.lt.s32.totalorder (!%p397_p2), %v1704_v36, 68  ;;  %vm563_vm7 = vcmp.ge.s32.totalorder (!%p397_p2), %v1704_v36, 3  ;;  %vm564_vm8 = vcmp.lt.s32.totalorder (!%p397_p2), %v1704_v36, 67 }
   0xb   : > { %vm1708_vm6 = vmand (!%p397_p2), %vm555_vm4, %vm556_vm5  ;;  %vm570_vm11 = vcmp.ge.s32.totalorder (!%p397_p2), %v1704_v36, 2  ;;  %vm571_vm12 = vcmp.lt.s32.totalorder (!%p397_p2), %v1704_v36, 66  ;;  %vm577_vm15 = vcmp.ge.s32.totalorder (!%p397_p2), %v1704_v36, 1 }
   0xc   : > { %vm1368_vm9 = vmpackc.low (!%p397_p2), %vm1708_vm6, %vm1708_vm6 }
   0xd   : > { %s1946_s26 = smov (!%p443_p3, %s1185_s26), 1  ;;  %1365 = vmatpush3.bf16.msra.mxu0 %v1362_v5  ;;  %vm1717_vm10 = vmand %vm563_vm7, %vm564_vm8  ;;  %vm585_vm7 = vcmp.lt.s32.totalorder %v1704_v36, 64 }
   0xe   : > { %s1247_s18 = sshll.u32 %s1946_s26, 4  ;;  %s1927_s22 = sshll.u32 %s1946_s26, 3  ;;  %1418 = vmatprep.subr.bf16.mxu0 %v1534_v21  ;;  %vm1372_vm13 = vmpackc.low %vm1717_vm10, %vm1717_vm10 }
   0xf   : > { %s451_s21 = scalar_lea.vmem %s1914_s1, %s1247_s18  ;;  %s446_s27 = scalar_lea.vmem %s1913_s0, %s1927_s22  ;;  %vm1727_vm14 = vmand %vm570_vm11, %vm571_vm12  ;;  %vm596_vm12 = vcmp.lt.s32.totalorder %v1704_v36, 62 }
  0x10   : > { %v456_v6 = vld [vmem:[%s451_s21] sm:$0xff]  ;;  %v457_v7 = vld [vmem:[%s451_s21 + $0x8] sm:$0xff]  ;;  %s1541_s18 = smov 125   ;;  %vm1376_vm2 = vmpackc.low %vm1727_vm14, %vm1727_vm14 }
  0x11   : > { %1292 = vmatprep.mubr.msk.f32.mxu0 %vm462_vm0, %v456_v6  ;;  %v1657_v12 = vld [vmem:[%s446_s27] sm:$0xff]  ;;  %vm1384_vm8 = vmpackc.low %vm585_vm7, %vm585_vm7 }
  0x12   : > { %1293 = vmatmul.mubr.msk.f32.vlgmr.msra.gmra.mrb[0].mxu0 %vm462_vm0, %v457_v7  ;;  %vm578_vm0 = vcmp.lt.s32.totalorder %v1704_v36, 65 }
  0x13   : > { %1334 = vmatprep.mubr.msk.f32.mxu0 %vm1543_vm3, %v1544_v33  ;;  %vm1737_vm4 = vmand %vm577_vm15, %vm578_vm0  ;;  %vm603_vm15 = vcmp.lt.s32.totalorder %v1704_v36, 61 }
  0x14   : > { %vm1380_vm5 = vmpackc.low %vm1737_vm4, %vm1737_vm4 }
  0x15   : > { %vm1396_vm0 = vmpackc.low %vm603_vm15, %vm603_vm15 }
  0xe5   : > { %v1643_v8 = vpop.f32.mrb[0].mxu0 }
  0xe6   : > { %v1645_v9 = vpop.f32.mrb[1].mxu0 }
  0xe7   : > { %v1383_v10 = vpack.c.bf16 %v1643_v8, %v1645_v9  ;;  %v1473_v11 = vpack.i.bf16 %v1643_v8, %v1645_v9 }
  0xe9   : > { %1474 = vrot.lane.b32.xlu0 %v1473_v11, %s1533_s28 }
  0xed   : > { %549 = vrot.lane.b32.xlu0 %v1657_v12, %s1533_s28 }
 0x15b   : > { %v1475_v13 = vpop.permute.xlu0 %1474 }
 0x15c   : > { %v1477_v14 = vunpack.i.h.bf16 %v1475_v13  ;;  %v1476_v15 = vunpack.i.l.bf16 %v1475_v13 }
 0x15e   : > { %v620_v16 = vsel %vm548_vm1, %v1476_v15, %v1645_v9  ;;  %v623_v17 = vsel %vm548_vm1, %v1477_v14, %v1643_v8  ;;  %v616_v14 = vld [vmem:[%s1917_s4] sm:$0xff] }
 0x15f   : > { %v1478_v18 = vpack.i.bf16 %v623_v17, %v620_v16  ;;  %v550_v19 = vpop.permute.xlu0 %549  ;;  %v990_v16 = vld [vmem:[%s1923_s10] sm:$0xff] }
 0x160   : > { %v551_v20 = vsel %vm548_vm1, %v550_v19, %v1657_v12 }
 0x161   : > { %1479 = vrot.lane.b32.xlu1 %v1478_v18, %s1533_s28 }
 0x165   : > { %552 = vrot.lane.b32.xlu1 %v551_v20, %s1533_s28 }
 0x1d3   : > { %v1480_v22 = vpop.permute.xlu1 %1479 }
 0x1d4   : > { %v1482_v23 = vunpack.i.h.bf16 %v1480_v22  ;;  %v1481_v24 = vunpack.i.l.bf16 %v1480_v22 }
 0x1d6   : > { %v629_v25 = vsel %vm548_vm1, %v1482_v23, %v1643_v8  ;;  %v628_v26 = vsel %vm548_vm1, %v1481_v24, %v1645_v9 }
 0x1d7   : > { %v1483_v27 = vpack.i.bf16 %v629_v25, %v628_v26  ;;  %v553_v28 = vpop.permute.xlu1 %552 }
 0x1d8   : > { %v554_v29 = vsel %vm548_vm1, %v553_v28, %v1657_v12 }
 0x1d9   : > { %1484 = vrot.lane.b32.xlu0 %v1483_v27, %s1535_s29  ;;  %1489 = vrot.lane.b32.xlu1 %v1483_v27, %s1536_s30 }
 0x1dd   : > { %1494 = vrot.lane.b32.xlu0 %v1483_v27, %s1537_s14  ;;  %1499 = vrot.lane.b32.xlu1 %v1483_v27, %s1538_s15 }
 0x1e1   : > { %1504 = vrot.lane.b32.xlu0 %v1483_v27, %s1539_s16  ;;  %1509 = vrot.lane.b32.xlu1 %v1483_v27, %s1540_s17 }
 0x1e5   : > { %1514 = vrot.lane.b32.xlu0 %v1483_v27, %s1541_s18  ;;  %1519 = vrot.lane.b32.xlu1 %v1483_v27, %s1542_s19 }
 0x1e9   : > { %566 = vrot.lane.b32.xlu1 %v554_v29, %s1536_s30  ;;  %559 = vrot.lane.b32.xlu0 %v554_v29, %s1535_s29 }
 0x1ed   : > { %580 = vrot.lane.b32.xlu1 %v554_v29, %s1538_s15  ;;  %573 = vrot.lane.b32.xlu0 %v554_v29, %s1537_s14 }
 0x1f1   : > { %598 = vrot.lane.b32.xlu1 %v554_v29, %s1540_s17  ;;  %591 = vrot.lane.b32.xlu0 %v554_v29, %s1539_s16 }
 0x1f5   : > { %612 = vrot.lane.b32.xlu1 %v554_v29, %s1542_s19  ;;  %605 = vrot.lane.b32.xlu0 %v554_v29, %s1541_s18 }
 0x1f9   : > { %849 = vperm.xlu0 %1523, %v846_v31   ;;  %856 = vperm.xlu1 %1524, %v853_v32  }
 0x24b   : > { %v1490_v38 = vpop.permute.xlu1 %1489  ;;  %v1485_v39 = vpop.permute.xlu0 %1484 }
 0x24c   : > { %v1487_v40 = vunpack.i.h.bf16 %v1485_v39  ;;  %v1486_v41 = vunpack.i.l.bf16 %v1485_v39  ;;  %v1492_v42 = vunpack.i.h.bf16 %v1490_v38  ;;  %v1491_v43 = vunpack.i.l.bf16 %v1490_v38 }
 0x24e   : > { %v1367_v44 = vpack.c.bf16 %v1487_v40, %v1486_v41  ;;  %v1371_v47 = vpack.c.bf16 %v1492_v42, %v1491_v43  ;;  %v863_v41 = vld [vmem:[%s1922_s9] sm:$0xff] }
 0x24f   : > { %v1495_v46 = vpop.permute.xlu0 %1494  ;;  %v1500_v51 = vpop.permute.xlu1 %1499  ;;  %v862_v42 = vld [vmem:[%s1921_s8] sm:$0xff] }
 0x250   : > { %1369 = vmatpush1.bf16.msk.msra.mxu1 %vm1368_vm9, %v1367_v44  ;;  %v1497_v48 = vunpack.i.h.bf16 %v1495_v46  ;;  %v1496_v49 = vunpack.i.l.bf16 %v1495_v46  ;;  %v1502_v52 = vunpack.i.h.bf16 %v1500_v51  ;;  %v1501_v53 = vunpack.i.l.bf16 %v1500_v51 }
 0x251   : > { %1370 = vmatprep.subr.bf16.mxu1 %v1534_v21  ;;  %vm589_vm9 = vcmp.lt.s32.totalorder %v1704_v36, 63 }
 0x252   : > { %v1375_v54 = vpack.c.bf16 %v1497_v48, %v1496_v49  ;;  %v1379_v56 = vpack.c.bf16 %v1502_v52, %v1501_v53  ;;  %vm1388_vm11 = vmpackc.low %vm589_vm9, %vm589_vm9 }
 0x253   : > { %v1505_v57 = vpop.permute.xlu0 %1504  ;;  %v1510_v60 = vpop.permute.xlu1 %1509 }
 0x254   : > { %1373 = vmatpush1.bf16.msk.msra.mxu1 %vm1372_vm13, %v1371_v47  ;;  %v1507_v58 = vunpack.i.h.bf16 %v1505_v57  ;;  %v1506_v59 = vunpack.i.l.bf16 %v1505_v57  ;;  %v1512_v61 = vunpack.i.h.bf16 %v1510_v60  ;;  %v1511_v62 = vunpack.i.l.bf16 %v1510_v60  ;;  %vm1392_vm13 = vmpackc.low %vm596_vm12, %vm596_vm12 }
 0x255   : > { %1374 = vmatprep.subr.bf16.mxu1 %v1534_v21 }
 0x256   : > { %v1387_v63 = vpack.c.bf16 %v1507_v58, %v1506_v59  ;;  %v1391_v1 = vpack.c.bf16 %v1512_v61, %v1511_v62 }
 0x257   : > { %v1515_v0 = vpop.permute.xlu0 %1514  ;;  %v1520_v4 = vpop.permute.xlu1 %1519 }
 0x258   : > { %1377 = vmatpush1.bf16.msk.msra.mxu1 %vm1376_vm2, %v1375_v54  ;;  %v1517_v2 = vunpack.i.h.bf16 %v1515_v0  ;;  %v1516_v3 = vunpack.i.l.bf16 %v1515_v0  ;;  %v1522_v6 = vunpack.i.h.bf16 %v1520_v4  ;;  %v1521_v7 = vunpack.i.l.bf16 %v1520_v4  ;;  %v861_v54 = vld [vmem:[%s1920_s7] sm:$0xff] }
 0x259   : > { %1378 = vmatprep.subr.bf16.mxu1 %v1534_v21  ;;  %vm610_vm2 = vcmp.lt.s32.totalorder %v1704_v36, 60  ;;  %v991_v4 = vld [vmem:[%s1924_s11] sm:$0xff] }
 0x25a   : > { %v1395_v8 = vpack.c.bf16 %v1517_v2, %v1516_v3  ;;  %v1399_v9 = vpack.c.bf16 %v1522_v6, %v1521_v7  ;;  %v992_v3 = vld [vmem:[%s1925_s12] sm:$0xff] }
 0x25b   : > { %v560_v5 = vpop.permute.xlu0 %559 }
 0x25c   : > { %1381 = vmatpush1.bf16.msk.msra.mxu1 %vm1380_vm5, %v1379_v56  ;;  %vm1400_vm5 = vmpackc.low %vm610_vm2, %vm610_vm2 }
 0x25d   : > { %1382 = vmatprep.subr.bf16.mxu1 %v1534_v21 }
 0x25f   : > { %v574_v11 = vpop.permute.xlu0 %573 }
 0x260   : > { %1385 = vmatpush1.bf16.msk.msra.mxu1 %vm1384_vm8, %v1383_v10  ;;  %v567_v10 = vpop.permute.xlu1 %566  ;;  %vm1780_vm8 = vmpackc.low %vm1717_vm10, %vm1708_vm6 }
 0x261   : > { %1386 = vmatprep.subr.bf16.mxu1 %v1534_v21  ;;  %v1403_v13 = vpack.c.bf16 %v567_v10, %v560_v5  ;;  %vm1804_vm6 = vmpackc.low %vm589_vm9, %vm585_vm7 }
 0x262   : > { %vm1816_vm10 = vmpackc.low %vm603_vm15, %vm596_vm12 }
 0x263   : > { %v592_v18 = vpop.permute.xlu0 %591 }
 0x264   : > { %1389 = vmatpush1.bf16.msk.msra.mxu1 %vm1388_vm11, %v1387_v63  ;;  %vm1793_vm11 = vmpackc.low %vm1737_vm4, %vm1727_vm14  ;;  %v581_v17 = vpop.permute.xlu1 %580  ;;  %v1411_v22 = vpack.c.bf16 %v592_v18, %v1657_v12  ;;  %v544_v12 = vld [vmem:[%s1916_s3] sm:$0xff]  ;;  %vm772_vm14 = vcmask 588800  }
 0x265   : > { %1390 = vmatprep.subr.bf16.mxu1 %v1534_v21  ;;  %v1407_v19 = vpack.c.bf16 %v581_v17, %v574_v11 }
 0x267   : > { %v606_v23 = vpop.permute.xlu0 %605 }
 0x268   : > { %1393 = vmatpush1.bf16.msk.msra.mxu1 %vm1392_vm13, %v1391_v1  ;;  %v599_v25 = vpop.permute.xlu1 %598 }
 0x269   : > { %1394 = vmatprep.subr.bf16.mxu1 %v1534_v21  ;;  %v1415_v26 = vpack.c.bf16 %v606_v23, %v599_v25 }
 0x26c   : > { %1397 = vmatpush1.bf16.msk.msra.mxu1 %vm1396_vm0, %v1395_v8  ;;  %v613_v27 = vpop.permute.xlu1 %612 }
 0x26d   : > { %1398 = vmatprep.subr.bf16.mxu1 %v1534_v21 }
 0x270   : > { %1401 = vmatpush1.bf16.msk.msra.mxu1 %vm1400_vm5, %v1399_v9 }
 0x271   : > { %1402 = vmatprep.subr.bf16.mxu1 %v1534_v21 }
 0x273   : > { %767 = vmatmul.mubr.f32.vlgmr.msra.gmra.mrb[0].mxu1 %v616_v14 }
 0x274   : > { %1405 = vmatpush3.bf16.msk.msra.mxu1 %vm1780_vm8, %v1403_v13  ;;  %1313 = vmatprep.mubr.msk.f32.mxu1 %vm1543_vm3, %v1544_v33 }
 0x275   : > { %1406 = vmatprep.subr.bf16.mxu1 %v1534_v21 }
 0x278   : > { %1409 = vmatpush3.bf16.msk.msra.mxu1 %vm1793_vm11, %v1407_v19  ;;  %v850_v28 = vpop.permute.xlu0 %849  ;;  %v857_v30 = vpop.permute.xlu1 %856 }
 0x279   : > { %1410 = vmatprep.subr.bf16.mxu1 %v1534_v21 }
 0x27c   : > { %1413 = vmatpush3.bf16.msk.msra.mxu1 %vm1804_vm6, %v1411_v22 }
 0x27d   : > { %1414 = vmatprep.subr.bf16.mxu1 %v1534_v21 }
 0x280   : > { %1417 = vmatpush3.bf16.msk.msra.mxu1 %vm1816_vm10, %v1415_v26 }
 0x281   : > { %1311 = vmatprep.subr.mxu1 %v1544_v33 }
 0x284   : > { %1312 = vmatpush3.msk.msra.mxu1 %vm610_vm2, %v613_v27 }
 0x285   : > { %1314 = vmatmul.mubr.msk.f32.vlgmr.msra.gmra.mrb[0].mxu1 %vm772_vm14, %v544_v12 }
 0x358   : > { %v842_v29 = vpop.f32.mrb[0].mxu1 }
 0x359   : > { %v852_v31 = vmul.f32 %v850_v28, %v842_v29  ;;  %v1315_v32 = vpop.f32.mrb[1].mxu1 }
 0x35b   : > { %v859_v34 = vadd.f32 %v857_v30, %v852_v31 }
 0x35d   : > { %v860_v35 = vmax.f32 %v859_v34, 0.0 }
 0x35f   : > { %864 = vrot.lane.b32.xlu1 %v860_v35, %s1533_s28 }
 0x3d1   : > { %v865_v37 = vpop.permute.xlu1 %864 }
 0x3d2   : > { %v866_v38 = vsel %vm548_vm1, %v865_v37, %v860_v35 }
 0x3d3   : > { %867 = vrot.lane.b32.xlu0 %v866_v38, %s1533_s28 }
 0x445   : > { %v868_v39 = vpop.permute.xlu0 %867 }
 0x446   : > { %v869_v40 = vsel %vm548_vm1, %v868_v39, %v860_v35 }
 0x447   : > { %875 = vrot.lane.b32.xlu0 %v869_v40, %s1536_s30  ;;  %871 = vrot.lane.b32.xlu1 %v869_v40, %s1535_s29 }
 0x44b   : > { %883 = vrot.lane.b32.xlu0 %v869_v40, %s1538_s15  ;;  %879 = vrot.lane.b32.xlu1 %v869_v40, %s1537_s14 }
 0x44f   : > { %892 = vrot.lane.b32.xlu0 %v869_v40, %s1540_s17  ;;  %888 = vrot.lane.b32.xlu1 %v869_v40, %s1539_s16 }
 0x453   : > { %900 = vrot.lane.b32.xlu0 %v869_v40, %s1542_s19  ;;  %896 = vrot.lane.b32.xlu1 %v869_v40, %s1541_s18 }
 0x457   : > { %985 = vperm.xlu0 %1523, %v863_v41   ;;  %979 = vperm.xlu1 %1524, %v862_v42  }
 0x4b9   : > { %v876_v43 = vpop.permute.xlu0 %875  ;;  %v872_v44 = vpop.permute.xlu1 %871 }
 0x4ba   : > { %v1419_v45 = vpack.c.bf16 %v876_v43, %v872_v44 }
 0x4bc   : > { %1421 = vmatpush3.bf16.msk.msra.mxu0 %vm1780_vm8, %v1419_v45 }
 0x4bd   : > { %v884_v46 = vpop.permute.xlu0 %883  ;;  %v880_v47 = vpop.permute.xlu1 %879  ;;  %1422 = vmatprep.subr.bf16.mxu0 %v1534_v21 }
 0x4be   : > { %v1423_v48 = vpack.c.bf16 %v884_v46, %v880_v47 }
 0x4c0   : > { %1425 = vmatpush3.bf16.msk.msra.mxu0 %vm1793_vm11, %v1423_v48 }
 0x4c1   : > { %v889_v49 = vpop.permute.xlu1 %888  ;;  %1426 = vmatprep.subr.bf16.mxu0 %v1534_v21  ;;  %v893_v51 = vpop.permute.xlu0 %892 }
 0x4c2   : > { %v1427_v50 = vpack.c.bf16 %v889_v49, %v860_v35 }
 0x4c4   : > { %1429 = vmatpush3.bf16.msk.msra.mxu0 %vm1804_vm6, %v1427_v50 }
 0x4c5   : > { %v897_v52 = vpop.permute.xlu1 %896  ;;  %1430 = vmatprep.subr.bf16.mxu0 %v1534_v21  ;;  %v901_v55 = vpop.permute.xlu0 %900 }
 0x4c6   : > { %v1431_v53 = vpack.c.bf16 %v897_v52, %v893_v51 }
 0x4c8   : > { %1433 = vmatpush3.bf16.msk.msra.mxu0 %vm1816_vm10, %v1431_v53 }
 0x4c9   : > { %1332 = vmatprep.subr.mxu0 %v1544_v33 }
 0x4cc   : > { %1333 = vmatpush3.msk.msra.mxu0 %vm610_vm2, %v901_v55 }
 0x4cd   : > { %1335 = vmatmul.mubr.msk.f32.vlgmr.msra.gmra.mrb[2].mxu0 %vm772_vm14, %v861_v54  ;;  %1434 = vmatprep.subr.bf16.mxu0 %v1534_v21 }
 0x4ce   : > { %1355 = vmatprep.mubr.msk.f32.mxu0 %vm1543_vm3, %v1544_v33 }
 0x4d6   : > { %v980_v56 = vpop.permute.xlu1 %979  ;;  %v986_v60 = vpop.permute.xlu0 %985 }
 0x5a0   : > { %v973_v57 = vpop.f32.mrb[2].mxu0 }
 0x5a1   : > { %v982_v58 = vmul.f32 %v980_v56, %v973_v57  ;;  %v1336_v59 = vpop.f32.mrb[3].mxu0 }
 0x5a3   : > { %v988_v61 = vadd.f32 %v986_v60, %v982_v58 }
 0x5a5   : > { %v989_v62 = vmax.f32 %v988_v61, 0.0 }
 0x5a7   : > { %993 = vrot.lane.b32.xlu1 %v989_v62, %s1533_s28 }
 0x619   : > { %v994_v63 = vpop.permute.xlu1 %993 }
 0x61a   : > { %v995_v0 = vsel %vm548_vm1, %v994_v63, %v989_v62 }
 0x61b   : > { %996 = vrot.lane.b32.xlu0 %v995_v0, %s1533_s28 }
 0x68d   : > { %v997_v1 = vpop.permute.xlu0 %996 }
 0x68e   : > { %v998_v2 = vsel %vm548_vm1, %v997_v1, %v989_v62  ;;  %vm1118_vm1 = vcmask 523264  }
 0x68f   : > { %1004 = vrot.lane.b32.xlu0 %v998_v2, %s1536_s30  ;;  %1000 = vrot.lane.b32.xlu1 %v998_v2, %s1535_s29 }
 0x693   : > { %1012 = vrot.lane.b32.xlu0 %v998_v2, %s1538_s15  ;;  %1008 = vrot.lane.b32.xlu1 %v998_v2, %s1537_s14  ;;  %s1944_s15 = sshll.u32 %s1946_s26, 3 }
 0x697   : > { %1021 = vrot.lane.b32.xlu0 %v998_v2, %s1540_s17  ;;  %1017 = vrot.lane.b32.xlu1 %v998_v2, %s1539_s16 }
 0x69b   : > { %1029 = vrot.lane.b32.xlu0 %v998_v2, %s1542_s19  ;;  %1025 = vrot.lane.b32.xlu1 %v998_v2, %s1541_s18  ;;  %s455_s18 = scalar_lea.vmem %s1926_s13, %s1944_s15 }
 0x69f   : > { %1114 = vperm.xlu0 %1523, %v992_v3   ;;  %1108 = vperm.xlu1 %1524, %v991_v4  }
 0x701   : > { %v1005_v5 = vpop.permute.xlu0 %1004  ;;  %v1001_v6 = vpop.permute.xlu1 %1000 }
 0x702   : > { %v1435_v7 = vpack.c.bf16 %v1005_v5, %v1001_v6 }
 0x704   : > { %1437 = vmatpush3.bf16.msk.msra.mxu0 %vm1780_vm8, %v1435_v7 }
 0x705   : > { %v1013_v8 = vpop.permute.xlu0 %1012  ;;  %v1009_v9 = vpop.permute.xlu1 %1008  ;;  %1438 = vmatprep.subr.bf16.mxu0 %v1534_v21 }
 0x706   : > { %v1439_v10 = vpack.c.bf16 %v1013_v8, %v1009_v9 }
 0x708   : > { %1441 = vmatpush3.bf16.msk.msra.mxu0 %vm1793_vm11, %v1439_v10 }
 0x709   : > { %v1018_v11 = vpop.permute.xlu1 %1017  ;;  %1442 = vmatprep.subr.bf16.mxu0 %v1534_v21  ;;  %v1022_v14 = vpop.permute.xlu0 %1021 }
 0x70a   : > { %v1443_v13 = vpack.c.bf16 %v1018_v11, %v989_v62 }
 0x70c   : > { %1445 = vmatpush3.bf16.msk.msra.mxu0 %vm1804_vm6, %v1443_v13 }
 0x70d   : > { %v1026_v17 = vpop.permute.xlu1 %1025  ;;  %1446 = vmatprep.subr.bf16.mxu0 %v1534_v21  ;;  %v1030_v18 = vpop.permute.xlu0 %1029 }
 0x70e   : > { %v1447_v15 = vpack.c.bf16 %v1026_v17, %v1022_v14 }
 0x710   : > { %1449 = vmatpush3.bf16.msk.msra.mxu0 %vm1816_vm10, %v1447_v15 }
 0x711   : > { %1353 = vmatprep.subr.mxu0 %v1544_v33 }
 0x714   : > { %1354 = vmatpush3.msk.msra.mxu0 %vm610_vm2, %v1030_v18 }
 0x715   : > { %1356 = vmatmul.mubr.msk.f32.vlgmr.msra.gmra.mrb[4].mxu0 %vm772_vm14, %v990_v16 }
 0x71e   : > { %v1109_v19 = vpop.permute.xlu1 %1108  ;;  %v1115_v33 = vpop.permute.xlu0 %1114 }
 0x7e8   : > { %v1102_v20 = vpop.f32.mrb[4].mxu0 }
 0x7e9   : > { %v1111_v22 = vmul.f32 %v1109_v19, %v1102_v20  ;;  %v1357_v21 = vpop.f32.mrb[5].mxu0 }
 0x7eb   : > { %v1117_v23 = vadd.f32 %v1115_v33, %v1111_v22 }
 0x7ed   : > { %1119 = vst.msk [vmem:[%s455_s18] sm:$0xff] %vm1118_vm1, %v1117_v23 }
 0x7ee PF: > { %s23_s25 = sadd.s32 1, %s1531_s25  }
 0x7ef   : > { %p20_p4 = scmp.ge.s32.totalorder %s23_s25, 4  }
 0x7f1   :  { %22 = sbr.rel (!%p20_p4) target bundleno = 1 (0x1), region = 105 }

// kernel: _lambda_.8
= control target key start
LH: loop header
LB: loop body
LE: loop exit
PB: predicated region body
PF: predicated region fallthrough
CT: control target
= control target key end

     0   :  { %s1898_s13 = smov 0   ;;  %s2272_s0 = inlined_call_operand.vmem [shape: f32[2,16,32], index: 0, kind: input, shape index: {}]   ;;  %s2273_s1 = inlined_call_operand.vmem [shape: f32[2,32,16], index: 1, kind: input, shape index: {}]   ;;  %s2274_s2 = inlined_call_operand.vmem [shape: f32[16,32], index: 2, kind: input, shape index: {}]   ;;  %s2275_s3 = inlined_call_operand.vmem [shape: f32[16,144], index: 3, kind: input, shape index: {}]   ;;  %s2276_s4 = inlined_call_operand.vmem [shape: f32[16,288], index: 4, kind: input, shape index: {}]   ;;  %s2277_s5 = inlined_call_operand.vmem [shape: f32[16,1], index: 5, kind: input, shape index: {}]   ;;  %s2278_s6 = inlined_call_operand.vmem [shape: f32[16,1], index: 6, kind: input, shape index: {}]   ;;  %s2279_s7 = inlined_call_operand.vmem [shape: f32[16,144], index: 7, kind: input, shape index: {}]   ;;  %s2280_s8 = inlined_call_operand.vmem [shape: f32[16,1], index: 8, kind: input, shape index: {}]   ;;  %s2281_s9 = inlined_call_operand.vmem [shape: f32[16,1], index: 9, kind: input, shape index: {}]   ;;  %s2282_s10 = inlined_call_operand.vmem [shape: f32[2,16,32], index: 10, kind: output, shape index: {}]  }
   0x1 LB: > { %s1298_s14 = sadd.s32 4294967295, %s1830_s13   ;;  %p1302_p0 = scmp.ge.s32.totalorder %s1830_s13, 1  ;;  %s1830_s13 = sphi %s1898_s13, %s20_s13  }
   0x2   : > { %p322_p1 = scmp.lt.s32.totalorder %s1830_s13, 3 }
   0x4   : > { %p323_p2 = pnand %p1302_p0, %p322_p1 }
   0x5   : > { %v384_v0 = vld [vmem:[%s2274_s2] sm:$0xff] (!%p323_p2)  ;;  %v385_v1 = vld [vmem:[%s2274_s2 + $0x8] sm:$0xff] (!%p323_p2)  ;;  %p365_p3 = scmp.lt.s32.totalorder (!%p323_p2), %s1298_s14, 1  ;;  %vm386_vm0 = vcmask (!%p323_p2), 130048   ;;  %s1832_s27 = smov (!%p323_p2), 32   ;;  %v490_v10 = vlaneseq (!%p323_p2)  ;;  %vm492_vm3 = vcmask (!%p323_p2), 1047808  }
   0x6   : > { %326 = sbr.rel (%p323_p2) target bundleno = 1487 (0x5cf), region = 60  ;;  %v1467_v2 = vpack.c.bf16 (!%p323_p2), %v385_v1, %v384_v0  ;;  %s1833_s28 = smov (!%p323_p2), 124   ;;  %v602_v57 = vld [vmem:[%s2276_s4 + $0x10] sm:$0xff] (!%p323_p2)  ;;  %vm766_vm4 = vcmask (!%p323_p2), 261120   ;;  %v601_v58 = vld [vmem:[%s2276_s4 + $0x8] sm:$0xff] (!%p323_p2)  ;;  %v1004_v59 = vld [vmem:[%s2277_s5] sm:$0xff] (!%p323_p2) }
   0x7   : > { %v1935_v11 = vand.u32 (!%p323_p2), 127, %v490_v10  ;;  %s1834_s29 = smov (!%p323_p2), 100   ;;  %s1835_s12 = smov (!%p323_p2), 127   ;;  %837 = vmatprep.mubr.f32.mxu1 (!%p323_p2), %v601_v58  ;;  %v1841_v60 = vmov (!%p323_p2), 0   ;;  %v1005_v61 = vld [vmem:[%s2277_s5 + $0x8] sm:$0xff] (!%p323_p2)  ;;  %v1018_v63 = vld [vmem:[%s2278_s6] sm:$0xff] (!%p323_p2) }
   0x8   : > { %1468 = vmatprep.subr.bf16.mxu0 (!%p323_p2), %v1467_v2  ;;  %s1836_s15 = smov (!%p323_p2), 99   ;;  %s1837_s16 = smov (!%p323_p2), 98   ;;  %1772 = vset.pattern.permute.xlu0 (!%p323_p2), %v1841_v60  ;;  %v1019_v62 = vld [vmem:[%s2278_s6 + $0x8] sm:$0xff] (!%p323_p2) }
   0x9   : > { %1470 = vmatpush3.bf16.msra.mxu0 (!%p323_p2), %v1467_v2  ;;  %vm552_vm1 = vcmp.lt.s32.totalorder (!%p323_p2), %v1935_v11, 32  ;;  %s1838_s17 = smov (!%p323_p2), 126   ;;  %s1839_s18 = smov (!%p323_p2), 97   ;;  %1773 = vset.pattern.permute.xlu1 (!%p323_p2), %v1841_v60  ;;  %vm590_vm5 = vcmp.lt.s32.totalorder (!%p323_p2), %v1935_v11, 28  ;;  %vm505_vm6 = vcmp.ge.s32.totalorder (!%p323_p2), %v1935_v11, 4  ;;  %vm506_vm7 = vcmp.lt.s32.totalorder (!%p323_p2), %v1935_v11, 36 }
   0xa   : > { %vm1938_vm2 = vmpackc.low (!%p323_p2), %vm552_vm1, %vm552_vm1  ;;  %vm557_vm11 = vcmp.lt.s32.totalorder (!%p323_p2), %v1935_v11, 31  ;;  %vm518_vm12 = vcmp.ge.s32.totalorder (!%p323_p2), %v1935_v11, 3  ;;  %vm519_vm13 = vcmp.lt.s32.totalorder (!%p323_p2), %v1935_v11, 35  ;;  %vm529_vm1 = vcmp.ge.s32.totalorder (!%p323_p2), %v1935_v11, 2  ;;  %v1034_v60 = vld [vmem:[%s2279_s7] sm:$0xff] (!%p323_p2) }
   0xb   : > { %vm2023_vm8 = vmpackc.low (!%p323_p2), %vm590_vm5, %vm590_vm5  ;;  %vm530_vm5 = vcmp.lt.s32.totalorder (!%p323_p2), %v1935_v11, 34 }
   0xc   : > { %vm507_vm9 = vmand (!%p323_p2), %vm505_vm6, %vm506_vm7  ;;  %vm568_vm7 = vcmp.lt.s32.totalorder (!%p323_p2), %v1935_v11, 30 }
   0xd   : > { %s2304_s14 = smov (!%p365_p3, %s1298_s14), 1  ;;  %vm2031_vm10 = vmpackc.low %vm507_vm9, %vm507_vm9 }
   0xe   : > { %s1394_s19 = sshll.u32 %s2304_s14, 5  ;;  %s1393_s23 = sshll.u32 %s2304_s14, 4  ;;  %vm2054_vm14 = vmpackc.low %vm557_vm11, %vm557_vm11  ;;  %vm540_vm11 = vcmp.ge.s32.totalorder %v1935_v11, 1 }
   0xf   : > { %s374_s22 = scalar_lea.vmem %s2273_s1, %s1394_s19  ;;  %s369_s26 = scalar_lea.vmem %s2272_s0, %s1393_s23  ;;  %vm520_vm15 = vmand %vm518_vm12, %vm519_vm13  ;;  %vm541_vm12 = vcmp.lt.s32.totalorder %v1935_v11, 33 }
  0x10   : > { %v380_v3 = vld [vmem:[%s374_s22] sm:$0xff]  ;;  %v381_v4 = vld [vmem:[%s374_s22 + $0x8] sm:$0xff]  ;;  %v382_v5 = vld [vmem:[%s374_s22 + $0x10] sm:$0xff]  ;;  %s1840_s19 = smov 125  }
  0x11   : > { %1450 = vmatprep.mubr.msk.f32.mxu0 %vm386_vm0, %v380_v3  ;;  %v383_v6 = vld [vmem:[%s374_s22 + $0x18] sm:$0xff]  ;;  %v1928_v7 = vld [vmem:[%s369_s26] sm:$0xff]  ;;  %v1930_v8 = vld [vmem:[%s369_s26 + $0x8] sm:$0xff]  ;;  %s379_s22 = scalar_lea.vmem %s2282_s10, %s1393_s23 }
  0x12   : > { %1451 = vmatmul.mubr.msk.f32.vlgmr.msra.gmra.mrb[0].mxu0 %vm386_vm0, %v381_v4  ;;  %v1632_v9 = vpack.i.bf16 %v1930_v8, %v1928_v7  ;;  %vm2075_vm6 = vmpackc.low %vm520_vm15, %vm520_vm15 }
  0x13   : > { %1453 = vmatprep.mubr.msk.f32.mxu0 %vm386_vm0, %v382_v5  ;;  %vm2081_vm9 = vmand %vm529_vm1, %vm530_vm5 }
  0x14   : > { %1633 = vrot.lane.b32.xlu1 %v1632_v9, %s1832_s27  ;;  %vm2097_vm13 = vmpackc.low %vm2081_vm9, %vm2081_vm9 }
  0x15   : > { %vm2105_vm15 = vmpackc.low %vm568_vm7, %vm568_vm7  ;;  %vm579_vm7 = vcmp.lt.s32.totalorder %v1935_v11, 29 }
  0x16   : > { %1454 = vmatmul.mubr.msk.f32.gmra.mrb[2].mxu0 %vm386_vm0, %v383_v6  ;;  %vm542_vm1 = vmand %vm540_vm11, %vm541_vm12 }
  0x17   : > { %1464 = vmatprep.mubr.msk.f32.mxu0 %vm766_vm4, %v602_v57  ;;  %vm2122_vm5 = vmpackc.low %vm542_vm1, %vm542_vm1 }
  0x18   : > { %vm2139_vm9 = vmpackc.low %vm579_vm7, %vm579_vm7 }
  0x86   : > { %v1634_v21 = vpop.permute.xlu1 %1633 }
  0x87   : > { %v1636_v22 = vunpack.i.h.bf16 %v1634_v21  ;;  %v1635_v23 = vunpack.i.l.bf16 %v1634_v21 }
  0x89   : > { %v495_v29 = vsel %vm492_vm3, %v1635_v23, %v1928_v7  ;;  %v498_v30 = vsel %vm492_vm3, %v1636_v22, %v1930_v8 }
  0x8a   : > { %v1647_v35 = vpack.i.bf16 %v498_v30, %v495_v29 }
  0xe5   : > { %v1452_v12 = vpop.f32.mrb[0].mxu0 }
  0xe6   : > { %v465_v13 = vpop.f32.mrb[1].mxu0 }
  0xe7   : > { %v1622_v15 = vpack.i.bf16 %v1452_v12, %v465_v13  ;;  %v1471_v16 = vpack.c.bf16 %v1452_v12, %v465_v13 }
  0xe9   : > { %1623 = vrot.lane.b32.xlu0 %v1622_v15, %s1832_s27  ;;  %v1943_v17 = vpop.f32.mrb[2].mxu0  ;;  %1473 = vmatprep.subr.msk.bf16.mxu1 %vm1938_vm2, %v1471_v16 }
  0xea   : > { %v1947_v18 = vpop.f32.mrb[3].mxu0 }
  0xeb   : > { %v1477_v19 = vpack.c.bf16 %v1943_v17, %v1947_v18  ;;  %v1627_v20 = vpack.i.bf16 %v1943_v17, %v1947_v18 }
  0xed   : > { %1628 = vrot.lane.b32.xlu0 %v1627_v20, %s1832_s27 }
 0x15b   : > { %v1624_v24 = vpop.permute.xlu0 %1623 }
 0x15c   : > { %v1626_v25 = vunpack.i.h.bf16 %v1624_v24  ;;  %v1625_v26 = vunpack.i.l.bf16 %v1624_v24 }
 0x15e   : > { %v608_v27 = vsel %vm492_vm3, %v1625_v26, %v465_v13  ;;  %v611_v28 = vsel %vm492_vm3, %v1626_v25, %v1452_v12 }
 0x15f   : > { %v1629_v31 = vpop.permute.xlu0 %1628  ;;  %v1637_v32 = vpack.i.bf16 %v611_v28, %v608_v27 }
 0x160   : > { %v1631_v33 = vunpack.i.h.bf16 %v1629_v31  ;;  %v1630_v34 = vunpack.i.l.bf16 %v1629_v31  ;;  %v605_v31 = vld [vmem:[%s2276_s4 + $0x28] sm:$0xff] }
 0x161   : > { %1638 = vrot.lane.b32.xlu1 %v1637_v32, %s1832_s27 }
 0x162   : > { %v614_v36 = vsel %vm492_vm3, %v1630_v34, %v1947_v18  ;;  %v617_v37 = vsel %vm492_vm3, %v1631_v33, %v1943_v17 }
 0x163   : > { %v1642_v38 = vpack.i.bf16 %v617_v37, %v614_v36  ;;  %v1842_v37 = vmov 0.0|0.0  }
 0x165   : > { %1643 = vrot.lane.b32.xlu0 %v1642_v38, %s1832_s27  ;;  %1648 = vrot.lane.b32.xlu1 %v1647_v35, %s1832_s27 }
 0x1d3   : > { %v1639_v39 = vpop.permute.xlu1 %1638 }
 0x1d4   : > { %v1641_v40 = vunpack.i.h.bf16 %v1639_v39  ;;  %v1640_v41 = vunpack.i.l.bf16 %v1639_v39 }
 0x1d6   : > { %v627_v42 = vsel %vm492_vm3, %v1641_v40, %v1452_v12  ;;  %v626_v43 = vsel %vm492_vm3, %v1640_v41, %v465_v13 }
 0x1d7   : > { %v1644_v44 = vpop.permute.xlu0 %1643  ;;  %v1649_v45 = vpop.permute.xlu1 %1648  ;;  %v1662_v46 = vpack.i.bf16 %v627_v42, %v626_v43  ;;  %v485_v42 = vld [vmem:[%s2275_s3 + $0x8] sm:$0xff] }
 0x1d8   : > { %v1646_v47 = vunpack.i.h.bf16 %v1644_v44  ;;  %v1645_v48 = vunpack.i.l.bf16 %v1644_v44  ;;  %v1651_v49 = vunpack.i.h.bf16 %v1649_v45  ;;  %v1650_v50 = vunpack.i.l.bf16 %v1649_v45 }
 0x1d9   : > { %1663 = vrot.lane.b32.xlu0 %v1662_v46, %s1833_s28 }
 0x1da   : > { %v629_v51 = vsel %vm492_vm3, %v1646_v47, %v1943_v17  ;;  %v628_v52 = vsel %vm492_vm3, %v1645_v48, %v1947_v18  ;;  %v504_v53 = vsel %vm492_vm3, %v1651_v49, %v1930_v8  ;;  %v503_v54 = vsel %vm492_vm3, %v1650_v50, %v1928_v7 }
 0x1db   : > { %v1652_v55 = vpack.i.bf16 %v504_v53, %v503_v54  ;;  %v1677_v56 = vpack.i.bf16 %v629_v51, %v628_v52 }
 0x1dd   : > { %1668 = vrot.lane.b32.xlu0 %v1662_v46, %s1834_s29  ;;  %1653 = vrot.lane.b32.xlu1 %v1652_v55, %s1834_s29 }
 0x1e1   : > { %1673 = vrot.lane.b32.xlu0 %v1662_v46, %s1835_s12  ;;  %1658 = vrot.lane.b32.xlu1 %v1652_v55, %s1836_s15 }
 0x1e5   : > { %1688 = vrot.lane.b32.xlu0 %v1652_v55, %s1837_s16  ;;  %1678 = vrot.lane.b32.xlu1 %v1677_v56, %s1833_s28 }
 0x1e9   : > { %1698 = vrot.lane.b32.xlu0 %v1677_v56, %s1834_s29  ;;  %1683 = vrot.lane.b32.xlu1 %v1662_v46, %s1836_s15 }
 0x1ed   : > { %1703 = vrot.lane.b32.xlu0 %v1662_v46, %s1838_s17  ;;  %1693 = vrot.lane.b32.xlu1 %v1652_v55, %s1839_s18 }
 0x1f1   : > { %1718 = vrot.lane.b32.xlu0 %v1677_v56, %s1836_s15  ;;  %1708 = vrot.lane.b32.xlu1 %v1677_v56, %s1835_s12 }
 0x1f5   : > { %1723 = vrot.lane.b32.xlu0 %v1652_v55, %s1835_s12  ;;  %1713 = vrot.lane.b32.xlu1 %v1662_v46, %s1837_s16 }
 0x1f9   : > { %1733 = vrot.lane.b32.xlu0 %v1677_v56, %s1838_s17  ;;  %1728 = vrot.lane.b32.xlu1 %v1662_v46, %s1840_s19 }
 0x1fd   : > { %1738 = vrot.lane.b32.xlu0 %v1662_v46, %s1839_s18  ;;  %1743 = vrot.lane.b32.xlu1 %v1677_v56, %s1837_s16 }
 0x201   : > { %1753 = vrot.lane.b32.xlu0 %v1677_v56, %s1840_s19  ;;  %1748 = vrot.lane.b32.xlu1 %v1652_v55, %s1838_s17 }
 0x205   : > { %1763 = vrot.lane.b32.xlu0 %v1652_v55, %s1840_s19  ;;  %1758 = vrot.lane.b32.xlu1 %v1677_v56, %s1839_s18 }
 0x209   : > { %1768 = vrot.lane.b32.xlu1 %v1652_v55, %s1833_s28  ;;  %1008 = vperm.xlu0 %1772, %v1004_v59  }
 0x20d   : > { %1013 = vperm.xlu1 %1773, %v1005_v61   ;;  %1027 = vperm.xlu0 %1772, %v1019_v62  }
 0x211   : > { %1022 = vperm.xlu1 %1773, %v1018_v63  }
 0x24b   : > { %v1664_v0 = vpop.permute.xlu0 %1663 }
 0x24c   : > { %v1666_v1 = vunpack.i.h.bf16 %v1664_v0  ;;  %v1665_v2 = vunpack.i.l.bf16 %v1664_v0 }
 0x24e   : > { %v1519_v4 = vpack.c.bf16 %v1666_v1, %v1665_v2 }
 0x24f   : > { %v1669_v5 = vpop.permute.xlu0 %1668  ;;  %v1654_v6 = vpop.permute.xlu1 %1653 }
 0x250   : > { %v1671_v9 = vunpack.i.h.bf16 %v1669_v5  ;;  %v1670_v10 = vunpack.i.l.bf16 %v1669_v5  ;;  %1521 = vmatprep.subr.msk.bf16.mxu0 %vm2023_vm8, %v1519_v4  ;;  %v1656_v25 = vunpack.i.h.bf16 %v1654_v6  ;;  %v1655_v26 = vunpack.i.l.bf16 %v1654_v6 }
 0x251   : > { %1524 = vmatpush3.bf16.msk.msra.mxu0 %vm2023_vm8, %v1519_v4 }
 0x252   : > { %v1474_v13 = vpack.c.bf16 %v1671_v9, %v1670_v10  ;;  %v1532_v38 = vpack.c.bf16 %v1656_v25, %v1655_v26 }
 0x253   : > { %v1674_v15 = vpop.permute.xlu0 %1673  ;;  %v1659_v16 = vpop.permute.xlu1 %1658 }
 0x254   : > { %1476 = vmatpush3.bf16.msk.msra.mxu1 %vm2031_vm10, %v1474_v13  ;;  %v1676_v27 = vunpack.i.h.bf16 %v1674_v15  ;;  %v1675_v28 = vunpack.i.l.bf16 %v1674_v15  ;;  %v1661_v30 = vunpack.i.h.bf16 %v1659_v16  ;;  %v1660_v33 = vunpack.i.l.bf16 %v1659_v16 }
 0x255   : > { %1479 = vmatprep.subr.msk.bf16.mxu1 %vm1938_vm2, %v1477_v19 }
 0x256   : > { %v1483_v39 = vpack.c.bf16 %v1676_v27, %v1675_v28  ;;  %v1536_v44 = vpack.c.bf16 %v1661_v30, %v1660_v33 }
 0x257   : > { %v2042_v20 = vpop.permute.xlu0 %1688  ;;  %v1679_v21 = vpop.permute.xlu1 %1678 }
 0x258   : > { %v1681_v22 = vunpack.i.h.bf16 %v1679_v21  ;;  %v1680_v23 = vunpack.i.l.bf16 %v1679_v21  ;;  %v1691_v47 = vunpack.i.h.bf16 %v2042_v20  ;;  %v1690_v48 = vunpack.i.l.bf16 %v2042_v20 }
 0x259   : > { %v1548_v21 = vpack.c.bf16 %v1930_v8, %v1928_v7 }
 0x25a   : > { %v1525_v24 = vpack.c.bf16 %v1681_v22, %v1680_v23  ;;  %v1540_v61 = vpack.c.bf16 %v1691_v47, %v1690_v48 }
 0x25b   : > { %v1699_v17 = vpop.permute.xlu0 %1698  ;;  %v1684_v18 = vpop.permute.xlu1 %1683 }
 0x25c   : > { %v1701_v29 = vunpack.i.h.bf16 %v1699_v17  ;;  %v1700_v19 = vunpack.i.l.bf16 %v1699_v17  ;;  %1527 = vmatprep.subr.msk.bf16.mxu0 %vm2023_vm8, %v1525_v24  ;;  %v1686_v35 = vunpack.i.h.bf16 %v1684_v18  ;;  %v1685_v36 = vunpack.i.l.bf16 %v1684_v18 }
 0x25d   : > { %1530 = vmatpush3.bf16.msk.msra.mxu0 %vm2023_vm8, %v1525_v24 }
 0x25e   : > { %v1480_v34 = vpack.c.bf16 %v1701_v29, %v1700_v19  ;;  %1531 = vmatprep.subr.bf16.mxu0 %v1842_v37  ;;  %v1486_v45 = vpack.c.bf16 %v1686_v35, %v1685_v36 }
 0x25f   : > { %v1704_v40 = vpop.permute.xlu0 %1703  ;;  %v1694_v41 = vpop.permute.xlu1 %1693 }
 0x260   : > { %1482 = vmatpush3.bf16.msk.msra.mxu1 %vm2031_vm10, %v1480_v34  ;;  %1465 = vmatmul.mubr.msk.f32.vlgmr.msra.gmra.mrb[4].mxu0 %vm766_vm4, %v605_v31  ;;  %v1706_v49 = vunpack.i.h.bf16 %v1704_v40  ;;  %v1705_v50 = vunpack.i.l.bf16 %v1704_v40  ;;  %v1696_v62 = vunpack.i.h.bf16 %v1694_v41  ;;  %v1695_v63 = vunpack.i.l.bf16 %v1694_v41 }
 0x261   : > { %1485 = vmatprep.subr.msk.bf16.mxu1 %vm2054_vm14, %v1483_v39  ;;  %1534 = vmatpush1.bf16.msk.msra.mxu0 %vm2031_vm10, %v1532_v38 }
 0x262   : > { %1535 = vmatprep.subr.bf16.mxu0 %v1842_v37  ;;  %1369 = vmatprep.mubr.msk.f32.mxu0 %vm386_vm0, %v485_v42  ;;  %v1495_v2 = vpack.c.bf16 %v1706_v49, %v1705_v50  ;;  %v1544_v10 = vpack.c.bf16 %v1696_v62, %v1695_v63  ;;  %v486_v62 = vld [vmem:[%s2275_s3 + $0x10] sm:$0xff] }
 0x263   : > { %v1719_v51 = vpop.permute.xlu0 %1718  ;;  %v1709_v52 = vpop.permute.xlu1 %1708 }
 0x264   : > { %v1721_v53 = vunpack.i.h.bf16 %v1719_v51  ;;  %v1720_v54 = vunpack.i.l.bf16 %v1719_v51  ;;  %v1711_v55 = vunpack.i.h.bf16 %v1709_v52  ;;  %v1710_v56 = vunpack.i.l.bf16 %v1709_v52  ;;  %1488 = vmatpush3.bf16.msk.msra.mxu1 %vm2075_vm6, %v1486_v45 }
 0x265   : > { %1538 = vmatpush1.bf16.msk.msra.mxu0 %vm2075_vm6, %v1536_v44 }
 0x266   : > { %v1492_v58 = vpack.c.bf16 %v1721_v53, %v1720_v54  ;;  %v1489_v59 = vpack.c.bf16 %v1711_v55, %v1710_v56  ;;  %1539 = vmatprep.subr.bf16.mxu0 %v1842_v37  ;;  %v600_v54 = vld [vmem:[%s2276_s4] sm:$0xff] }
 0x267   : > { %v1724_v0 = vpop.permute.xlu0 %1723  ;;  %v1714_v1 = vpop.permute.xlu1 %1713  ;;  %v604_v55 = vld [vmem:[%s2276_s4 + $0x20] sm:$0xff] }
 0x268   : > { %v1716_v4 = vunpack.i.h.bf16 %v1714_v1  ;;  %v1715_v5 = vunpack.i.l.bf16 %v1714_v1  ;;  %1491 = vmatprep.subr.msk.bf16.mxu1 %vm2054_vm14, %v1489_v59  ;;  %v1726_v23 = vunpack.i.h.bf16 %v1724_v0  ;;  %v1725_v24 = vunpack.i.l.bf16 %v1724_v0  ;;  %v484_v59 = vld [vmem:[%s2275_s3] sm:$0xff] }
 0x269   : > { %1494 = vmatpush3.bf16.msk.msra.mxu1 %vm2075_vm6, %v1492_v58  ;;  %1542 = vmatpush1.bf16.msk.msra.mxu0 %vm2097_vm13, %v1540_v61  ;;  %v603_v58 = vld [vmem:[%s2276_s4 + $0x18] sm:$0xff] }
 0x26a   : > { %v1498_v6 = vpack.c.bf16 %v1716_v4, %v1715_v5  ;;  %1497 = vmatprep.subr.msk.bf16.mxu1 %vm2105_vm15, %v1495_v2  ;;  %1543 = vmatprep.subr.bf16.mxu0 %v1842_v37  ;;  %v1552_v19 = vpack.c.bf16 %v1726_v23, %v1725_v24  ;;  %v487_v61 = vld [vmem:[%s2275_s3 + $0x18] sm:$0xff] }
 0x26b   : > { %v1734_v13 = vpop.permute.xlu0 %1733  ;;  %v1729_v15 = vpop.permute.xlu1 %1728 }
 0x26c   : > { %v1736_v16 = vunpack.i.h.bf16 %v1734_v13  ;;  %v1735_v20 = vunpack.i.l.bf16 %v1734_v13  ;;  %v1731_v25 = vunpack.i.h.bf16 %v1729_v15  ;;  %v1730_v26 = vunpack.i.l.bf16 %v1729_v15 }
 0x26d   : > { %1500 = vmatpush3.bf16.msk.msra.mxu1 %vm2097_vm13, %v1498_v6  ;;  %1546 = vmatpush1.bf16.msk.msra.mxu0 %vm2122_vm5, %v1544_v10 }
 0x26e   : > { %v1501_v22 = vpack.c.bf16 %v1736_v16, %v1735_v20  ;;  %1547 = vmatprep.subr.bf16.mxu0 %v1842_v37  ;;  %v1507_v30 = vpack.c.bf16 %v1731_v25, %v1730_v26 }
 0x26f   : > { %v1739_v27 = vpop.permute.xlu0 %1738  ;;  %v1744_v28 = vpop.permute.xlu1 %1743 }
 0x270   : > { %v1746_v17 = vunpack.i.h.bf16 %v1744_v28  ;;  %v1745_v18 = vunpack.i.l.bf16 %v1744_v28  ;;  %1503 = vmatprep.subr.msk.bf16.mxu1 %vm2105_vm15, %v1501_v22  ;;  %v1741_v7 = vunpack.i.h.bf16 %v1739_v27  ;;  %v1740_v8 = vunpack.i.l.bf16 %v1739_v27 }
 0x271   : > { %1550 = vmatpush1.bf16.msk.msra.mxu0 %vm1938_vm2, %v1548_v21 }
 0x272   : > { %v1504_v29 = vpack.c.bf16 %v1746_v17, %v1745_v18  ;;  %1551 = vmatprep.subr.bf16.mxu0 %v1842_v37  ;;  %v1510_v39 = vpack.c.bf16 %v1741_v7, %v1740_v8 }
 0x273   : > { %v1754_v31 = vpop.permute.xlu0 %1753  ;;  %v1749_v33 = vpop.permute.xlu1 %1748 }
 0x274   : > { %v1756_v34 = vunpack.i.h.bf16 %v1754_v31  ;;  %v1755_v35 = vunpack.i.l.bf16 %v1754_v31  ;;  %v1751_v36 = vunpack.i.h.bf16 %v1749_v33  ;;  %v1750_v38 = vunpack.i.l.bf16 %v1749_v33  ;;  %1506 = vmatpush3.bf16.msk.msra.mxu1 %vm2097_vm13, %v1504_v29 }
 0x275   : > { %1509 = vmatprep.subr.msk.bf16.mxu1 %vm2139_vm9, %v1507_v30  ;;  %1554 = vmatpush1.bf16.msk.msra.mxu0 %vm2054_vm14, %v1552_v19 }
 0x276   : > { %v1513_v40 = vpack.c.bf16 %v1756_v34, %v1755_v35  ;;  %v1556_v41 = vpack.c.bf16 %v1751_v36, %v1750_v38  ;;  %1555 = vmatprep.subr.bf16.mxu0 %v1842_v37 }
 0x277   : > { %v1764_v42 = vpop.permute.xlu0 %1763  ;;  %v1759_v44 = vpop.permute.xlu1 %1758 }
 0x278   : > { %v1766_v45 = vunpack.i.h.bf16 %v1764_v42  ;;  %v1765_v46 = vunpack.i.l.bf16 %v1764_v42  ;;  %v1761_v47 = vunpack.i.h.bf16 %v1759_v44  ;;  %v1760_v48 = vunpack.i.l.bf16 %v1759_v44  ;;  %1512 = vmatpush3.bf16.msk.msra.mxu1 %vm2122_vm5, %v1510_v39 }
 0x279   : > { %1515 = vmatprep.subr.msk.bf16.mxu1 %vm2139_vm9, %v1513_v40  ;;  %1558 = vmatpush1.bf16.msk.msra.mxu0 %vm2105_vm15, %v1556_v41 }
 0x27a   : > { %v1560_v49 = vpack.c.bf16 %v1766_v45, %v1765_v46  ;;  %v1516_v50 = vpack.c.bf16 %v1761_v47, %v1760_v48  ;;  %1559 = vmatprep.subr.bf16.mxu0 %v1842_v37  ;;  %v1039_v46 = vld [vmem:[%s2280_s8 + $0x8] sm:$0xff]  ;;  %v1038_v47 = vld [vmem:[%s2280_s8] sm:$0xff] }
 0x27b   : > { %v1769_v51 = vpop.permute.xlu1 %1768  ;;  %v1041_v48 = vld [vmem:[%s2281_s9 + $0x8] sm:$0xff] }
 0x27c   : > { %v1771_v52 = vunpack.i.h.bf16 %v1769_v51  ;;  %v1770_v53 = vunpack.i.l.bf16 %v1769_v51  ;;  %1518 = vmatpush3.bf16.msk.msra.mxu1 %vm2122_vm5, %v1516_v50  ;;  %v1035_v50 = vld [vmem:[%s2279_s7 + $0x8] sm:$0xff] }
 0x27d   : > { %1562 = vmatpush1.bf16.msk.msra.mxu0 %vm2139_vm9, %v1560_v49  ;;  %1567 = vmatprep.subr.bf16.mxu1 %v1842_v37  ;;  %v1040_v49 = vld [vmem:[%s2281_s9] sm:$0xff] }
 0x27e   : > { %v1564_v56 = vpack.c.bf16 %v1771_v52, %v1770_v53  ;;  %1563 = vmatprep.subr.bf16.mxu0 %v1842_v37 }
 0x27f   : > { %838 = vmatmul.mubr.f32.vlgmr.msra.gmra.mrb[0].mxu1 %v600_v54 }
 0x280   : > { %842 = vmatprep.mubr.f32.mxu1 %v604_v55 }
 0x281   : > { %1566 = vmatpush1.bf16.msk.msra.mxu0 %vm2023_vm8, %v1564_v56 }
 0x283   : > { %843 = vmatmul.mubr.f32.gmra.mrb[2].mxu1 %v603_v58 }
 0x284   : > { %994 = vmatmul.mubr.f32.vlgmr.msra.gmra.mrb[6].mxu0 %v484_v59  ;;  %1389 = vmatprep.mubr.msk.f32.mxu1 %vm386_vm0, %v1035_v50 }
 0x285   : > { %1370 = vmatprep.mubr.msk.f32.mxu0 %vm386_vm0, %v487_v61 }
 0x288   : > { %999 = vmatmul.mubr.f32.gmra.mrb[8].mxu0 %v486_v62  ;;  %v1009_v22 = vpop.permute.xlu0 %1008 }
 0x28c   : > { %v1014_v5 = vpop.permute.xlu1 %1013  ;;  %v1028_v7 = vpop.permute.xlu0 %1027 }
 0x290   : > { %v1023_v25 = vpop.permute.xlu1 %1022 }
 0x333   : > { %v1466_v63 = vpop.f32.mrb[4].mxu0 }
 0x334   : > { %v914_v0 = vpop.f32.mrb[5].mxu0 }
 0x352   : > { %v1434_v1 = vpop.f32.mrb[0].mxu1 }
 0x353   : > { %v1435_v2 = vpop.f32.mrb[1].mxu1 }
 0x354   : > { %v1436_v4 = vadd.f32 %v1435_v2, %v1434_v1 }
 0x356   : > { %v1437_v6 = vpop.f32.mrb[2].mxu1  ;;  %v915_v10 = vadd.f32 %v1436_v4, %v914_v0 }
 0x357   : > { %v1438_v13 = vpop.f32.mrb[3].mxu1  ;;  %v995_v15 = vpop.f32.mrb[6].mxu0 }
 0x358   : > { %v1439_v16 = vadd.f32 %v1438_v13, %v1437_v6  ;;  %v996_v20 = vadd.f32 %v995_v15, %v915_v10  ;;  %v997_v21 = vpop.f32.mrb[7].mxu0 }
 0x35a   : > { %v1016_v23 = vmul.f32 %v1009_v22, %v996_v20  ;;  %v920_v24 = vadd.f32 %v1466_v63, %v1439_v16 }
 0x35b   : > { %v1000_v26 = vpop.f32.mrb[8].mxu0 }
 0x35c   : > { %v1001_v27 = vadd.f32 %v1000_v26, %v920_v24  ;;  %v1002_v28 = vpop.f32.mrb[9].mxu0  ;;  %v1030_v17 = vadd.f32 %v1023_v25, %v1016_v23  ;;  %v1037_v26 = vld [vmem:[%s2279_s7 + $0x18] sm:$0xff] }
 0x35e   : > { %v1017_v18 = vmul.f32 %v1014_v5, %v1001_v27  ;;  %v2184_v29 = vmax.f32 %v1030_v17, 0.0 }
 0x360   : > { %v1031_v8 = vadd.f32 %v1028_v7, %v1017_v18 }
 0x362   : > { %v2186_v19 = vmax.f32 %v1031_v8, 0.0 }
 0x364   : > { %v1774_v30 = vpack.i.bf16 %v2186_v19, %v2184_v29  ;;  %v1584_v10 = vpack.c.bf16 %v2186_v19, %v2184_v29 }
 0x366   : > { %1775 = vrot.lane.b32.xlu1 %v1774_v30, %s1832_s27 }
 0x3d8   : > { %v1776_v31 = vpop.permute.xlu1 %1775 }
 0x3d9   : > { %v1778_v33 = vunpack.i.h.bf16 %v1776_v31  ;;  %v1777_v34 = vunpack.i.l.bf16 %v1776_v31 }
 0x3db   : > { %v1044_v35 = vsel %vm492_vm3, %v1777_v34, %v2184_v29  ;;  %v1047_v36 = vsel %vm492_vm3, %v1778_v33, %v2186_v19 }
 0x3dc   : > { %v1779_v38 = vpack.i.bf16 %v1047_v36, %v1044_v35 }
 0x3de   : > { %1780 = vrot.lane.b32.xlu0 %v1779_v38, %s1832_s27 }
 0x450   : > { %v1781_v39 = vpop.permute.xlu0 %1780 }
 0x451   : > { %v1783_v40 = vunpack.i.h.bf16 %v1781_v39  ;;  %v1782_v41 = vunpack.i.l.bf16 %v1781_v39 }
 0x453   : > { %v1053_v42 = vsel %vm492_vm3, %v1783_v40, %v2186_v19  ;;  %v1052_v44 = vsel %vm492_vm3, %v1782_v41, %v2184_v29 }
 0x454   : > { %v1789_v45 = vpack.i.bf16 %v1053_v42, %v1052_v44 }
 0x456   : > { %1790 = vrot.lane.b32.xlu0 %v1789_v45, %s1836_s15  ;;  %1785 = vrot.lane.b32.xlu1 %v1789_v45, %s1834_s29 }
 0x45a   : > { %1800 = vrot.lane.b32.xlu0 %v1789_v45, %s1839_s18  ;;  %1795 = vrot.lane.b32.xlu1 %v1789_v45, %s1837_s16 }
 0x45e   : > { %1810 = vrot.lane.b32.xlu0 %v1789_v45, %s1838_s17  ;;  %1805 = vrot.lane.b32.xlu1 %v1789_v45, %s1835_s12 }
 0x462   : > { %1820 = vrot.lane.b32.xlu0 %v1789_v45, %s1833_s28  ;;  %1815 = vrot.lane.b32.xlu1 %v1789_v45, %s1840_s19 }
 0x466   : > { %1210 = vperm.xlu0 %1772, %v1039_v46   ;;  %1205 = vperm.xlu1 %1773, %v1038_v47  }
 0x46a   : > { %1222 = vperm.xlu0 %1772, %v1041_v48   ;;  %1217 = vperm.xlu1 %1773, %v1040_v49  }
 0x4c8   : > { %v1791_v51 = vpop.permute.xlu0 %1790  ;;  %v1786_v52 = vpop.permute.xlu1 %1785 }
 0x4c9   : > { %v1788_v53 = vunpack.i.h.bf16 %v1786_v52  ;;  %v1787_v54 = vunpack.i.l.bf16 %v1786_v52  ;;  %v1793_v55 = vunpack.i.h.bf16 %v1791_v51  ;;  %v1792_v56 = vunpack.i.l.bf16 %v1791_v51 }
 0x4cb   : > { %v1568_v58 = vpack.c.bf16 %v1788_v53, %v1787_v54  ;;  %v1572_v61 = vpack.c.bf16 %v1793_v55, %v1792_v56 }
 0x4cc   : > { %v1796_v59 = vpop.permute.xlu1 %1795  ;;  %v1801_v0 = vpop.permute.xlu0 %1800 }
 0x4cd   : > { %1570 = vmatpush1.bf16.msk.msra.mxu1 %vm2031_vm10, %v1568_v58  ;;  %v1798_v62 = vunpack.i.h.bf16 %v1796_v59  ;;  %v1797_v63 = vunpack.i.l.bf16 %v1796_v59  ;;  %v1803_v1 = vunpack.i.h.bf16 %v1801_v0  ;;  %v1802_v2 = vunpack.i.l.bf16 %v1801_v0 }
 0x4ce   : > { %1571 = vmatprep.subr.bf16.mxu1 %v1842_v37 }
 0x4cf   : > { %v1576_v4 = vpack.c.bf16 %v1798_v62, %v1797_v63  ;;  %v1580_v12 = vpack.c.bf16 %v1803_v1, %v1802_v2 }
 0x4d0   : > { %v1806_v5 = vpop.permute.xlu1 %1805  ;;  %v1811_v13 = vpop.permute.xlu0 %1810 }
 0x4d1   : > { %1574 = vmatpush1.bf16.msk.msra.mxu1 %vm2075_vm6, %v1572_v61  ;;  %v1808_v6 = vunpack.i.h.bf16 %v1806_v5  ;;  %v1807_v43 = vunpack.i.l.bf16 %v1806_v5  ;;  %v1813_v57 = vunpack.i.h.bf16 %v1811_v13  ;;  %v1812_v15 = vunpack.i.l.bf16 %v1811_v13 }
 0x4d2   : > { %1575 = vmatprep.subr.bf16.mxu1 %v1842_v37 }
 0x4d3   : > { %v1588_v16 = vpack.c.bf16 %v1808_v6, %v1807_v43  ;;  %v1592_v9 = vpack.c.bf16 %v1813_v57, %v1812_v15 }
 0x4d4   : > { %v1816_v20 = vpop.permute.xlu1 %1815  ;;  %v1821_v23 = vpop.permute.xlu0 %1820 }
 0x4d5   : > { %1578 = vmatpush1.bf16.msk.msra.mxu1 %vm2097_vm13, %v1576_v4  ;;  %v1818_v21 = vunpack.i.h.bf16 %v1816_v20  ;;  %v1817_v22 = vunpack.i.l.bf16 %v1816_v20  ;;  %v1823_v14 = vunpack.i.h.bf16 %v1821_v23  ;;  %v1822_v24 = vunpack.i.l.bf16 %v1821_v23 }
 0x4d6   : > { %1579 = vmatprep.subr.bf16.mxu1 %v1842_v37 }
 0x4d7   : > { %v1596_v25 = vpack.c.bf16 %v1818_v21, %v1817_v22  ;;  %v1600_v32 = vpack.c.bf16 %v1823_v14, %v1822_v24 }
 0x4d9   : > { %1582 = vmatpush1.bf16.msk.msra.mxu1 %vm2122_vm5, %v1580_v12 }
 0x4da   : > { %1583 = vmatprep.subr.bf16.mxu1 %v1842_v37 }
 0x4dd   : > { %1586 = vmatpush1.bf16.msk.msra.mxu1 %vm1938_vm2, %v1584_v10 }
 0x4de   : > { %1587 = vmatprep.subr.bf16.mxu1 %v1842_v37 }
 0x4e1   : > { %1590 = vmatpush1.bf16.msk.msra.mxu1 %vm2054_vm14, %v1588_v16 }
 0x4e2   : > { %1591 = vmatprep.subr.bf16.mxu1 %v1842_v37 }
 0x4e5   : > { %1594 = vmatpush1.bf16.msk.msra.mxu1 %vm2105_vm15, %v1592_v9  ;;  %v1206_v11 = vpop.permute.xlu1 %1205  ;;  %v1211_v27 = vpop.permute.xlu0 %1210 }
 0x4e6   : > { %1595 = vmatprep.subr.bf16.mxu1 %v1842_v37 }
 0x4e9   : > { %1598 = vmatpush1.bf16.msk.msra.mxu1 %vm2139_vm9, %v1596_v25  ;;  %v1218_v18 = vpop.permute.xlu1 %1217  ;;  %v1223_v31 = vpop.permute.xlu0 %1222 }
 0x4ea   : > { %1599 = vmatprep.subr.bf16.mxu1 %v1842_v37  ;;  %v1036_v37 = vld [vmem:[%s2279_s7 + $0x10] sm:$0xff] }
 0x4ed   : > { %1602 = vmatpush1.bf16.msk.msra.mxu1 %vm2023_vm8, %v1600_v32 }
 0x4f0   : > { %1193 = vmatmul.mubr.f32.vlgmr.msra.gmra.mrb[4].mxu1 %v1034_v60 }
 0x4f1   : > { %1390 = vmatprep.mubr.msk.f32.mxu1 %vm386_vm0, %v1037_v26 }
 0x4f4   : > { %1198 = vmatmul.mubr.f32.gmra.mrb[6].mxu1 %v1036_v37 }
 0x5c3   : > { %v1194_v3 = vpop.f32.mrb[4].mxu1 }
 0x5c4   : > { %v1213_v28 = vmul.f32 %v1206_v11, %v1194_v3  ;;  %v1196_v17 = vpop.f32.mrb[5].mxu1 }
 0x5c6   : > { %v1225_v7 = vadd.f32 %v1218_v18, %v1213_v28 }
 0x5c7   : > { %v1199_v8 = vpop.f32.mrb[6].mxu1 }
 0x5c8   : > { %v1227_v29 = vmax.f32 %v1225_v7, 0.0  ;;  %v1214_v19 = vmul.f32 %v1211_v27, %v1199_v8  ;;  %v1201_v30 = vpop.f32.mrb[7].mxu1 }
 0x5ca   : > { %1229 = vst.msk [vmem:[%s379_s22] sm:$0xff] %vm766_vm4, %v1227_v29  ;;  %v1226_v33 = vadd.f32 %v1223_v31, %v1214_v19 }
 0x5cc   : > { %v1228_v34 = vmax.f32 %v1226_v33, 0.0 }
 0x5ce   : > { %1230 = vst.msk [vmem:[%s379_s22 + $0x8] sm:$0xff] %vm766_vm4, %v1228_v34 }
 0x5cf PF: > { %s20_s13 = sadd.s32 1, %s1830_s13  }
 0x5d0   : > { %p17_p4 = scmp.ge.s32.totalorder %s20_s13, 4  }
 0x5d2   :  { %19 = sbr.rel (!%p17_p4) target bundleno = 1 (0x1), region = 93 }

</bundles_post_ra>
